<compile_context>
chip_gen: v7x
topology: tpu7x:2x2x1
jax: 0.10.0
libtpu: 0.0.40
codegen_flags: <defaults>
</compile_context>

<pallas_src>
import jax
import jax.numpy as jnp
from jax.experimental import pallas as pl
from jax.experimental.pallas import tpu as pltpu  # noqa: F401  (TPU backend)

# ------------------------- model hyper-parameters (small) -------------------------
BATCH = 2
IN_CH = 3
IMG = 16
PATCH = 4
HIDDEN = 32
HEADS = 4
HEAD_DIM = HIDDEN // HEADS
MLP_DIM = 4 * HIDDEN
LAYERS = 2
NUM_CLASSES = 10
LN_EPS = 1e-6  # dinov2 layer_norm_eps
N_PATCH = (IMG // PATCH) ** 2
SEQ = N_PATCH + 1


# ------------------------------ in-kernel helpers ----------------------------------
def _layer_norm(x, g, b):
    mu = jnp.mean(x, axis=-1, keepdims=True)
    var = jnp.mean((x - mu) ** 2, axis=-1, keepdims=True)
    return (x - mu) * jax.lax.rsqrt(var + LN_EPS) * g + b


def _gelu_tanh(x):
    # tanh-approx GELU: tanh goes to the EUP slot instead of a 12-op VALU erf
    # polynomial.  Deviates from exact-erf torch.nn.GELU by <~1e-3 relative.
    return 0.5 * x * (1.0 + jnp.tanh(0.7978845608028654 * (x + 0.044715 * x * x * x)))


# --------------------------------- fused kernel ------------------------------------
def _vit_fused_kernel(
    tok_ref, patch_w_ref, add_ref, attn_bias_ref, pool_ref,
    ln1_g_ref, ln1_b_ref,
    qw_ref, qb_ref, kw_ref, kb_ref, vw_ref, vb_ref,
    ow_ref, ob_ref, ls1_ref,
    ln2_g_ref, ln2_b_ref, fc1_w_ref, fc1_b_ref, fc2_w_ref, fc2_b_ref, ls2_ref,
    fln_g_ref, fln_b_ref, cls_w_ref, cls_b_ref,
    out_ref,
):
    f32 = jnp.float32
    bf16 = jnp.bfloat16

    # Patch embedding (conv-as-matmul, bf16 operands / f32 accumulate) + CLS/pos add.
    # CLS rows of `tok` are zeros; `add` carries (cls + pos[0]) on CLS rows and
    # (patch_bias + pos[1+p]) on patch rows, so one matmul + one add builds h0.
    h = jnp.dot(tok_ref[...], patch_w_ref[...], preferred_element_type=f32) + add_ref[...]
    attn_bias = attn_bias_ref[...]  # 0 within a batch element, -1e9 across batch elements

    for l in range(LAYERS):  # statically unrolled (LAYERS = 2)
        # ---------------- attention block (pre-LN) ----------------
        # Head-major packed weights: per-head projections produce (B*S, Dh) directly
        # (no 8-lane slices of a QKV slab), and the output projection is accumulated
        # per head through the matching (Dh, D) slice of o_w (no head concat).
        x = _layer_norm(h, ln1_g_ref[l], ln1_b_ref[l])
        x_b = x.astype(bf16)
        attn_acc = None
        for hh in range(HEADS):  # statically unrolled (HEADS = 4)
            q_h = jnp.dot(x_b, qw_ref[l, hh], preferred_element_type=f32) + qb_ref[l, hh]
            k_h = jnp.dot(x_b, kw_ref[l, hh], preferred_element_type=f32) + kb_ref[l, hh]
            v_h = jnp.dot(x_b, vw_ref[l, hh], preferred_element_type=f32) + vb_ref[l, hh]
            # scores: contract last dims of q and k (q @ k^T without explicit transpose).
            # q already carries the 1/sqrt(Dh) scale (folded into weights at pack time).
            s = jax.lax.dot_general(q_h.astype(bf16), k_h.astype(bf16),
                                    (((1,), (1,)), ((), ())),
                                    preferred_element_type=f32)
            s = s + attn_bias
            s = s - jnp.max(s, axis=-1, keepdims=True)   # kept for exp-range safety
            p = jnp.exp(s)
            p = p * pl.reciprocal(jnp.sum(p, axis=-1, keepdims=True), approx=True)
            av = jnp.dot(p.astype(bf16), v_h.astype(bf16), preferred_element_type=f32)
            contrib = jnp.dot(av.astype(bf16), ow_ref[l, hh], preferred_element_type=f32)
            attn_acc = contrib if attn_acc is None else attn_acc + contrib
        attn_acc = attn_acc + ob_ref[l]
        h = h + attn_acc * ls1_ref[l]                     # LayerScale1 + residual

        # ---------------- MLP block (pre-LN) ----------------
        x = _layer_norm(h, ln2_g_ref[l], ln2_b_ref[l])
        m = jnp.dot(x.astype(bf16), fc1_w_ref[l], preferred_element_type=f32) + fc1_b_ref[l]
        m = _gelu_tanh(m)
        m = jnp.dot(m.astype(bf16), fc2_w_ref[l], preferred_element_type=f32) + fc2_b_ref[l]
        h = h + m * ls2_ref[l]                            # LayerScale2 + residual

    # final LayerNorm -> last_hidden_state
    x = _layer_norm(h, fln_g_ref[...], fln_b_ref[...])
    # features = last_hidden_state.mean(dim=1), as a constant pooling matmul (B, B*S)@(B*S, D)
    feats = jnp.dot(pool_ref[...], x, preferred_element_type=f32)
    # logits = classifier(features)   (tiny; kept f32 for output accuracy)
    out_ref[...] = jnp.dot(feats, cls_w_ref[...], preferred_element_type=f32) + cls_b_ref[...]


# ----------------------------------- parameters ------------------------------------
def init_params(key):
    # TODO(synk): real facebook/dinov2-base pretrained weights need file/network I/O;
    # using deterministic random init at reduced dims instead.
    def nrm(key, shape, std=0.02):
        return (jax.random.normal(key, shape, jnp.float32) * std).astype(jnp.float32)

    keys = iter(jax.random.split(key, 16 + LAYERS * 16))
    params = {
        "patch_w": nrm(next(keys), (IN_CH * PATCH * PATCH, HIDDEN)),
        "patch_b": jnp.zeros((HIDDEN,), jnp.float32),
        "cls_token": nrm(next(keys), (1, 1, HIDDEN)),
        "pos_embed": nrm(next(keys), (1, SEQ, HIDDEN)),
        "final_ln_g": jnp.ones((HIDDEN,), jnp.float32),
        "final_ln_b": jnp.zeros((HIDDEN,), jnp.float32),
        "cls_w": nrm(next(keys), (HIDDEN, NUM_CLASSES)),
        "cls_b": jnp.zeros((NUM_CLASSES,), jnp.float32),
        "layers": [],
    }
    for _ in range(LAYERS):
        layer = {
            "ln1_g": jnp.ones((HIDDEN,), jnp.float32),
            "ln1_b": jnp.zeros((HIDDEN,), jnp.float32),
            "q_w": nrm(next(keys), (HIDDEN, HIDDEN)),
            "q_b": jnp.zeros((HIDDEN,), jnp.float32),
            "k_w": nrm(next(keys), (HIDDEN, HIDDEN)),
            "k_b": jnp.zeros((HIDDEN,), jnp.float32),
            "v_w": nrm(next(keys), (HIDDEN, HIDDEN)),
            "v_b": jnp.zeros((HIDDEN,), jnp.float32),
            "o_w": nrm(next(keys), (HIDDEN, HIDDEN)),
            "o_b": jnp.zeros((HIDDEN,), jnp.float32),
            "ls1": jnp.ones((HIDDEN,), jnp.float32),   # LayerScale lambda1
            "ln2_g": jnp.ones((HIDDEN,), jnp.float32),
            "ln2_b": jnp.zeros((HIDDEN,), jnp.float32),
            "fc1_w": nrm(next(keys), (HIDDEN, MLP_DIM)),
            "fc1_b": jnp.zeros((MLP_DIM,), jnp.float32),
            "fc2_w": nrm(next(keys), (MLP_DIM, HIDDEN)),
            "fc2_b": jnp.zeros((HIDDEN,), jnp.float32),
            "ls2": jnp.ones((HIDDEN,), jnp.float32),   # LayerScale lambda2
        }
        params["layers"].append(layer)
    return params


def pack_params(params):
    """One-time, forward-path-free packing of weights into kernel-ready arrays.

    * per-head Q/K/V weights head-major (L, HEADS, D, Dh), 1/sqrt(Dh) folded into Q
    * o_w split per head (L, HEADS, Dh, D) so the output projection accumulates per head
    * cls token + positional embedding + patch bias fused into one additive slab
    * attention cross-batch mask and mean-pool matrix precomputed (shape-only constants)
    * all matmul weights cast to bf16; biases / LN / LayerScale params stay f32
    """
    f32 = jnp.float32
    wdt = jnp.bfloat16
    L, D, Dh, H = LAYERS, HIDDEN, HEAD_DIM, HEADS
    B, S = BATCH, SEQ
    layers = params["layers"]
    scale = float(Dh) ** -0.5

    pos = params["pos_embed"][0]                     # (S, D)
    cls = params["cls_token"][0, 0]                  # (D,)
    add_row = jnp.concatenate(
        [(cls + pos[0])[None, :], pos[1:] + params["patch_b"][None, :]], axis=0)  # (S, D)
    add_full = jnp.tile(add_row, (B, 1)).astype(f32)            # (B*S, D)

    row_batch = jnp.repeat(jnp.arange(B), S)                    # (B*S,)
    attn_bias = jnp.where(row_batch[:, None] == row_batch[None, :], 0.0, -1e9).astype(f32)
    pool_mat = jnp.where(jnp.arange(B)[:, None] == row_batch[None, :],
                         1.0 / S, 0.0).astype(f32)              # (B, B*S)

    def head_w(name, pre=1.0):
        w = jnp.stack([ly[name] for ly in layers]) * pre        # (L, D, D)
        return w.reshape(L, D, H, Dh).transpose(0, 2, 1, 3).astype(wdt)  # (L, H, D, Dh)

    def head_b(name, pre=1.0):
        b = jnp.stack([ly[name] for ly in layers]) * pre        # (L, D)
        return b.reshape(L, H, 1, Dh).astype(f32)               # (L, H, 1, Dh)

    vec = lambda name: jnp.stack([ly[name][None, :] for ly in layers]).astype(f32)  # (L,1,N)
    mat = lambda name: jnp.stack([ly[name] for ly in layers]).astype(wdt)           # (L,K,N)

    o_w = jnp.stack([ly["o_w"] for ly in layers]).reshape(L, H, Dh, D).astype(wdt)

    return (
        params["patch_w"].astype(wdt), add_full, attn_bias, pool_mat,
        vec("ln1_g"), vec("ln1_b"),
        head_w("q_w", scale), head_b("q_b", scale),
        head_w("k_w"), head_b("k_b"),
        head_w("v_w"), head_b("v_b"),
        o_w, vec("o_b"), vec("ls1"),
        vec("ln2_g"), vec("ln2_b"),
        mat("fc1_w"), vec("fc1_b"),
        mat("fc2_w"), vec("fc2_b"), vec("ls2"),
        params["final_ln_g"][None, :].astype(f32), params["final_ln_b"][None, :].astype(f32),
        params["cls_w"].astype(f32), params["cls_b"][None, :].astype(f32),
    )


# ------------------------------------ forward ---------------------------------------
def combined_model_forward(x_nchw, packed):
    """Per-call work: data-dependent patch extraction + one fused pallas_call."""
    B, C, H, W = x_nchw.shape
    P = PATCH
    nh, nw = H // P, W // P
    n_patches = nh * nw
    S = n_patches + 1

    # patch extraction: NCHW -> (B, Np, C*P*P), same (C,P,P) flatten order as conv weight
    patches = x_nchw.reshape(B, C, nh, P, nw, P).transpose(0, 2, 4, 1, 3, 5)
    patches = patches.reshape(B, n_patches, C * P * P)
    # prepend a zero row per batch element for the CLS position
    tok = jnp.concatenate([jnp.zeros((B, 1, C * P * P), x_nchw.dtype), patches], axis=1)
    tok = tok.reshape(B * S, C * P * P).astype(jnp.bfloat16)

    # Single fused pallas_call: all weights + activations (<~150 KB) live in VMEM.
    return pl.pallas_call(
        _vit_fused_kernel,
        out_shape=jax.ShapeDtypeStruct((B, NUM_CLASSES), jnp.float32),
    )(tok, *packed)


# -------------------------------------- main ----------------------------------------
if __name__ == "__main__":
    key = jax.random.PRNGKey(0)
    k_x, k_p = jax.random.split(key)
    x = jax.random.normal(k_x, (BATCH, IN_CH, IMG, IMG), jnp.float32)  # NCHW like PyTorch
    params = init_params(k_p)
    packed = pack_params(params)          # one-time packing, hoisted out of the forward path

    fwd = jax.jit(combined_model_forward)
    out = jax.block_until_ready(fwd(x, packed))

    assert out.shape == (BATCH, NUM_CLASSES), out.shape
    assert bool(jnp.all(jnp.isfinite(out)))
    print("KERNEL_OK")
</pallas_src>

<mosaic_0001>
module attributes {stable_mosaic.version = 11 : i64} {
  func.func @_vit_fused_kernel(%arg0: memref<34x48xbf16, #tpu.memory_space<vmem>>, %arg1: memref<48x32xbf16, #tpu.memory_space<vmem>>, %arg2: memref<34x32xf32, #tpu.memory_space<vmem>>, %arg3: memref<34x34xf32, #tpu.memory_space<vmem>>, %arg4: memref<2x34xf32, #tpu.memory_space<vmem>>, %arg5: memref<2x1x32xf32, #tpu.memory_space<vmem>>, %arg6: memref<2x1x32xf32, #tpu.memory_space<vmem>>, %arg7: memref<2x4x32x8xbf16, #tpu.memory_space<vmem>>, %arg8: memref<2x4x1x8xf32, #tpu.memory_space<vmem>>, %arg9: memref<2x4x32x8xbf16, #tpu.memory_space<vmem>>, %arg10: memref<2x4x1x8xf32, #tpu.memory_space<vmem>>, %arg11: memref<2x4x32x8xbf16, #tpu.memory_space<vmem>>, %arg12: memref<2x4x1x8xf32, #tpu.memory_space<vmem>>, %arg13: memref<2x4x8x32xbf16, #tpu.memory_space<vmem>>, %arg14: memref<2x1x32xf32, #tpu.memory_space<vmem>>, %arg15: memref<2x1x32xf32, #tpu.memory_space<vmem>>, %arg16: memref<2x1x32xf32, #tpu.memory_space<vmem>>, %arg17: memref<2x1x32xf32, #tpu.memory_space<vmem>>, %arg18: memref<2x32x128xbf16, #tpu.memory_space<vmem>>, %arg19: memref<2x1x128xf32, #tpu.memory_space<vmem>>, %arg20: memref<2x128x32xbf16, #tpu.memory_space<vmem>>, %arg21: memref<2x1x32xf32, #tpu.memory_space<vmem>>, %arg22: memref<2x1x32xf32, #tpu.memory_space<vmem>>, %arg23: memref<1x32xf32, #tpu.memory_space<vmem>>, %arg24: memref<1x32xf32, #tpu.memory_space<vmem>>, %arg25: memref<32x10xf32, #tpu.memory_space<vmem>>, %arg26: memref<1x10xf32, #tpu.memory_space<vmem>>, %arg27: memref<2x10xf32, #tpu.memory_space<vmem>>) attributes {dimension_semantics = [], scalar_prefetch = 0 : i64, scratch_operands = 0 : i64, tpu.core_type = #tpu.core_type<tc>} {
    %c0 = arith.constant 0 : index
    %c0_0 = arith.constant 0 : index
    %0 = vector.load %arg0[%c0, %c0_0] : memref<34x48xbf16, #tpu.memory_space<vmem>>, vector<34x48xbf16>
    %c0_1 = arith.constant 0 : index
    %c0_2 = arith.constant 0 : index
    %1 = vector.load %arg1[%c0_1, %c0_2] : memref<48x32xbf16, #tpu.memory_space<vmem>>, vector<48x32xbf16>
    %cst = arith.constant dense<0.000000e+00> : vector<34x32xf32>
    %2 = tpu.matmul %0, %1, %cst {dimension_numbers = #tpu.dot_dimension_numbers<[1], [0], [0], [1], [0, 0, 1, 1], [], []>} : vector<34x48xbf16>, vector<48x32xbf16>, vector<34x32xf32> -> vector<34x32xf32>
    %c0_3 = arith.constant 0 : index
    %c0_4 = arith.constant 0 : index
    %3 = vector.load %arg2[%c0_3, %c0_4] : memref<34x32xf32, #tpu.memory_space<vmem>>, vector<34x32xf32>
    %4 = arith.addf %2, %3 : vector<34x32xf32>
    %c0_5 = arith.constant 0 : index
    %c0_6 = arith.constant 0 : index
    %5 = vector.load %arg3[%c0_5, %c0_6] : memref<34x34xf32, #tpu.memory_space<vmem>>, vector<34x34xf32>
    %c0_7 = arith.constant 0 : index
    %c0_8 = arith.constant 0 : index
    %c0_9 = arith.constant 0 : index
    %6 = vector.load %arg5[%c0_7, %c0_8, %c0_9] : memref<2x1x32xf32, #tpu.memory_space<vmem>>, vector<1x1x32xf32>
    %7 = vector.shape_cast %6 : vector<1x1x32xf32> to vector<1x32xf32>
    %c0_10 = arith.constant 0 : index
    %c0_11 = arith.constant 0 : index
    %c0_12 = arith.constant 0 : index
    %8 = vector.load %arg6[%c0_10, %c0_11, %c0_12] : memref<2x1x32xf32, #tpu.memory_space<vmem>>, vector<1x1x32xf32>
    %9 = vector.shape_cast %8 : vector<1x1x32xf32> to vector<1x32xf32>
    %cst_13 = arith.constant dense<0.000000e+00> : vector<34xf32>
    %10 = vector.multi_reduction <add>, %4, %cst_13 [1] : vector<34x32xf32> to vector<34xf32>
    %11 = vector.shape_cast %10 : vector<34xf32> to vector<34x1xf32>
    %cst_14 = arith.constant 3.200000e+01 : f32
    %12 = vector.broadcast %cst_14 : f32 to vector<34x1xf32>
    %13 = arith.divf %11, %12 : vector<34x1xf32>
    %14 = vector.broadcast %13 : vector<34x1xf32> to vector<34x32xf32>
    %15 = arith.subf %4, %14 : vector<34x32xf32>
    %16 = arith.mulf %15, %15 : vector<34x32xf32>
    %cst_15 = arith.constant dense<0.000000e+00> : vector<34xf32>
    %17 = vector.multi_reduction <add>, %16, %cst_15 [1] : vector<34x32xf32> to vector<34xf32>
    %18 = vector.shape_cast %17 : vector<34xf32> to vector<34x1xf32>
    %cst_16 = arith.constant 3.200000e+01 : f32
    %19 = vector.broadcast %cst_16 : f32 to vector<34x1xf32>
    %20 = arith.divf %18, %19 : vector<34x1xf32>
    %21 = vector.broadcast %13 : vector<34x1xf32> to vector<34x32xf32>
    %22 = arith.subf %4, %21 : vector<34x32xf32>
    %cst_17 = arith.constant 9.99999997E-7 : f32
    %23 = vector.broadcast %cst_17 : f32 to vector<34x1xf32>
    %24 = arith.addf %20, %23 : vector<34x1xf32>
    %25 = math.rsqrt %24 : vector<34x1xf32>
    %26 = vector.broadcast %25 : vector<34x1xf32> to vector<34x32xf32>
    %27 = arith.mulf %22, %26 : vector<34x32xf32>
    %28 = vector.broadcast %7 : vector<1x32xf32> to vector<34x32xf32>
    %29 = arith.mulf %27, %28 : vector<34x32xf32>
    %30 = vector.broadcast %9 : vector<1x32xf32> to vector<34x32xf32>
    %31 = arith.addf %29, %30 : vector<34x32xf32>
    %32 = arith.truncf %31 : vector<34x32xf32> to vector<34x32xbf16>
    %c0_18 = arith.constant 0 : index
    %c0_19 = arith.constant 0 : index
    %c0_20 = arith.constant 0 : index
    %c0_21 = arith.constant 0 : index
    %33 = vector.load %arg7[%c0_18, %c0_19, %c0_20, %c0_21] : memref<2x4x32x8xbf16, #tpu.memory_space<vmem>>, vector<1x1x32x8xbf16>
    %34 = vector.shape_cast %33 : vector<1x1x32x8xbf16> to vector<32x8xbf16>
    %cst_22 = arith.constant dense<0.000000e+00> : vector<34x8xf32>
    %35 = tpu.matmul %32, %34, %cst_22 {dimension_numbers = #tpu.dot_dimension_numbers<[1], [0], [0], [1], [0, 0, 1, 1], [], []>} : vector<34x32xbf16>, vector<32x8xbf16>, vector<34x8xf32> -> vector<34x8xf32>
    %c0_23 = arith.constant 0 : index
    %c0_24 = arith.constant 0 : index
    %c0_25 = arith.constant 0 : index
    %c0_26 = arith.constant 0 : index
    %36 = vector.load %arg8[%c0_23, %c0_24, %c0_25, %c0_26] : memref<2x4x1x8xf32, #tpu.memory_space<vmem>>, vector<1x1x1x8xf32>
    %37 = vector.shape_cast %36 : vector<1x1x1x8xf32> to vector<1x8xf32>
    %38 = vector.broadcast %37 : vector<1x8xf32> to vector<34x8xf32>
    %39 = arith.addf %35, %38 : vector<34x8xf32>
    %c0_27 = arith.constant 0 : index
    %c0_28 = arith.constant 0 : index
    %c0_29 = arith.constant 0 : index
    %c0_30 = arith.constant 0 : index
    %40 = vector.load %arg9[%c0_27, %c0_28, %c0_29, %c0_30] : memref<2x4x32x8xbf16, #tpu.memory_space<vmem>>, vector<1x1x32x8xbf16>
    %41 = vector.shape_cast %40 : vector<1x1x32x8xbf16> to vector<32x8xbf16>
    %cst_31 = arith.constant dense<0.000000e+00> : vector<34x8xf32>
    %42 = tpu.matmul %32, %41, %cst_31 {dimension_numbers = #tpu.dot_dimension_numbers<[1], [0], [0], [1], [0, 0, 1, 1], [], []>} : vector<34x32xbf16>, vector<32x8xbf16>, vector<34x8xf32> -> vector<34x8xf32>
    %c0_32 = arith.constant 0 : index
    %c0_33 = arith.constant 0 : index
    %c0_34 = arith.constant 0 : index
    %c0_35 = arith.constant 0 : index
    %43 = vector.load %arg10[%c0_32, %c0_33, %c0_34, %c0_35] : memref<2x4x1x8xf32, #tpu.memory_space<vmem>>, vector<1x1x1x8xf32>
    %44 = vector.shape_cast %43 : vector<1x1x1x8xf32> to vector<1x8xf32>
    %45 = vector.broadcast %44 : vector<1x8xf32> to vector<34x8xf32>
    %46 = arith.addf %42, %45 : vector<34x8xf32>
    %c0_36 = arith.constant 0 : index
    %c0_37 = arith.constant 0 : index
    %c0_38 = arith.constant 0 : index
    %c0_39 = arith.constant 0 : index
    %47 = vector.load %arg11[%c0_36, %c0_37, %c0_38, %c0_39] : memref<2x4x32x8xbf16, #tpu.memory_space<vmem>>, vector<1x1x32x8xbf16>
    %48 = vector.shape_cast %47 : vector<1x1x32x8xbf16> to vector<32x8xbf16>
    %cst_40 = arith.constant dense<0.000000e+00> : vector<34x8xf32>
    %49 = tpu.matmul %32, %48, %cst_40 {dimension_numbers = #tpu.dot_dimension_numbers<[1], [0], [0], [1], [0, 0, 1, 1], [], []>} : vector<34x32xbf16>, vector<32x8xbf16>, vector<34x8xf32> -> vector<34x8xf32>
    %c0_41 = arith.constant 0 : index
    %c0_42 = arith.constant 0 : index
    %c0_43 = arith.constant 0 : index
    %c0_44 = arith.constant 0 : index
    %50 = vector.load %arg12[%c0_41, %c0_42, %c0_43, %c0_44] : memref<2x4x1x8xf32, #tpu.memory_space<vmem>>, vector<1x1x1x8xf32>
    %51 = vector.shape_cast %50 : vector<1x1x1x8xf32> to vector<1x8xf32>
    %52 = vector.broadcast %51 : vector<1x8xf32> to vector<34x8xf32>
    %53 = arith.addf %49, %52 : vector<34x8xf32>
    %54 = arith.truncf %39 : vector<34x8xf32> to vector<34x8xbf16>
    %55 = arith.truncf %46 : vector<34x8xf32> to vector<34x8xbf16>
    %cst_45 = arith.constant dense<0.000000e+00> : vector<34x34xf32>
    %56 = tpu.matmul %54, %55, %cst_45 {dimension_numbers = #tpu.dot_dimension_numbers<[1], [1], [0], [0], [0, 0, 1, 0], [], []>} : vector<34x8xbf16>, vector<34x8xbf16>, vector<34x34xf32> -> vector<34x34xf32>
    %57 = arith.addf %56, %5 : vector<34x34xf32>
    %cst_46 = arith.constant dense<0xFF800000> : vector<34xf32>
    %58 = vector.multi_reduction <maximumf>, %57, %cst_46 [1] : vector<34x34xf32> to vector<34xf32>
    %59 = vector.shape_cast %58 : vector<34xf32> to vector<34x1xf32>
    %60 = vector.broadcast %59 : vector<34x1xf32> to vector<34x34xf32>
    %61 = arith.subf %57, %60 : vector<34x34xf32>
    %62 = math.exp %61 : vector<34x34xf32>
    %cst_47 = arith.constant dense<0.000000e+00> : vector<34xf32>
    %63 = vector.multi_reduction <add>, %62, %cst_47 [1] : vector<34x34xf32> to vector<34xf32>
    %64 = vector.shape_cast %63 : vector<34xf32> to vector<34x1xf32>
    %65 = tpu.reciprocal %64 {approx = true} : vector<34x1xf32> -> vector<34x1xf32>
    %66 = vector.broadcast %65 : vector<34x1xf32> to vector<34x34xf32>
    %67 = arith.mulf %62, %66 : vector<34x34xf32>
    %68 = arith.truncf %67 : vector<34x34xf32> to vector<34x34xbf16>
    %69 = arith.truncf %53 : vector<34x8xf32> to vector<34x8xbf16>
    %cst_48 = arith.constant dense<0.000000e+00> : vector<34x8xf32>
    %70 = tpu.matmul %68, %69, %cst_48 {dimension_numbers = #tpu.dot_dimension_numbers<[1], [0], [0], [1], [0, 0, 1, 1], [], []>} : vector<34x34xbf16>, vector<34x8xbf16>, vector<34x8xf32> -> vector<34x8xf32>
    %71 = arith.truncf %70 : vector<34x8xf32> to vector<34x8xbf16>
    %c0_49 = arith.constant 0 : index
    %c0_50 = arith.constant 0 : index
    %c0_51 = arith.constant 0 : index
    %c0_52 = arith.constant 0 : index
    %72 = vector.load %arg13[%c0_49, %c0_50, %c0_51, %c0_52] : memref<2x4x8x32xbf16, #tpu.memory_space<vmem>>, vector<1x1x8x32xbf16>
    %73 = vector.shape_cast %72 : vector<1x1x8x32xbf16> to vector<8x32xbf16>
    %cst_53 = arith.constant dense<0.000000e+00> : vector<34x32xf32>
    %74 = tpu.matmul %71, %73, %cst_53 {dimension_numbers = #tpu.dot_dimension_numbers<[1], [0], [0], [1], [0, 0, 1, 1], [], []>} : vector<34x8xbf16>, vector<8x32xbf16>, vector<34x32xf32> -> vector<34x32xf32>
    %c0_54 = arith.constant 0 : index
    %c1 = arith.constant 1 : index
    %c0_55 = arith.constant 0 : index
    %c0_56 = arith.constant 0 : index
    %75 = vector.load %arg7[%c0_54, %c1, %c0_55, %c0_56] : memref<2x4x32x8xbf16, #tpu.memory_space<vmem>>, vector<1x1x32x8xbf16>
    %76 = vector.shape_cast %75 : vector<1x1x32x8xbf16> to vector<32x8xbf16>
    %cst_57 = arith.constant dense<0.000000e+00> : vector<34x8xf32>
    %77 = tpu.matmul %32, %76, %cst_57 {dimension_numbers = #tpu.dot_dimension_numbers<[1], [0], [0], [1], [0, 0, 1, 1], [], []>} : vector<34x32xbf16>, vector<32x8xbf16>, vector<34x8xf32> -> vector<34x8xf32>
    %c0_58 = arith.constant 0 : index
    %c1_59 = arith.constant 1 : index
    %c0_60 = arith.constant 0 : index
    %c0_61 = arith.constant 0 : index
    %78 = vector.load %arg8[%c0_58, %c1_59, %c0_60, %c0_61] : memref<2x4x1x8xf32, #tpu.memory_space<vmem>>, vector<1x1x1x8xf32>
    %79 = vector.shape_cast %78 : vector<1x1x1x8xf32> to vector<1x8xf32>
    %80 = vector.broadcast %79 : vector<1x8xf32> to vector<34x8xf32>
    %81 = arith.addf %77, %80 : vector<34x8xf32>
    %c0_62 = arith.constant 0 : index
    %c1_63 = arith.constant 1 : index
    %c0_64 = arith.constant 0 : index
    %c0_65 = arith.constant 0 : index
    %82 = vector.load %arg9[%c0_62, %c1_63, %c0_64, %c0_65] : memref<2x4x32x8xbf16, #tpu.memory_space<vmem>>, vector<1x1x32x8xbf16>
    %83 = vector.shape_cast %82 : vector<1x1x32x8xbf16> to vector<32x8xbf16>
    %cst_66 = arith.constant dense<0.000000e+00> : vector<34x8xf32>
    %84 = tpu.matmul %32, %83, %cst_66 {dimension_numbers = #tpu.dot_dimension_numbers<[1], [0], [0], [1], [0, 0, 1, 1], [], []>} : vector<34x32xbf16>, vector<32x8xbf16>, vector<34x8xf32> -> vector<34x8xf32>
    %c0_67 = arith.constant 0 : index
    %c1_68 = arith.constant 1 : index
    %c0_69 = arith.constant 0 : index
    %c0_70 = arith.constant 0 : index
    %85 = vector.load %arg10[%c0_67, %c1_68, %c0_69, %c0_70] : memref<2x4x1x8xf32, #tpu.memory_space<vmem>>, vector<1x1x1x8xf32>
    %86 = vector.shape_cast %85 : vector<1x1x1x8xf32> to vector<1x8xf32>
    %87 = vector.broadcast %86 : vector<1x8xf32> to vector<34x8xf32>
    %88 = arith.addf %84, %87 : vector<34x8xf32>
    %c0_71 = arith.constant 0 : index
    %c1_72 = arith.constant 1 : index
    %c0_73 = arith.constant 0 : index
    %c0_74 = arith.constant 0 : index
    %89 = vector.load %arg11[%c0_71, %c1_72, %c0_73, %c0_74] : memref<2x4x32x8xbf16, #tpu.memory_space<vmem>>, vector<1x1x32x8xbf16>
    %90 = vector.shape_cast %89 : vector<1x1x32x8xbf16> to vector<32x8xbf16>
    %cst_75 = arith.constant dense<0.000000e+00> : vector<34x8xf32>
    %91 = tpu.matmul %32, %90, %cst_75 {dimension_numbers = #tpu.dot_dimension_numbers<[1], [0], [0], [1], [0, 0, 1, 1], [], []>} : vector<34x32xbf16>, vector<32x8xbf16>, vector<34x8xf32> -> vector<34x8xf32>
    %c0_76 = arith.constant 0 : index
    %c1_77 = arith.constant 1 : index
    %c0_78 = arith.constant 0 : index
    %c0_79 = arith.constant 0 : index
    %92 = vector.load %arg12[%c0_76, %c1_77, %c0_78, %c0_79] : memref<2x4x1x8xf32, #tpu.memory_space<vmem>>, vector<1x1x1x8xf32>
    %93 = vector.shape_cast %92 : vector<1x1x1x8xf32> to vector<1x8xf32>
    %94 = vector.broadcast %93 : vector<1x8xf32> to vector<34x8xf32>
    %95 = arith.addf %91, %94 : vector<34x8xf32>
    %96 = arith.truncf %81 : vector<34x8xf32> to vector<34x8xbf16>
    %97 = arith.truncf %88 : vector<34x8xf32> to vector<34x8xbf16>
    %cst_80 = arith.constant dense<0.000000e+00> : vector<34x34xf32>
    %98 = tpu.matmul %96, %97, %cst_80 {dimension_numbers = #tpu.dot_dimension_numbers<[1], [1], [0], [0], [0, 0, 1, 0], [], []>} : vector<34x8xbf16>, vector<34x8xbf16>, vector<34x34xf32> -> vector<34x34xf32>
    %99 = arith.addf %98, %5 : vector<34x34xf32>
    %cst_81 = arith.constant dense<0xFF800000> : vector<34xf32>
    %100 = vector.multi_reduction <maximumf>, %99, %cst_81 [1] : vector<34x34xf32> to vector<34xf32>
    %101 = vector.shape_cast %100 : vector<34xf32> to vector<34x1xf32>
    %102 = vector.broadcast %101 : vector<34x1xf32> to vector<34x34xf32>
    %103 = arith.subf %99, %102 : vector<34x34xf32>
    %104 = math.exp %103 : vector<34x34xf32>
    %cst_82 = arith.constant dense<0.000000e+00> : vector<34xf32>
    %105 = vector.multi_reduction <add>, %104, %cst_82 [1] : vector<34x34xf32> to vector<34xf32>
    %106 = vector.shape_cast %105 : vector<34xf32> to vector<34x1xf32>
    %107 = tpu.reciprocal %106 {approx = true} : vector<34x1xf32> -> vector<34x1xf32>
    %108 = vector.broadcast %107 : vector<34x1xf32> to vector<34x34xf32>
    %109 = arith.mulf %104, %108 : vector<34x34xf32>
    %110 = arith.truncf %109 : vector<34x34xf32> to vector<34x34xbf16>
    %111 = arith.truncf %95 : vector<34x8xf32> to vector<34x8xbf16>
    %cst_83 = arith.constant dense<0.000000e+00> : vector<34x8xf32>
    %112 = tpu.matmul %110, %111, %cst_83 {dimension_numbers = #tpu.dot_dimension_numbers<[1], [0], [0], [1], [0, 0, 1, 1], [], []>} : vector<34x34xbf16>, vector<34x8xbf16>, vector<34x8xf32> -> vector<34x8xf32>
    %113 = arith.truncf %112 : vector<34x8xf32> to vector<34x8xbf16>
    %c0_84 = arith.constant 0 : index
    %c1_85 = arith.constant 1 : index
    %c0_86 = arith.constant 0 : index
    %c0_87 = arith.constant 0 : index
    %114 = vector.load %arg13[%c0_84, %c1_85, %c0_86, %c0_87] : memref<2x4x8x32xbf16, #tpu.memory_space<vmem>>, vector<1x1x8x32xbf16>
    %115 = vector.shape_cast %114 : vector<1x1x8x32xbf16> to vector<8x32xbf16>
    %cst_88 = arith.constant dense<0.000000e+00> : vector<34x32xf32>
    %116 = tpu.matmul %113, %115, %cst_88 {dimension_numbers = #tpu.dot_dimension_numbers<[1], [0], [0], [1], [0, 0, 1, 1], [], []>} : vector<34x8xbf16>, vector<8x32xbf16>, vector<34x32xf32> -> vector<34x32xf32>
    %117 = arith.addf %74, %116 : vector<34x32xf32>
    %c0_89 = arith.constant 0 : index
    %c2 = arith.constant 2 : index
    %c0_90 = arith.constant 0 : index
    %c0_91 = arith.constant 0 : index
    %118 = vector.load %arg7[%c0_89, %c2, %c0_90, %c0_91] : memref<2x4x32x8xbf16, #tpu.memory_space<vmem>>, vector<1x1x32x8xbf16>
    %119 = vector.shape_cast %118 : vector<1x1x32x8xbf16> to vector<32x8xbf16>
    %cst_92 = arith.constant dense<0.000000e+00> : vector<34x8xf32>
    %120 = tpu.matmul %32, %119, %cst_92 {dimension_numbers = #tpu.dot_dimension_numbers<[1], [0], [0], [1], [0, 0, 1, 1], [], []>} : vector<34x32xbf16>, vector<32x8xbf16>, vector<34x8xf32> -> vector<34x8xf32>
    %c0_93 = arith.constant 0 : index
    %c2_94 = arith.constant 2 : index
    %c0_95 = arith.constant 0 : index
    %c0_96 = arith.constant 0 : index
    %121 = vector.load %arg8[%c0_93, %c2_94, %c0_95, %c0_96] : memref<2x4x1x8xf32, #tpu.memory_space<vmem>>, vector<1x1x1x8xf32>
    %122 = vector.shape_cast %121 : vector<1x1x1x8xf32> to vector<1x8xf32>
    %123 = vector.broadcast %122 : vector<1x8xf32> to vector<34x8xf32>
    %124 = arith.addf %120, %123 : vector<34x8xf32>
    %c0_97 = arith.constant 0 : index
    %c2_98 = arith.constant 2 : index
    %c0_99 = arith.constant 0 : index
    %c0_100 = arith.constant 0 : index
    %125 = vector.load %arg9[%c0_97, %c2_98, %c0_99, %c0_100] : memref<2x4x32x8xbf16, #tpu.memory_space<vmem>>, vector<1x1x32x8xbf16>
    %126 = vector.shape_cast %125 : vector<1x1x32x8xbf16> to vector<32x8xbf16>
    %cst_101 = arith.constant dense<0.000000e+00> : vector<34x8xf32>
    %127 = tpu.matmul %32, %126, %cst_101 {dimension_numbers = #tpu.dot_dimension_numbers<[1], [0], [0], [1], [0, 0, 1, 1], [], []>} : vector<34x32xbf16>, vector<32x8xbf16>, vector<34x8xf32> -> vector<34x8xf32>
    %c0_102 = arith.constant 0 : index
    %c2_103 = arith.constant 2 : index
    %c0_104 = arith.constant 0 : index
    %c0_105 = arith.constant 0 : index
    %128 = vector.load %arg10[%c0_102, %c2_103, %c0_104, %c0_105] : memref<2x4x1x8xf32, #tpu.memory_space<vmem>>, vector<1x1x1x8xf32>
    %129 = vector.shape_cast %128 : vector<1x1x1x8xf32> to vector<1x8xf32>
    %130 = vector.broadcast %129 : vector<1x8xf32> to vector<34x8xf32>
    %131 = arith.addf %127, %130 : vector<34x8xf32>
    %c0_106 = arith.constant 0 : index
    %c2_107 = arith.constant 2 : index
    %c0_108 = arith.constant 0 : index
    %c0_109 = arith.constant 0 : index
    %132 = vector.load %arg11[%c0_106, %c2_107, %c0_108, %c0_109] : memref<2x4x32x8xbf16, #tpu.memory_space<vmem>>, vector<1x1x32x8xbf16>
    %133 = vector.shape_cast %132 : vector<1x1x32x8xbf16> to vector<32x8xbf16>
    %cst_110 = arith.constant dense<0.000000e+00> : vector<34x8xf32>
    %134 = tpu.matmul %32, %133, %cst_110 {dimension_numbers = #tpu.dot_dimension_numbers<[1], [0], [0], [1], [0, 0, 1, 1], [], []>} : vector<34x32xbf16>, vector<32x8xbf16>, vector<34x8xf32> -> vector<34x8xf32>
    %c0_111 = arith.constant 0 : index
    %c2_112 = arith.constant 2 : index
    %c0_113 = arith.constant 0 : index
    %c0_114 = arith.constant 0 : index
    %135 = vector.load %arg12[%c0_111, %c2_112, %c0_113, %c0_114] : memref<2x4x1x8xf32, #tpu.memory_space<vmem>>, vector<1x1x1x8xf32>
    %136 = vector.shape_cast %135 : vector<1x1x1x8xf32> to vector<1x8xf32>
    %137 = vector.broadcast %136 : vector<1x8xf32> to vector<34x8xf32>
    %138 = arith.addf %134, %137 : vector<34x8xf32>
    %139 = arith.truncf %124 : vector<34x8xf32> to vector<34x8xbf16>
    %140 = arith.truncf %131 : vector<34x8xf32> to vector<34x8xbf16>
    %cst_115 = arith.constant dense<0.000000e+00> : vector<34x34xf32>
    %141 = tpu.matmul %139, %140, %cst_115 {dimension_numbers = #tpu.dot_dimension_numbers<[1], [1], [0], [0], [0, 0, 1, 0], [], []>} : vector<34x8xbf16>, vector<34x8xbf16>, vector<34x34xf32> -> vector<34x34xf32>
    %142 = arith.addf %141, %5 : vector<34x34xf32>
    %cst_116 = arith.constant dense<0xFF800000> : vector<34xf32>
    %143 = vector.multi_reduction <maximumf>, %142, %cst_116 [1] : vector<34x34xf32> to vector<34xf32>
    %144 = vector.shape_cast %143 : vector<34xf32> to vector<34x1xf32>
    %145 = vector.broadcast %144 : vector<34x1xf32> to vector<34x34xf32>
    %146 = arith.subf %142, %145 : vector<34x34xf32>
    %147 = math.exp %146 : vector<34x34xf32>
    %cst_117 = arith.constant dense<0.000000e+00> : vector<34xf32>
    %148 = vector.multi_reduction <add>, %147, %cst_117 [1] : vector<34x34xf32> to vector<34xf32>
    %149 = vector.shape_cast %148 : vector<34xf32> to vector<34x1xf32>
    %150 = tpu.reciprocal %149 {approx = true} : vector<34x1xf32> -> vector<34x1xf32>
    %151 = vector.broadcast %150 : vector<34x1xf32> to vector<34x34xf32>
    %152 = arith.mulf %147, %151 : vector<34x34xf32>
    %153 = arith.truncf %152 : vector<34x34xf32> to vector<34x34xbf16>
    %154 = arith.truncf %138 : vector<34x8xf32> to vector<34x8xbf16>
    %cst_118 = arith.constant dense<0.000000e+00> : vector<34x8xf32>
    %155 = tpu.matmul %153, %154, %cst_118 {dimension_numbers = #tpu.dot_dimension_numbers<[1], [0], [0], [1], [0, 0, 1, 1], [], []>} : vector<34x34xbf16>, vector<34x8xbf16>, vector<34x8xf32> -> vector<34x8xf32>
    %156 = arith.truncf %155 : vector<34x8xf32> to vector<34x8xbf16>
    %c0_119 = arith.constant 0 : index
    %c2_120 = arith.constant 2 : index
    %c0_121 = arith.constant 0 : index
    %c0_122 = arith.constant 0 : index
    %157 = vector.load %arg13[%c0_119, %c2_120, %c0_121, %c0_122] : memref<2x4x8x32xbf16, #tpu.memory_space<vmem>>, vector<1x1x8x32xbf16>
    %158 = vector.shape_cast %157 : vector<1x1x8x32xbf16> to vector<8x32xbf16>
    %cst_123 = arith.constant dense<0.000000e+00> : vector<34x32xf32>
    %159 = tpu.matmul %156, %158, %cst_123 {dimension_numbers = #tpu.dot_dimension_numbers<[1], [0], [0], [1], [0, 0, 1, 1], [], []>} : vector<34x8xbf16>, vector<8x32xbf16>, vector<34x32xf32> -> vector<34x32xf32>
    %160 = arith.addf %117, %159 : vector<34x32xf32>
    %c0_124 = arith.constant 0 : index
    %c3 = arith.constant 3 : index
    %c0_125 = arith.constant 0 : index
    %c0_126 = arith.constant 0 : index
    %161 = vector.load %arg7[%c0_124, %c3, %c0_125, %c0_126] : memref<2x4x32x8xbf16, #tpu.memory_space<vmem>>, vector<1x1x32x8xbf16>
    %162 = vector.shape_cast %161 : vector<1x1x32x8xbf16> to vector<32x8xbf16>
    %cst_127 = arith.constant dense<0.000000e+00> : vector<34x8xf32>
    %163 = tpu.matmul %32, %162, %cst_127 {dimension_numbers = #tpu.dot_dimension_numbers<[1], [0], [0], [1], [0, 0, 1, 1], [], []>} : vector<34x32xbf16>, vector<32x8xbf16>, vector<34x8xf32> -> vector<34x8xf32>
    %c0_128 = arith.constant 0 : index
    %c3_129 = arith.constant 3 : index
    %c0_130 = arith.constant 0 : index
    %c0_131 = arith.constant 0 : index
    %164 = vector.load %arg8[%c0_128, %c3_129, %c0_130, %c0_131] : memref<2x4x1x8xf32, #tpu.memory_space<vmem>>, vector<1x1x1x8xf32>
    %165 = vector.shape_cast %164 : vector<1x1x1x8xf32> to vector<1x8xf32>
    %166 = vector.broadcast %165 : vector<1x8xf32> to vector<34x8xf32>
    %167 = arith.addf %163, %166 : vector<34x8xf32>
    %c0_132 = arith.constant 0 : index
    %c3_133 = arith.constant 3 : index
    %c0_134 = arith.constant 0 : index
    %c0_135 = arith.constant 0 : index
    %168 = vector.load %arg9[%c0_132, %c3_133, %c0_134, %c0_135] : memref<2x4x32x8xbf16, #tpu.memory_space<vmem>>, vector<1x1x32x8xbf16>
    %169 = vector.shape_cast %168 : vector<1x1x32x8xbf16> to vector<32x8xbf16>
    %cst_136 = arith.constant dense<0.000000e+00> : vector<34x8xf32>
    %170 = tpu.matmul %32, %169, %cst_136 {dimension_numbers = #tpu.dot_dimension_numbers<[1], [0], [0], [1], [0, 0, 1, 1], [], []>} : vector<34x32xbf16>, vector<32x8xbf16>, vector<34x8xf32> -> vector<34x8xf32>
    %c0_137 = arith.constant 0 : index
    %c3_138 = arith.constant 3 : index
    %c0_139 = arith.constant 0 : index
    %c0_140 = arith.constant 0 : index
    %171 = vector.load %arg10[%c0_137, %c3_138, %c0_139, %c0_140] : memref<2x4x1x8xf32, #tpu.memory_space<vmem>>, vector<1x1x1x8xf32>
    %172 = vector.shape_cast %171 : vector<1x1x1x8xf32> to vector<1x8xf32>
    %173 = vector.broadcast %172 : vector<1x8xf32> to vector<34x8xf32>
    %174 = arith.addf %170, %173 : vector<34x8xf32>
    %c0_141 = arith.constant 0 : index
    %c3_142 = arith.constant 3 : index
    %c0_143 = arith.constant 0 : index
    %c0_144 = arith.constant 0 : index
    %175 = vector.load %arg11[%c0_141, %c3_142, %c0_143, %c0_144] : memref<2x4x32x8xbf16, #tpu.memory_space<vmem>>, vector<1x1x32x8xbf16>
    %176 = vector.shape_cast %175 : vector<1x1x32x8xbf16> to vector<32x8xbf16>
    %cst_145 = arith.constant dense<0.000000e+00> : vector<34x8xf32>
    %177 = tpu.matmul %32, %176, %cst_145 {dimension_numbers = #tpu.dot_dimension_numbers<[1], [0], [0], [1], [0, 0, 1, 1], [], []>} : vector<34x32xbf16>, vector<32x8xbf16>, vector<34x8xf32> -> vector<34x8xf32>
    %c0_146 = arith.constant 0 : index
    %c3_147 = arith.constant 3 : index
    %c0_148 = arith.constant 0 : index
    %c0_149 = arith.constant 0 : index
    %178 = vector.load %arg12[%c0_146, %c3_147, %c0_148, %c0_149] : memref<2x4x1x8xf32, #tpu.memory_space<vmem>>, vector<1x1x1x8xf32>
    %179 = vector.shape_cast %178 : vector<1x1x1x8xf32> to vector<1x8xf32>
    %180 = vector.broadcast %179 : vector<1x8xf32> to vector<34x8xf32>
    %181 = arith.addf %177, %180 : vector<34x8xf32>
    %182 = arith.truncf %167 : vector<34x8xf32> to vector<34x8xbf16>
    %183 = arith.truncf %174 : vector<34x8xf32> to vector<34x8xbf16>
    %cst_150 = arith.constant dense<0.000000e+00> : vector<34x34xf32>
    %184 = tpu.matmul %182, %183, %cst_150 {dimension_numbers = #tpu.dot_dimension_numbers<[1], [1], [0], [0], [0, 0, 1, 0], [], []>} : vector<34x8xbf16>, vector<34x8xbf16>, vector<34x34xf32> -> vector<34x34xf32>
    %185 = arith.addf %184, %5 : vector<34x34xf32>
    %cst_151 = arith.constant dense<0xFF800000> : vector<34xf32>
    %186 = vector.multi_reduction <maximumf>, %185, %cst_151 [1] : vector<34x34xf32> to vector<34xf32>
    %187 = vector.shape_cast %186 : vector<34xf32> to vector<34x1xf32>
    %188 = vector.broadcast %187 : vector<34x1xf32> to vector<34x34xf32>
    %189 = arith.subf %185, %188 : vector<34x34xf32>
    %190 = math.exp %189 : vector<34x34xf32>
    %cst_152 = arith.constant dense<0.000000e+00> : vector<34xf32>
    %191 = vector.multi_reduction <add>, %190, %cst_152 [1] : vector<34x34xf32> to vector<34xf32>
    %192 = vector.shape_cast %191 : vector<34xf32> to vector<34x1xf32>
    %193 = tpu.reciprocal %192 {approx = true} : vector<34x1xf32> -> vector<34x1xf32>
    %194 = vector.broadcast %193 : vector<34x1xf32> to vector<34x34xf32>
    %195 = arith.mulf %190, %194 : vector<34x34xf32>
    %196 = arith.truncf %195 : vector<34x34xf32> to vector<34x34xbf16>
    %197 = arith.truncf %181 : vector<34x8xf32> to vector<34x8xbf16>
    %cst_153 = arith.constant dense<0.000000e+00> : vector<34x8xf32>
    %198 = tpu.matmul %196, %197, %cst_153 {dimension_numbers = #tpu.dot_dimension_numbers<[1], [0], [0], [1], [0, 0, 1, 1], [], []>} : vector<34x34xbf16>, vector<34x8xbf16>, vector<34x8xf32> -> vector<34x8xf32>
    %199 = arith.truncf %198 : vector<34x8xf32> to vector<34x8xbf16>
    %c0_154 = arith.constant 0 : index
    %c3_155 = arith.constant 3 : index
    %c0_156 = arith.constant 0 : index
    %c0_157 = arith.constant 0 : index
    %200 = vector.load %arg13[%c0_154, %c3_155, %c0_156, %c0_157] : memref<2x4x8x32xbf16, #tpu.memory_space<vmem>>, vector<1x1x8x32xbf16>
    %201 = vector.shape_cast %200 : vector<1x1x8x32xbf16> to vector<8x32xbf16>
    %cst_158 = arith.constant dense<0.000000e+00> : vector<34x32xf32>
    %202 = tpu.matmul %199, %201, %cst_158 {dimension_numbers = #tpu.dot_dimension_numbers<[1], [0], [0], [1], [0, 0, 1, 1], [], []>} : vector<34x8xbf16>, vector<8x32xbf16>, vector<34x32xf32> -> vector<34x32xf32>
    %203 = arith.addf %160, %202 : vector<34x32xf32>
    %c0_159 = arith.constant 0 : index
    %c0_160 = arith.constant 0 : index
    %c0_161 = arith.constant 0 : index
    %204 = vector.load %arg14[%c0_159, %c0_160, %c0_161] : memref<2x1x32xf32, #tpu.memory_space<vmem>>, vector<1x1x32xf32>
    %205 = vector.shape_cast %204 : vector<1x1x32xf32> to vector<1x32xf32>
    %206 = vector.broadcast %205 : vector<1x32xf32> to vector<34x32xf32>
    %207 = arith.addf %203, %206 : vector<34x32xf32>
    %c0_162 = arith.constant 0 : index
    %c0_163 = arith.constant 0 : index
    %c0_164 = arith.constant 0 : index
    %208 = vector.load %arg15[%c0_162, %c0_163, %c0_164] : memref<2x1x32xf32, #tpu.memory_space<vmem>>, vector<1x1x32xf32>
    %209 = vector.shape_cast %208 : vector<1x1x32xf32> to vector<1x32xf32>
    %210 = vector.broadcast %209 : vector<1x32xf32> to vector<34x32xf32>
    %211 = arith.mulf %207, %210 : vector<34x32xf32>
    %212 = arith.addf %4, %211 : vector<34x32xf32>
    %c0_165 = arith.constant 0 : index
    %c0_166 = arith.constant 0 : index
    %c0_167 = arith.constant 0 : index
    %213 = vector.load %arg16[%c0_165, %c0_166, %c0_167] : memref<2x1x32xf32, #tpu.memory_space<vmem>>, vector<1x1x32xf32>
    %214 = vector.shape_cast %213 : vector<1x1x32xf32> to vector<1x32xf32>
    %c0_168 = arith.constant 0 : index
    %c0_169 = arith.constant 0 : index
    %c0_170 = arith.constant 0 : index
    %215 = vector.load %arg17[%c0_168, %c0_169, %c0_170] : memref<2x1x32xf32, #tpu.memory_space<vmem>>, vector<1x1x32xf32>
    %216 = vector.shape_cast %215 : vector<1x1x32xf32> to vector<1x32xf32>
    %cst_171 = arith.constant dense<0.000000e+00> : vector<34xf32>
    %217 = vector.multi_reduction <add>, %212, %cst_171 [1] : vector<34x32xf32> to vector<34xf32>
    %218 = vector.shape_cast %217 : vector<34xf32> to vector<34x1xf32>
    %cst_172 = arith.constant 3.200000e+01 : f32
    %219 = vector.broadcast %cst_172 : f32 to vector<34x1xf32>
    %220 = arith.divf %218, %219 : vector<34x1xf32>
    %221 = vector.broadcast %220 : vector<34x1xf32> to vector<34x32xf32>
    %222 = arith.subf %212, %221 : vector<34x32xf32>
    %223 = arith.mulf %222, %222 : vector<34x32xf32>
    %cst_173 = arith.constant dense<0.000000e+00> : vector<34xf32>
    %224 = vector.multi_reduction <add>, %223, %cst_173 [1] : vector<34x32xf32> to vector<34xf32>
    %225 = vector.shape_cast %224 : vector<34xf32> to vector<34x1xf32>
    %cst_174 = arith.constant 3.200000e+01 : f32
    %226 = vector.broadcast %cst_174 : f32 to vector<34x1xf32>
    %227 = arith.divf %225, %226 : vector<34x1xf32>
    %228 = vector.broadcast %220 : vector<34x1xf32> to vector<34x32xf32>
    %229 = arith.subf %212, %228 : vector<34x32xf32>
    %cst_175 = arith.constant 9.99999997E-7 : f32
    %230 = vector.broadcast %cst_175 : f32 to vector<34x1xf32>
    %231 = arith.addf %227, %230 : vector<34x1xf32>
    %232 = math.rsqrt %231 : vector<34x1xf32>
    %233 = vector.broadcast %232 : vector<34x1xf32> to vector<34x32xf32>
    %234 = arith.mulf %229, %233 : vector<34x32xf32>
    %235 = vector.broadcast %214 : vector<1x32xf32> to vector<34x32xf32>
    %236 = arith.mulf %234, %235 : vector<34x32xf32>
    %237 = vector.broadcast %216 : vector<1x32xf32> to vector<34x32xf32>
    %238 = arith.addf %236, %237 : vector<34x32xf32>
    %239 = arith.truncf %238 : vector<34x32xf32> to vector<34x32xbf16>
    %c0_176 = arith.constant 0 : index
    %c0_177 = arith.constant 0 : index
    %c0_178 = arith.constant 0 : index
    %240 = vector.load %arg18[%c0_176, %c0_177, %c0_178] : memref<2x32x128xbf16, #tpu.memory_space<vmem>>, vector<1x32x128xbf16>
    %241 = vector.shape_cast %240 : vector<1x32x128xbf16> to vector<32x128xbf16>
    %cst_179 = arith.constant dense<0.000000e+00> : vector<34x128xf32>
    %242 = tpu.matmul %239, %241, %cst_179 {dimension_numbers = #tpu.dot_dimension_numbers<[1], [0], [0], [1], [0, 0, 1, 1], [], []>} : vector<34x32xbf16>, vector<32x128xbf16>, vector<34x128xf32> -> vector<34x128xf32>
    %c0_180 = arith.constant 0 : index
    %c0_181 = arith.constant 0 : index
    %c0_182 = arith.constant 0 : index
    %243 = vector.load %arg19[%c0_180, %c0_181, %c0_182] : memref<2x1x128xf32, #tpu.memory_space<vmem>>, vector<1x1x128xf32>
    %244 = vector.shape_cast %243 : vector<1x1x128xf32> to vector<1x128xf32>
    %245 = vector.broadcast %244 : vector<1x128xf32> to vector<34x128xf32>
    %246 = arith.addf %242, %245 : vector<34x128xf32>
    %cst_183 = arith.constant 5.000000e-01 : f32
    %247 = vector.broadcast %cst_183 : f32 to vector<34x128xf32>
    %248 = arith.mulf %247, %246 : vector<34x128xf32>
    %cst_184 = arith.constant 4.471500e-02 : f32
    %249 = vector.broadcast %cst_184 : f32 to vector<34x128xf32>
    %250 = arith.mulf %249, %246 : vector<34x128xf32>
    %251 = arith.mulf %250, %246 : vector<34x128xf32>
    %252 = arith.mulf %251, %246 : vector<34x128xf32>
    %253 = arith.addf %246, %252 : vector<34x128xf32>
    %cst_185 = arith.constant 0.797884583 : f32
    %254 = vector.broadcast %cst_185 : f32 to vector<34x128xf32>
    %255 = arith.mulf %254, %253 : vector<34x128xf32>
    %256 = math.tanh %255 : vector<34x128xf32>
    %cst_186 = arith.constant 1.000000e+00 : f32
    %257 = vector.broadcast %cst_186 : f32 to vector<34x128xf32>
    %258 = arith.addf %257, %256 : vector<34x128xf32>
    %259 = arith.mulf %248, %258 : vector<34x128xf32>
    %260 = arith.truncf %259 : vector<34x128xf32> to vector<34x128xbf16>
    %c0_187 = arith.constant 0 : index
    %c0_188 = arith.constant 0 : index
    %c0_189 = arith.constant 0 : index
    %261 = vector.load %arg20[%c0_187, %c0_188, %c0_189] : memref<2x128x32xbf16, #tpu.memory_space<vmem>>, vector<1x128x32xbf16>
    %262 = vector.shape_cast %261 : vector<1x128x32xbf16> to vector<128x32xbf16>
    %cst_190 = arith.constant dense<0.000000e+00> : vector<34x32xf32>
    %263 = tpu.matmul %260, %262, %cst_190 {dimension_numbers = #tpu.dot_dimension_numbers<[1], [0], [0], [1], [0, 0, 1, 1], [], []>} : vector<34x128xbf16>, vector<128x32xbf16>, vector<34x32xf32> -> vector<34x32xf32>
    %c0_191 = arith.constant 0 : index
    %c0_192 = arith.constant 0 : index
    %c0_193 = arith.constant 0 : index
    %264 = vector.load %arg21[%c0_191, %c0_192, %c0_193] : memref<2x1x32xf32, #tpu.memory_space<vmem>>, vector<1x1x32xf32>
    %265 = vector.shape_cast %264 : vector<1x1x32xf32> to vector<1x32xf32>
    %266 = vector.broadcast %265 : vector<1x32xf32> to vector<34x32xf32>
    %267 = arith.addf %263, %266 : vector<34x32xf32>
    %c0_194 = arith.constant 0 : index
    %c0_195 = arith.constant 0 : index
    %c0_196 = arith.constant 0 : index
    %268 = vector.load %arg22[%c0_194, %c0_195, %c0_196] : memref<2x1x32xf32, #tpu.memory_space<vmem>>, vector<1x1x32xf32>
    %269 = vector.shape_cast %268 : vector<1x1x32xf32> to vector<1x32xf32>
    %270 = vector.broadcast %269 : vector<1x32xf32> to vector<34x32xf32>
    %271 = arith.mulf %267, %270 : vector<34x32xf32>
    %272 = arith.addf %212, %271 : vector<34x32xf32>
    %c1_197 = arith.constant 1 : index
    %c0_198 = arith.constant 0 : index
    %c0_199 = arith.constant 0 : index
    %273 = vector.load %arg5[%c1_197, %c0_198, %c0_199] : memref<2x1x32xf32, #tpu.memory_space<vmem>>, vector<1x1x32xf32>
    %274 = vector.shape_cast %273 : vector<1x1x32xf32> to vector<1x32xf32>
    %c1_200 = arith.constant 1 : index
    %c0_201 = arith.constant 0 : index
    %c0_202 = arith.constant 0 : index
    %275 = vector.load %arg6[%c1_200, %c0_201, %c0_202] : memref<2x1x32xf32, #tpu.memory_space<vmem>>, vector<1x1x32xf32>
    %276 = vector.shape_cast %275 : vector<1x1x32xf32> to vector<1x32xf32>
    %cst_203 = arith.constant dense<0.000000e+00> : vector<34xf32>
    %277 = vector.multi_reduction <add>, %272, %cst_203 [1] : vector<34x32xf32> to vector<34xf32>
    %278 = vector.shape_cast %277 : vector<34xf32> to vector<34x1xf32>
    %cst_204 = arith.constant 3.200000e+01 : f32
    %279 = vector.broadcast %cst_204 : f32 to vector<34x1xf32>
    %280 = arith.divf %278, %279 : vector<34x1xf32>
    %281 = vector.broadcast %280 : vector<34x1xf32> to vector<34x32xf32>
    %282 = arith.subf %272, %281 : vector<34x32xf32>
    %283 = arith.mulf %282, %282 : vector<34x32xf32>
    %cst_205 = arith.constant dense<0.000000e+00> : vector<34xf32>
    %284 = vector.multi_reduction <add>, %283, %cst_205 [1] : vector<34x32xf32> to vector<34xf32>
    %285 = vector.shape_cast %284 : vector<34xf32> to vector<34x1xf32>
    %cst_206 = arith.constant 3.200000e+01 : f32
    %286 = vector.broadcast %cst_206 : f32 to vector<34x1xf32>
    %287 = arith.divf %285, %286 : vector<34x1xf32>
    %288 = vector.broadcast %280 : vector<34x1xf32> to vector<34x32xf32>
    %289 = arith.subf %272, %288 : vector<34x32xf32>
    %cst_207 = arith.constant 9.99999997E-7 : f32
    %290 = vector.broadcast %cst_207 : f32 to vector<34x1xf32>
    %291 = arith.addf %287, %290 : vector<34x1xf32>
    %292 = math.rsqrt %291 : vector<34x1xf32>
    %293 = vector.broadcast %292 : vector<34x1xf32> to vector<34x32xf32>
    %294 = arith.mulf %289, %293 : vector<34x32xf32>
    %295 = vector.broadcast %274 : vector<1x32xf32> to vector<34x32xf32>
    %296 = arith.mulf %294, %295 : vector<34x32xf32>
    %297 = vector.broadcast %276 : vector<1x32xf32> to vector<34x32xf32>
    %298 = arith.addf %296, %297 : vector<34x32xf32>
    %299 = arith.truncf %298 : vector<34x32xf32> to vector<34x32xbf16>
    %c1_208 = arith.constant 1 : index
    %c0_209 = arith.constant 0 : index
    %c0_210 = arith.constant 0 : index
    %c0_211 = arith.constant 0 : index
    %300 = vector.load %arg7[%c1_208, %c0_209, %c0_210, %c0_211] : memref<2x4x32x8xbf16, #tpu.memory_space<vmem>>, vector<1x1x32x8xbf16>
    %301 = vector.shape_cast %300 : vector<1x1x32x8xbf16> to vector<32x8xbf16>
    %cst_212 = arith.constant dense<0.000000e+00> : vector<34x8xf32>
    %302 = tpu.matmul %299, %301, %cst_212 {dimension_numbers = #tpu.dot_dimension_numbers<[1], [0], [0], [1], [0, 0, 1, 1], [], []>} : vector<34x32xbf16>, vector<32x8xbf16>, vector<34x8xf32> -> vector<34x8xf32>
    %c1_213 = arith.constant 1 : index
    %c0_214 = arith.constant 0 : index
    %c0_215 = arith.constant 0 : index
    %c0_216 = arith.constant 0 : index
    %303 = vector.load %arg8[%c1_213, %c0_214, %c0_215, %c0_216] : memref<2x4x1x8xf32, #tpu.memory_space<vmem>>, vector<1x1x1x8xf32>
    %304 = vector.shape_cast %303 : vector<1x1x1x8xf32> to vector<1x8xf32>
    %305 = vector.broadcast %304 : vector<1x8xf32> to vector<34x8xf32>
    %306 = arith.addf %302, %305 : vector<34x8xf32>
    %c1_217 = arith.constant 1 : index
    %c0_218 = arith.constant 0 : index
    %c0_219 = arith.constant 0 : index
    %c0_220 = arith.constant 0 : index
    %307 = vector.load %arg9[%c1_217, %c0_218, %c0_219, %c0_220] : memref<2x4x32x8xbf16, #tpu.memory_space<vmem>>, vector<1x1x32x8xbf16>
    %308 = vector.shape_cast %307 : vector<1x1x32x8xbf16> to vector<32x8xbf16>
    %cst_221 = arith.constant dense<0.000000e+00> : vector<34x8xf32>
    %309 = tpu.matmul %299, %308, %cst_221 {dimension_numbers = #tpu.dot_dimension_numbers<[1], [0], [0], [1], [0, 0, 1, 1], [], []>} : vector<34x32xbf16>, vector<32x8xbf16>, vector<34x8xf32> -> vector<34x8xf32>
    %c1_222 = arith.constant 1 : index
    %c0_223 = arith.constant 0 : index
    %c0_224 = arith.constant 0 : index
    %c0_225 = arith.constant 0 : index
    %310 = vector.load %arg10[%c1_222, %c0_223, %c0_224, %c0_225] : memref<2x4x1x8xf32, #tpu.memory_space<vmem>>, vector<1x1x1x8xf32>
    %311 = vector.shape_cast %310 : vector<1x1x1x8xf32> to vector<1x8xf32>
    %312 = vector.broadcast %311 : vector<1x8xf32> to vector<34x8xf32>
    %313 = arith.addf %309, %312 : vector<34x8xf32>
    %c1_226 = arith.constant 1 : index
    %c0_227 = arith.constant 0 : index
    %c0_228 = arith.constant 0 : index
    %c0_229 = arith.constant 0 : index
    %314 = vector.load %arg11[%c1_226, %c0_227, %c0_228, %c0_229] : memref<2x4x32x8xbf16, #tpu.memory_space<vmem>>, vector<1x1x32x8xbf16>
    %315 = vector.shape_cast %314 : vector<1x1x32x8xbf16> to vector<32x8xbf16>
    %cst_230 = arith.constant dense<0.000000e+00> : vector<34x8xf32>
    %316 = tpu.matmul %299, %315, %cst_230 {dimension_numbers = #tpu.dot_dimension_numbers<[1], [0], [0], [1], [0, 0, 1, 1], [], []>} : vector<34x32xbf16>, vector<32x8xbf16>, vector<34x8xf32> -> vector<34x8xf32>
    %c1_231 = arith.constant 1 : index
    %c0_232 = arith.constant 0 : index
    %c0_233 = arith.constant 0 : index
    %c0_234 = arith.constant 0 : index
    %317 = vector.load %arg12[%c1_231, %c0_232, %c0_233, %c0_234] : memref<2x4x1x8xf32, #tpu.memory_space<vmem>>, vector<1x1x1x8xf32>
    %318 = vector.shape_cast %317 : vector<1x1x1x8xf32> to vector<1x8xf32>
    %319 = vector.broadcast %318 : vector<1x8xf32> to vector<34x8xf32>
    %320 = arith.addf %316, %319 : vector<34x8xf32>
    %321 = arith.truncf %306 : vector<34x8xf32> to vector<34x8xbf16>
    %322 = arith.truncf %313 : vector<34x8xf32> to vector<34x8xbf16>
    %cst_235 = arith.constant dense<0.000000e+00> : vector<34x34xf32>
    %323 = tpu.matmul %321, %322, %cst_235 {dimension_numbers = #tpu.dot_dimension_numbers<[1], [1], [0], [0], [0, 0, 1, 0], [], []>} : vector<34x8xbf16>, vector<34x8xbf16>, vector<34x34xf32> -> vector<34x34xf32>
    %324 = arith.addf %323, %5 : vector<34x34xf32>
    %cst_236 = arith.constant dense<0xFF800000> : vector<34xf32>
    %325 = vector.multi_reduction <maximumf>, %324, %cst_236 [1] : vector<34x34xf32> to vector<34xf32>
    %326 = vector.shape_cast %325 : vector<34xf32> to vector<34x1xf32>
    %327 = vector.broadcast %326 : vector<34x1xf32> to vector<34x34xf32>
    %328 = arith.subf %324, %327 : vector<34x34xf32>
    %329 = math.exp %328 : vector<34x34xf32>
    %cst_237 = arith.constant dense<0.000000e+00> : vector<34xf32>
    %330 = vector.multi_reduction <add>, %329, %cst_237 [1] : vector<34x34xf32> to vector<34xf32>
    %331 = vector.shape_cast %330 : vector<34xf32> to vector<34x1xf32>
    %332 = tpu.reciprocal %331 {approx = true} : vector<34x1xf32> -> vector<34x1xf32>
    %333 = vector.broadcast %332 : vector<34x1xf32> to vector<34x34xf32>
    %334 = arith.mulf %329, %333 : vector<34x34xf32>
    %335 = arith.truncf %334 : vector<34x34xf32> to vector<34x34xbf16>
    %336 = arith.truncf %320 : vector<34x8xf32> to vector<34x8xbf16>
    %cst_238 = arith.constant dense<0.000000e+00> : vector<34x8xf32>
    %337 = tpu.matmul %335, %336, %cst_238 {dimension_numbers = #tpu.dot_dimension_numbers<[1], [0], [0], [1], [0, 0, 1, 1], [], []>} : vector<34x34xbf16>, vector<34x8xbf16>, vector<34x8xf32> -> vector<34x8xf32>
    %338 = arith.truncf %337 : vector<34x8xf32> to vector<34x8xbf16>
    %c1_239 = arith.constant 1 : index
    %c0_240 = arith.constant 0 : index
    %c0_241 = arith.constant 0 : index
    %c0_242 = arith.constant 0 : index
    %339 = vector.load %arg13[%c1_239, %c0_240, %c0_241, %c0_242] : memref<2x4x8x32xbf16, #tpu.memory_space<vmem>>, vector<1x1x8x32xbf16>
    %340 = vector.shape_cast %339 : vector<1x1x8x32xbf16> to vector<8x32xbf16>
    %cst_243 = arith.constant dense<0.000000e+00> : vector<34x32xf32>
    %341 = tpu.matmul %338, %340, %cst_243 {dimension_numbers = #tpu.dot_dimension_numbers<[1], [0], [0], [1], [0, 0, 1, 1], [], []>} : vector<34x8xbf16>, vector<8x32xbf16>, vector<34x32xf32> -> vector<34x32xf32>
    %c1_244 = arith.constant 1 : index
    %c1_245 = arith.constant 1 : index
    %c0_246 = arith.constant 0 : index
    %c0_247 = arith.constant 0 : index
    %342 = vector.load %arg7[%c1_244, %c1_245, %c0_246, %c0_247] : memref<2x4x32x8xbf16, #tpu.memory_space<vmem>>, vector<1x1x32x8xbf16>
    %343 = vector.shape_cast %342 : vector<1x1x32x8xbf16> to vector<32x8xbf16>
    %cst_248 = arith.constant dense<0.000000e+00> : vector<34x8xf32>
    %344 = tpu.matmul %299, %343, %cst_248 {dimension_numbers = #tpu.dot_dimension_numbers<[1], [0], [0], [1], [0, 0, 1, 1], [], []>} : vector<34x32xbf16>, vector<32x8xbf16>, vector<34x8xf32> -> vector<34x8xf32>
    %c1_249 = arith.constant 1 : index
    %c1_250 = arith.constant 1 : index
    %c0_251 = arith.constant 0 : index
    %c0_252 = arith.constant 0 : index
    %345 = vector.load %arg8[%c1_249, %c1_250, %c0_251, %c0_252] : memref<2x4x1x8xf32, #tpu.memory_space<vmem>>, vector<1x1x1x8xf32>
    %346 = vector.shape_cast %345 : vector<1x1x1x8xf32> to vector<1x8xf32>
    %347 = vector.broadcast %346 : vector<1x8xf32> to vector<34x8xf32>
    %348 = arith.addf %344, %347 : vector<34x8xf32>
    %c1_253 = arith.constant 1 : index
    %c1_254 = arith.constant 1 : index
    %c0_255 = arith.constant 0 : index
    %c0_256 = arith.constant 0 : index
    %349 = vector.load %arg9[%c1_253, %c1_254, %c0_255, %c0_256] : memref<2x4x32x8xbf16, #tpu.memory_space<vmem>>, vector<1x1x32x8xbf16>
    %350 = vector.shape_cast %349 : vector<1x1x32x8xbf16> to vector<32x8xbf16>
    %cst_257 = arith.constant dense<0.000000e+00> : vector<34x8xf32>
    %351 = tpu.matmul %299, %350, %cst_257 {dimension_numbers = #tpu.dot_dimension_numbers<[1], [0], [0], [1], [0, 0, 1, 1], [], []>} : vector<34x32xbf16>, vector<32x8xbf16>, vector<34x8xf32> -> vector<34x8xf32>
    %c1_258 = arith.constant 1 : index
    %c1_259 = arith.constant 1 : index
    %c0_260 = arith.constant 0 : index
    %c0_261 = arith.constant 0 : index
    %352 = vector.load %arg10[%c1_258, %c1_259, %c0_260, %c0_261] : memref<2x4x1x8xf32, #tpu.memory_space<vmem>>, vector<1x1x1x8xf32>
    %353 = vector.shape_cast %352 : vector<1x1x1x8xf32> to vector<1x8xf32>
    %354 = vector.broadcast %353 : vector<1x8xf32> to vector<34x8xf32>
    %355 = arith.addf %351, %354 : vector<34x8xf32>
    %c1_262 = arith.constant 1 : index
    %c1_263 = arith.constant 1 : index
    %c0_264 = arith.constant 0 : index
    %c0_265 = arith.constant 0 : index
    %356 = vector.load %arg11[%c1_262, %c1_263, %c0_264, %c0_265] : memref<2x4x32x8xbf16, #tpu.memory_space<vmem>>, vector<1x1x32x8xbf16>
    %357 = vector.shape_cast %356 : vector<1x1x32x8xbf16> to vector<32x8xbf16>
    %cst_266 = arith.constant dense<0.000000e+00> : vector<34x8xf32>
    %358 = tpu.matmul %299, %357, %cst_266 {dimension_numbers = #tpu.dot_dimension_numbers<[1], [0], [0], [1], [0, 0, 1, 1], [], []>} : vector<34x32xbf16>, vector<32x8xbf16>, vector<34x8xf32> -> vector<34x8xf32>
    %c1_267 = arith.constant 1 : index
    %c1_268 = arith.constant 1 : index
    %c0_269 = arith.constant 0 : index
    %c0_270 = arith.constant 0 : index
    %359 = vector.load %arg12[%c1_267, %c1_268, %c0_269, %c0_270] : memref<2x4x1x8xf32, #tpu.memory_space<vmem>>, vector<1x1x1x8xf32>
    %360 = vector.shape_cast %359 : vector<1x1x1x8xf32> to vector<1x8xf32>
    %361 = vector.broadcast %360 : vector<1x8xf32> to vector<34x8xf32>
    %362 = arith.addf %358, %361 : vector<34x8xf32>
    %363 = arith.truncf %348 : vector<34x8xf32> to vector<34x8xbf16>
    %364 = arith.truncf %355 : vector<34x8xf32> to vector<34x8xbf16>
    %cst_271 = arith.constant dense<0.000000e+00> : vector<34x34xf32>
    %365 = tpu.matmul %363, %364, %cst_271 {dimension_numbers = #tpu.dot_dimension_numbers<[1], [1], [0], [0], [0, 0, 1, 0], [], []>} : vector<34x8xbf16>, vector<34x8xbf16>, vector<34x34xf32> -> vector<34x34xf32>
    %366 = arith.addf %365, %5 : vector<34x34xf32>
    %cst_272 = arith.constant dense<0xFF800000> : vector<34xf32>
    %367 = vector.multi_reduction <maximumf>, %366, %cst_272 [1] : vector<34x34xf32> to vector<34xf32>
    %368 = vector.shape_cast %367 : vector<34xf32> to vector<34x1xf32>
    %369 = vector.broadcast %368 : vector<34x1xf32> to vector<34x34xf32>
    %370 = arith.subf %366, %369 : vector<34x34xf32>
    %371 = math.exp %370 : vector<34x34xf32>
    %cst_273 = arith.constant dense<0.000000e+00> : vector<34xf32>
    %372 = vector.multi_reduction <add>, %371, %cst_273 [1] : vector<34x34xf32> to vector<34xf32>
    %373 = vector.shape_cast %372 : vector<34xf32> to vector<34x1xf32>
    %374 = tpu.reciprocal %373 {approx = true} : vector<34x1xf32> -> vector<34x1xf32>
    %375 = vector.broadcast %374 : vector<34x1xf32> to vector<34x34xf32>
    %376 = arith.mulf %371, %375 : vector<34x34xf32>
    %377 = arith.truncf %376 : vector<34x34xf32> to vector<34x34xbf16>
    %378 = arith.truncf %362 : vector<34x8xf32> to vector<34x8xbf16>
    %cst_274 = arith.constant dense<0.000000e+00> : vector<34x8xf32>
    %379 = tpu.matmul %377, %378, %cst_274 {dimension_numbers = #tpu.dot_dimension_numbers<[1], [0], [0], [1], [0, 0, 1, 1], [], []>} : vector<34x34xbf16>, vector<34x8xbf16>, vector<34x8xf32> -> vector<34x8xf32>
    %380 = arith.truncf %379 : vector<34x8xf32> to vector<34x8xbf16>
    %c1_275 = arith.constant 1 : index
    %c1_276 = arith.constant 1 : index
    %c0_277 = arith.constant 0 : index
    %c0_278 = arith.constant 0 : index
    %381 = vector.load %arg13[%c1_275, %c1_276, %c0_277, %c0_278] : memref<2x4x8x32xbf16, #tpu.memory_space<vmem>>, vector<1x1x8x32xbf16>
    %382 = vector.shape_cast %381 : vector<1x1x8x32xbf16> to vector<8x32xbf16>
    %cst_279 = arith.constant dense<0.000000e+00> : vector<34x32xf32>
    %383 = tpu.matmul %380, %382, %cst_279 {dimension_numbers = #tpu.dot_dimension_numbers<[1], [0], [0], [1], [0, 0, 1, 1], [], []>} : vector<34x8xbf16>, vector<8x32xbf16>, vector<34x32xf32> -> vector<34x32xf32>
    %384 = arith.addf %341, %383 : vector<34x32xf32>
    %c1_280 = arith.constant 1 : index
    %c2_281 = arith.constant 2 : index
    %c0_282 = arith.constant 0 : index
    %c0_283 = arith.constant 0 : index
    %385 = vector.load %arg7[%c1_280, %c2_281, %c0_282, %c0_283] : memref<2x4x32x8xbf16, #tpu.memory_space<vmem>>, vector<1x1x32x8xbf16>
    %386 = vector.shape_cast %385 : vector<1x1x32x8xbf16> to vector<32x8xbf16>
    %cst_284 = arith.constant dense<0.000000e+00> : vector<34x8xf32>
    %387 = tpu.matmul %299, %386, %cst_284 {dimension_numbers = #tpu.dot_dimension_numbers<[1], [0], [0], [1], [0, 0, 1, 1], [], []>} : vector<34x32xbf16>, vector<32x8xbf16>, vector<34x8xf32> -> vector<34x8xf32>
    %c1_285 = arith.constant 1 : index
    %c2_286 = arith.constant 2 : index
    %c0_287 = arith.constant 0 : index
    %c0_288 = arith.constant 0 : index
    %388 = vector.load %arg8[%c1_285, %c2_286, %c0_287, %c0_288] : memref<2x4x1x8xf32, #tpu.memory_space<vmem>>, vector<1x1x1x8xf32>
    %389 = vector.shape_cast %388 : vector<1x1x1x8xf32> to vector<1x8xf32>
    %390 = vector.broadcast %389 : vector<1x8xf32> to vector<34x8xf32>
    %391 = arith.addf %387, %390 : vector<34x8xf32>
    %c1_289 = arith.constant 1 : index
    %c2_290 = arith.constant 2 : index
    %c0_291 = arith.constant 0 : index
    %c0_292 = arith.constant 0 : index
    %392 = vector.load %arg9[%c1_289, %c2_290, %c0_291, %c0_292] : memref<2x4x32x8xbf16, #tpu.memory_space<vmem>>, vector<1x1x32x8xbf16>
    %393 = vector.shape_cast %392 : vector<1x1x32x8xbf16> to vector<32x8xbf16>
    %cst_293 = arith.constant dense<0.000000e+00> : vector<34x8xf32>
    %394 = tpu.matmul %299, %393, %cst_293 {dimension_numbers = #tpu.dot_dimension_numbers<[1], [0], [0], [1], [0, 0, 1, 1], [], []>} : vector<34x32xbf16>, vector<32x8xbf16>, vector<34x8xf32> -> vector<34x8xf32>
    %c1_294 = arith.constant 1 : index
    %c2_295 = arith.constant 2 : index
    %c0_296 = arith.constant 0 : index
    %c0_297 = arith.constant 0 : index
    %395 = vector.load %arg10[%c1_294, %c2_295, %c0_296, %c0_297] : memref<2x4x1x8xf32, #tpu.memory_space<vmem>>, vector<1x1x1x8xf32>
    %396 = vector.shape_cast %395 : vector<1x1x1x8xf32> to vector<1x8xf32>
    %397 = vector.broadcast %396 : vector<1x8xf32> to vector<34x8xf32>
    %398 = arith.addf %394, %397 : vector<34x8xf32>
    %c1_298 = arith.constant 1 : index
    %c2_299 = arith.constant 2 : index
    %c0_300 = arith.constant 0 : index
    %c0_301 = arith.constant 0 : index
    %399 = vector.load %arg11[%c1_298, %c2_299, %c0_300, %c0_301] : memref<2x4x32x8xbf16, #tpu.memory_space<vmem>>, vector<1x1x32x8xbf16>
    %400 = vector.shape_cast %399 : vector<1x1x32x8xbf16> to vector<32x8xbf16>
    %cst_302 = arith.constant dense<0.000000e+00> : vector<34x8xf32>
    %401 = tpu.matmul %299, %400, %cst_302 {dimension_numbers = #tpu.dot_dimension_numbers<[1], [0], [0], [1], [0, 0, 1, 1], [], []>} : vector<34x32xbf16>, vector<32x8xbf16>, vector<34x8xf32> -> vector<34x8xf32>
    %c1_303 = arith.constant 1 : index
    %c2_304 = arith.constant 2 : index
    %c0_305 = arith.constant 0 : index
    %c0_306 = arith.constant 0 : index
    %402 = vector.load %arg12[%c1_303, %c2_304, %c0_305, %c0_306] : memref<2x4x1x8xf32, #tpu.memory_space<vmem>>, vector<1x1x1x8xf32>
    %403 = vector.shape_cast %402 : vector<1x1x1x8xf32> to vector<1x8xf32>
    %404 = vector.broadcast %403 : vector<1x8xf32> to vector<34x8xf32>
    %405 = arith.addf %401, %404 : vector<34x8xf32>
    %406 = arith.truncf %391 : vector<34x8xf32> to vector<34x8xbf16>
    %407 = arith.truncf %398 : vector<34x8xf32> to vector<34x8xbf16>
    %cst_307 = arith.constant dense<0.000000e+00> : vector<34x34xf32>
    %408 = tpu.matmul %406, %407, %cst_307 {dimension_numbers = #tpu.dot_dimension_numbers<[1], [1], [0], [0], [0, 0, 1, 0], [], []>} : vector<34x8xbf16>, vector<34x8xbf16>, vector<34x34xf32> -> vector<34x34xf32>
    %409 = arith.addf %408, %5 : vector<34x34xf32>
    %cst_308 = arith.constant dense<0xFF800000> : vector<34xf32>
    %410 = vector.multi_reduction <maximumf>, %409, %cst_308 [1] : vector<34x34xf32> to vector<34xf32>
    %411 = vector.shape_cast %410 : vector<34xf32> to vector<34x1xf32>
    %412 = vector.broadcast %411 : vector<34x1xf32> to vector<34x34xf32>
    %413 = arith.subf %409, %412 : vector<34x34xf32>
    %414 = math.exp %413 : vector<34x34xf32>
    %cst_309 = arith.constant dense<0.000000e+00> : vector<34xf32>
    %415 = vector.multi_reduction <add>, %414, %cst_309 [1] : vector<34x34xf32> to vector<34xf32>
    %416 = vector.shape_cast %415 : vector<34xf32> to vector<34x1xf32>
    %417 = tpu.reciprocal %416 {approx = true} : vector<34x1xf32> -> vector<34x1xf32>
    %418 = vector.broadcast %417 : vector<34x1xf32> to vector<34x34xf32>
    %419 = arith.mulf %414, %418 : vector<34x34xf32>
    %420 = arith.truncf %419 : vector<34x34xf32> to vector<34x34xbf16>
    %421 = arith.truncf %405 : vector<34x8xf32> to vector<34x8xbf16>
    %cst_310 = arith.constant dense<0.000000e+00> : vector<34x8xf32>
    %422 = tpu.matmul %420, %421, %cst_310 {dimension_numbers = #tpu.dot_dimension_numbers<[1], [0], [0], [1], [0, 0, 1, 1], [], []>} : vector<34x34xbf16>, vector<34x8xbf16>, vector<34x8xf32> -> vector<34x8xf32>
    %423 = arith.truncf %422 : vector<34x8xf32> to vector<34x8xbf16>
    %c1_311 = arith.constant 1 : index
    %c2_312 = arith.constant 2 : index
    %c0_313 = arith.constant 0 : index
    %c0_314 = arith.constant 0 : index
    %424 = vector.load %arg13[%c1_311, %c2_312, %c0_313, %c0_314] : memref<2x4x8x32xbf16, #tpu.memory_space<vmem>>, vector<1x1x8x32xbf16>
    %425 = vector.shape_cast %424 : vector<1x1x8x32xbf16> to vector<8x32xbf16>
    %cst_315 = arith.constant dense<0.000000e+00> : vector<34x32xf32>
    %426 = tpu.matmul %423, %425, %cst_315 {dimension_numbers = #tpu.dot_dimension_numbers<[1], [0], [0], [1], [0, 0, 1, 1], [], []>} : vector<34x8xbf16>, vector<8x32xbf16>, vector<34x32xf32> -> vector<34x32xf32>
    %427 = arith.addf %384, %426 : vector<34x32xf32>
    %c1_316 = arith.constant 1 : index
    %c3_317 = arith.constant 3 : index
    %c0_318 = arith.constant 0 : index
    %c0_319 = arith.constant 0 : index
    %428 = vector.load %arg7[%c1_316, %c3_317, %c0_318, %c0_319] : memref<2x4x32x8xbf16, #tpu.memory_space<vmem>>, vector<1x1x32x8xbf16>
    %429 = vector.shape_cast %428 : vector<1x1x32x8xbf16> to vector<32x8xbf16>
    %cst_320 = arith.constant dense<0.000000e+00> : vector<34x8xf32>
    %430 = tpu.matmul %299, %429, %cst_320 {dimension_numbers = #tpu.dot_dimension_numbers<[1], [0], [0], [1], [0, 0, 1, 1], [], []>} : vector<34x32xbf16>, vector<32x8xbf16>, vector<34x8xf32> -> vector<34x8xf32>
    %c1_321 = arith.constant 1 : index
    %c3_322 = arith.constant 3 : index
    %c0_323 = arith.constant 0 : index
    %c0_324 = arith.constant 0 : index
    %431 = vector.load %arg8[%c1_321, %c3_322, %c0_323, %c0_324] : memref<2x4x1x8xf32, #tpu.memory_space<vmem>>, vector<1x1x1x8xf32>
    %432 = vector.shape_cast %431 : vector<1x1x1x8xf32> to vector<1x8xf32>
    %433 = vector.broadcast %432 : vector<1x8xf32> to vector<34x8xf32>
    %434 = arith.addf %430, %433 : vector<34x8xf32>
    %c1_325 = arith.constant 1 : index
    %c3_326 = arith.constant 3 : index
    %c0_327 = arith.constant 0 : index
    %c0_328 = arith.constant 0 : index
    %435 = vector.load %arg9[%c1_325, %c3_326, %c0_327, %c0_328] : memref<2x4x32x8xbf16, #tpu.memory_space<vmem>>, vector<1x1x32x8xbf16>
    %436 = vector.shape_cast %435 : vector<1x1x32x8xbf16> to vector<32x8xbf16>
    %cst_329 = arith.constant dense<0.000000e+00> : vector<34x8xf32>
    %437 = tpu.matmul %299, %436, %cst_329 {dimension_numbers = #tpu.dot_dimension_numbers<[1], [0], [0], [1], [0, 0, 1, 1], [], []>} : vector<34x32xbf16>, vector<32x8xbf16>, vector<34x8xf32> -> vector<34x8xf32>
    %c1_330 = arith.constant 1 : index
    %c3_331 = arith.constant 3 : index
    %c0_332 = arith.constant 0 : index
    %c0_333 = arith.constant 0 : index
    %438 = vector.load %arg10[%c1_330, %c3_331, %c0_332, %c0_333] : memref<2x4x1x8xf32, #tpu.memory_space<vmem>>, vector<1x1x1x8xf32>
    %439 = vector.shape_cast %438 : vector<1x1x1x8xf32> to vector<1x8xf32>
    %440 = vector.broadcast %439 : vector<1x8xf32> to vector<34x8xf32>
    %441 = arith.addf %437, %440 : vector<34x8xf32>
    %c1_334 = arith.constant 1 : index
    %c3_335 = arith.constant 3 : index
    %c0_336 = arith.constant 0 : index
    %c0_337 = arith.constant 0 : index
    %442 = vector.load %arg11[%c1_334, %c3_335, %c0_336, %c0_337] : memref<2x4x32x8xbf16, #tpu.memory_space<vmem>>, vector<1x1x32x8xbf16>
    %443 = vector.shape_cast %442 : vector<1x1x32x8xbf16> to vector<32x8xbf16>
    %cst_338 = arith.constant dense<0.000000e+00> : vector<34x8xf32>
    %444 = tpu.matmul %299, %443, %cst_338 {dimension_numbers = #tpu.dot_dimension_numbers<[1], [0], [0], [1], [0, 0, 1, 1], [], []>} : vector<34x32xbf16>, vector<32x8xbf16>, vector<34x8xf32> -> vector<34x8xf32>
    %c1_339 = arith.constant 1 : index
    %c3_340 = arith.constant 3 : index
    %c0_341 = arith.constant 0 : index
    %c0_342 = arith.constant 0 : index
    %445 = vector.load %arg12[%c1_339, %c3_340, %c0_341, %c0_342] : memref<2x4x1x8xf32, #tpu.memory_space<vmem>>, vector<1x1x1x8xf32>
    %446 = vector.shape_cast %445 : vector<1x1x1x8xf32> to vector<1x8xf32>
    %447 = vector.broadcast %446 : vector<1x8xf32> to vector<34x8xf32>
    %448 = arith.addf %444, %447 : vector<34x8xf32>
    %449 = arith.truncf %434 : vector<34x8xf32> to vector<34x8xbf16>
    %450 = arith.truncf %441 : vector<34x8xf32> to vector<34x8xbf16>
    %cst_343 = arith.constant dense<0.000000e+00> : vector<34x34xf32>
    %451 = tpu.matmul %449, %450, %cst_343 {dimension_numbers = #tpu.dot_dimension_numbers<[1], [1], [0], [0], [0, 0, 1, 0], [], []>} : vector<34x8xbf16>, vector<34x8xbf16>, vector<34x34xf32> -> vector<34x34xf32>
    %452 = arith.addf %451, %5 : vector<34x34xf32>
    %cst_344 = arith.constant dense<0xFF800000> : vector<34xf32>
    %453 = vector.multi_reduction <maximumf>, %452, %cst_344 [1] : vector<34x34xf32> to vector<34xf32>
    %454 = vector.shape_cast %453 : vector<34xf32> to vector<34x1xf32>
    %455 = vector.broadcast %454 : vector<34x1xf32> to vector<34x34xf32>
    %456 = arith.subf %452, %455 : vector<34x34xf32>
    %457 = math.exp %456 : vector<34x34xf32>
    %cst_345 = arith.constant dense<0.000000e+00> : vector<34xf32>
    %458 = vector.multi_reduction <add>, %457, %cst_345 [1] : vector<34x34xf32> to vector<34xf32>
    %459 = vector.shape_cast %458 : vector<34xf32> to vector<34x1xf32>
    %460 = tpu.reciprocal %459 {approx = true} : vector<34x1xf32> -> vector<34x1xf32>
    %461 = vector.broadcast %460 : vector<34x1xf32> to vector<34x34xf32>
    %462 = arith.mulf %457, %461 : vector<34x34xf32>
    %463 = arith.truncf %462 : vector<34x34xf32> to vector<34x34xbf16>
    %464 = arith.truncf %448 : vector<34x8xf32> to vector<34x8xbf16>
    %cst_346 = arith.constant dense<0.000000e+00> : vector<34x8xf32>
    %465 = tpu.matmul %463, %464, %cst_346 {dimension_numbers = #tpu.dot_dimension_numbers<[1], [0], [0], [1], [0, 0, 1, 1], [], []>} : vector<34x34xbf16>, vector<34x8xbf16>, vector<34x8xf32> -> vector<34x8xf32>
    %466 = arith.truncf %465 : vector<34x8xf32> to vector<34x8xbf16>
    %c1_347 = arith.constant 1 : index
    %c3_348 = arith.constant 3 : index
    %c0_349 = arith.constant 0 : index
    %c0_350 = arith.constant 0 : index
    %467 = vector.load %arg13[%c1_347, %c3_348, %c0_349, %c0_350] : memref<2x4x8x32xbf16, #tpu.memory_space<vmem>>, vector<1x1x8x32xbf16>
    %468 = vector.shape_cast %467 : vector<1x1x8x32xbf16> to vector<8x32xbf16>
    %cst_351 = arith.constant dense<0.000000e+00> : vector<34x32xf32>
    %469 = tpu.matmul %466, %468, %cst_351 {dimension_numbers = #tpu.dot_dimension_numbers<[1], [0], [0], [1], [0, 0, 1, 1], [], []>} : vector<34x8xbf16>, vector<8x32xbf16>, vector<34x32xf32> -> vector<34x32xf32>
    %470 = arith.addf %427, %469 : vector<34x32xf32>
    %c1_352 = arith.constant 1 : index
    %c0_353 = arith.constant 0 : index
    %c0_354 = arith.constant 0 : index
    %471 = vector.load %arg14[%c1_352, %c0_353, %c0_354] : memref<2x1x32xf32, #tpu.memory_space<vmem>>, vector<1x1x32xf32>
    %472 = vector.shape_cast %471 : vector<1x1x32xf32> to vector<1x32xf32>
    %473 = vector.broadcast %472 : vector<1x32xf32> to vector<34x32xf32>
    %474 = arith.addf %470, %473 : vector<34x32xf32>
    %c1_355 = arith.constant 1 : index
    %c0_356 = arith.constant 0 : index
    %c0_357 = arith.constant 0 : index
    %475 = vector.load %arg15[%c1_355, %c0_356, %c0_357] : memref<2x1x32xf32, #tpu.memory_space<vmem>>, vector<1x1x32xf32>
    %476 = vector.shape_cast %475 : vector<1x1x32xf32> to vector<1x32xf32>
    %477 = vector.broadcast %476 : vector<1x32xf32> to vector<34x32xf32>
    %478 = arith.mulf %474, %477 : vector<34x32xf32>
    %479 = arith.addf %272, %478 : vector<34x32xf32>
    %c1_358 = arith.constant 1 : index
    %c0_359 = arith.constant 0 : index
    %c0_360 = arith.constant 0 : index
    %480 = vector.load %arg16[%c1_358, %c0_359, %c0_360] : memref<2x1x32xf32, #tpu.memory_space<vmem>>, vector<1x1x32xf32>
    %481 = vector.shape_cast %480 : vector<1x1x32xf32> to vector<1x32xf32>
    %c1_361 = arith.constant 1 : index
    %c0_362 = arith.constant 0 : index
    %c0_363 = arith.constant 0 : index
    %482 = vector.load %arg17[%c1_361, %c0_362, %c0_363] : memref<2x1x32xf32, #tpu.memory_space<vmem>>, vector<1x1x32xf32>
    %483 = vector.shape_cast %482 : vector<1x1x32xf32> to vector<1x32xf32>
    %cst_364 = arith.constant dense<0.000000e+00> : vector<34xf32>
    %484 = vector.multi_reduction <add>, %479, %cst_364 [1] : vector<34x32xf32> to vector<34xf32>
    %485 = vector.shape_cast %484 : vector<34xf32> to vector<34x1xf32>
    %cst_365 = arith.constant 3.200000e+01 : f32
    %486 = vector.broadcast %cst_365 : f32 to vector<34x1xf32>
    %487 = arith.divf %485, %486 : vector<34x1xf32>
    %488 = vector.broadcast %487 : vector<34x1xf32> to vector<34x32xf32>
    %489 = arith.subf %479, %488 : vector<34x32xf32>
    %490 = arith.mulf %489, %489 : vector<34x32xf32>
    %cst_366 = arith.constant dense<0.000000e+00> : vector<34xf32>
    %491 = vector.multi_reduction <add>, %490, %cst_366 [1] : vector<34x32xf32> to vector<34xf32>
    %492 = vector.shape_cast %491 : vector<34xf32> to vector<34x1xf32>
    %cst_367 = arith.constant 3.200000e+01 : f32
    %493 = vector.broadcast %cst_367 : f32 to vector<34x1xf32>
    %494 = arith.divf %492, %493 : vector<34x1xf32>
    %495 = vector.broadcast %487 : vector<34x1xf32> to vector<34x32xf32>
    %496 = arith.subf %479, %495 : vector<34x32xf32>
    %cst_368 = arith.constant 9.99999997E-7 : f32
    %497 = vector.broadcast %cst_368 : f32 to vector<34x1xf32>
    %498 = arith.addf %494, %497 : vector<34x1xf32>
    %499 = math.rsqrt %498 : vector<34x1xf32>
    %500 = vector.broadcast %499 : vector<34x1xf32> to vector<34x32xf32>
    %501 = arith.mulf %496, %500 : vector<34x32xf32>
    %502 = vector.broadcast %481 : vector<1x32xf32> to vector<34x32xf32>
    %503 = arith.mulf %501, %502 : vector<34x32xf32>
    %504 = vector.broadcast %483 : vector<1x32xf32> to vector<34x32xf32>
    %505 = arith.addf %503, %504 : vector<34x32xf32>
    %506 = arith.truncf %505 : vector<34x32xf32> to vector<34x32xbf16>
    %c1_369 = arith.constant 1 : index
    %c0_370 = arith.constant 0 : index
    %c0_371 = arith.constant 0 : index
    %507 = vector.load %arg18[%c1_369, %c0_370, %c0_371] : memref<2x32x128xbf16, #tpu.memory_space<vmem>>, vector<1x32x128xbf16>
    %508 = vector.shape_cast %507 : vector<1x32x128xbf16> to vector<32x128xbf16>
    %cst_372 = arith.constant dense<0.000000e+00> : vector<34x128xf32>
    %509 = tpu.matmul %506, %508, %cst_372 {dimension_numbers = #tpu.dot_dimension_numbers<[1], [0], [0], [1], [0, 0, 1, 1], [], []>} : vector<34x32xbf16>, vector<32x128xbf16>, vector<34x128xf32> -> vector<34x128xf32>
    %c1_373 = arith.constant 1 : index
    %c0_374 = arith.constant 0 : index
    %c0_375 = arith.constant 0 : index
    %510 = vector.load %arg19[%c1_373, %c0_374, %c0_375] : memref<2x1x128xf32, #tpu.memory_space<vmem>>, vector<1x1x128xf32>
    %511 = vector.shape_cast %510 : vector<1x1x128xf32> to vector<1x128xf32>
    %512 = vector.broadcast %511 : vector<1x128xf32> to vector<34x128xf32>
    %513 = arith.addf %509, %512 : vector<34x128xf32>
    %cst_376 = arith.constant 5.000000e-01 : f32
    %514 = vector.broadcast %cst_376 : f32 to vector<34x128xf32>
    %515 = arith.mulf %514, %513 : vector<34x128xf32>
    %cst_377 = arith.constant 4.471500e-02 : f32
    %516 = vector.broadcast %cst_377 : f32 to vector<34x128xf32>
    %517 = arith.mulf %516, %513 : vector<34x128xf32>
    %518 = arith.mulf %517, %513 : vector<34x128xf32>
    %519 = arith.mulf %518, %513 : vector<34x128xf32>
    %520 = arith.addf %513, %519 : vector<34x128xf32>
    %cst_378 = arith.constant 0.797884583 : f32
    %521 = vector.broadcast %cst_378 : f32 to vector<34x128xf32>
    %522 = arith.mulf %521, %520 : vector<34x128xf32>
    %523 = math.tanh %522 : vector<34x128xf32>
    %cst_379 = arith.constant 1.000000e+00 : f32
    %524 = vector.broadcast %cst_379 : f32 to vector<34x128xf32>
    %525 = arith.addf %524, %523 : vector<34x128xf32>
    %526 = arith.mulf %515, %525 : vector<34x128xf32>
    %527 = arith.truncf %526 : vector<34x128xf32> to vector<34x128xbf16>
    %c1_380 = arith.constant 1 : index
    %c0_381 = arith.constant 0 : index
    %c0_382 = arith.constant 0 : index
    %528 = vector.load %arg20[%c1_380, %c0_381, %c0_382] : memref<2x128x32xbf16, #tpu.memory_space<vmem>>, vector<1x128x32xbf16>
    %529 = vector.shape_cast %528 : vector<1x128x32xbf16> to vector<128x32xbf16>
    %cst_383 = arith.constant dense<0.000000e+00> : vector<34x32xf32>
    %530 = tpu.matmul %527, %529, %cst_383 {dimension_numbers = #tpu.dot_dimension_numbers<[1], [0], [0], [1], [0, 0, 1, 1], [], []>} : vector<34x128xbf16>, vector<128x32xbf16>, vector<34x32xf32> -> vector<34x32xf32>
    %c1_384 = arith.constant 1 : index
    %c0_385 = arith.constant 0 : index
    %c0_386 = arith.constant 0 : index
    %531 = vector.load %arg21[%c1_384, %c0_385, %c0_386] : memref<2x1x32xf32, #tpu.memory_space<vmem>>, vector<1x1x32xf32>
    %532 = vector.shape_cast %531 : vector<1x1x32xf32> to vector<1x32xf32>
    %533 = vector.broadcast %532 : vector<1x32xf32> to vector<34x32xf32>
    %534 = arith.addf %530, %533 : vector<34x32xf32>
    %c1_387 = arith.constant 1 : index
    %c0_388 = arith.constant 0 : index
    %c0_389 = arith.constant 0 : index
    %535 = vector.load %arg22[%c1_387, %c0_388, %c0_389] : memref<2x1x32xf32, #tpu.memory_space<vmem>>, vector<1x1x32xf32>
    %536 = vector.shape_cast %535 : vector<1x1x32xf32> to vector<1x32xf32>
    %537 = vector.broadcast %536 : vector<1x32xf32> to vector<34x32xf32>
    %538 = arith.mulf %534, %537 : vector<34x32xf32>
    %539 = arith.addf %479, %538 : vector<34x32xf32>
    %c0_390 = arith.constant 0 : index
    %c0_391 = arith.constant 0 : index
    %540 = vector.load %arg23[%c0_390, %c0_391] : memref<1x32xf32, #tpu.memory_space<vmem>>, vector<1x32xf32>
    %c0_392 = arith.constant 0 : index
    %c0_393 = arith.constant 0 : index
    %541 = vector.load %arg24[%c0_392, %c0_393] : memref<1x32xf32, #tpu.memory_space<vmem>>, vector<1x32xf32>
    %cst_394 = arith.constant dense<0.000000e+00> : vector<34xf32>
    %542 = vector.multi_reduction <add>, %539, %cst_394 [1] : vector<34x32xf32> to vector<34xf32>
    %543 = vector.shape_cast %542 : vector<34xf32> to vector<34x1xf32>
    %cst_395 = arith.constant 3.200000e+01 : f32
    %544 = vector.broadcast %cst_395 : f32 to vector<34x1xf32>
    %545 = arith.divf %543, %544 : vector<34x1xf32>
    %546 = vector.broadcast %545 : vector<34x1xf32> to vector<34x32xf32>
    %547 = arith.subf %539, %546 : vector<34x32xf32>
    %548 = arith.mulf %547, %547 : vector<34x32xf32>
    %cst_396 = arith.constant dense<0.000000e+00> : vector<34xf32>
    %549 = vector.multi_reduction <add>, %548, %cst_396 [1] : vector<34x32xf32> to vector<34xf32>
    %550 = vector.shape_cast %549 : vector<34xf32> to vector<34x1xf32>
    %cst_397 = arith.constant 3.200000e+01 : f32
    %551 = vector.broadcast %cst_397 : f32 to vector<34x1xf32>
    %552 = arith.divf %550, %551 : vector<34x1xf32>
    %553 = vector.broadcast %545 : vector<34x1xf32> to vector<34x32xf32>
    %554 = arith.subf %539, %553 : vector<34x32xf32>
    %cst_398 = arith.constant 9.99999997E-7 : f32
    %555 = vector.broadcast %cst_398 : f32 to vector<34x1xf32>
    %556 = arith.addf %552, %555 : vector<34x1xf32>
    %557 = math.rsqrt %556 : vector<34x1xf32>
    %558 = vector.broadcast %557 : vector<34x1xf32> to vector<34x32xf32>
    %559 = arith.mulf %554, %558 : vector<34x32xf32>
    %560 = vector.broadcast %540 : vector<1x32xf32> to vector<34x32xf32>
    %561 = arith.mulf %559, %560 : vector<34x32xf32>
    %562 = vector.broadcast %541 : vector<1x32xf32> to vector<34x32xf32>
    %563 = arith.addf %561, %562 : vector<34x32xf32>
    %c0_399 = arith.constant 0 : index
    %c0_400 = arith.constant 0 : index
    %564 = vector.load %arg4[%c0_399, %c0_400] : memref<2x34xf32, #tpu.memory_space<vmem>>, vector<2x34xf32>
    %cst_401 = arith.constant dense<0.000000e+00> : vector<2x32xf32>
    %565 = tpu.matmul %564, %563, %cst_401 {dimension_numbers = #tpu.dot_dimension_numbers<[1], [0], [0], [1], [0, 0, 1, 1], [], []>} : vector<2x34xf32>, vector<34x32xf32>, vector<2x32xf32> -> vector<2x32xf32>
    %c0_402 = arith.constant 0 : index
    %c0_403 = arith.constant 0 : index
    %566 = vector.load %arg25[%c0_402, %c0_403] : memref<32x10xf32, #tpu.memory_space<vmem>>, vector<32x10xf32>
    %cst_404 = arith.constant dense<0.000000e+00> : vector<2x10xf32>
    %567 = tpu.matmul %565, %566, %cst_404 {dimension_numbers = #tpu.dot_dimension_numbers<[1], [0], [0], [1], [0, 0, 1, 1], [], []>} : vector<2x32xf32>, vector<32x10xf32>, vector<2x10xf32> -> vector<2x10xf32>
    %c0_405 = arith.constant 0 : index
    %c0_406 = arith.constant 0 : index
    %568 = vector.load %arg26[%c0_405, %c0_406] : memref<1x10xf32, #tpu.memory_space<vmem>>, vector<1x10xf32>
    %569 = vector.broadcast %568 : vector<1x10xf32> to vector<2x10xf32>
    %570 = arith.addf %567, %569 : vector<2x10xf32>
    %c0_407 = arith.constant 0 : index
    %c0_408 = arith.constant 0 : index
    %571 = vector.load %arg27[%c0_407, %c0_408] : memref<2x10xf32, #tpu.memory_space<vmem>>, vector<2x10xf32>
    tpu.vector_store %arg27[%c0_407, %c0_408], %570 {strides = array<i32>} : memref<2x10xf32, #tpu.memory_space<vmem>>, vector<2x10xf32>,
    return
  }
}

</mosaic_0001>

<bundles_post_ra>
// kernel: combined_model_forward.1
= control target key start
LH: loop header
LB: loop body
LE: loop exit
PB: predicated region body
PF: predicated region fallthrough
CT: control target
= control target key end

     0   :  { %s9604_s0 = inlined_call_operand.vmem [shape: bf16[34,48], index: 0, kind: input, shape index: {}]   ;;  %s9605_s1 = inlined_call_operand.vmem [shape: bf16[48,32], index: 1, kind: input, shape index: {}]   ;;  %s9606_s2 = inlined_call_operand.vmem [shape: f32[34,32], index: 2, kind: input, shape index: {}]   ;;  %s9607_s3 = inlined_call_operand.vmem [shape: f32[34,34], index: 3, kind: input, shape index: {}]   ;;  %s9608_s4 = inlined_call_operand.vmem [shape: f32[2,34], index: 4, kind: input, shape index: {}]   ;;  %s9609_s5 = inlined_call_operand.vmem [shape: f32[2,1,32], index: 5, kind: input, shape index: {}]   ;;  %s9610_s6 = inlined_call_operand.vmem [shape: f32[2,1,32], index: 6, kind: input, shape index: {}]   ;;  %s9611_s7 = inlined_call_operand.vmem [shape: bf16[2,4,32,8], index: 7, kind: input, shape index: {}]   ;;  %s9612_s8 = inlined_call_operand.vmem [shape: f32[2,4,1,8], index: 8, kind: input, shape index: {}]   ;;  %s9613_s9 = inlined_call_operand.vmem [shape: bf16[2,4,32,8], index: 9, kind: input, shape index: {}]   ;;  %s9614_s10 = inlined_call_operand.vmem [shape: f32[2,4,1,8], index: 10, kind: input, shape index: {}]   ;;  %s9615_s11 = inlined_call_operand.vmem [shape: bf16[2,4,32,8], index: 11, kind: input, shape index: {}]   ;;  %s9616_s12 = inlined_call_operand.vmem [shape: f32[2,4,1,8], index: 12, kind: input, shape index: {}]   ;;  %s9617_s13 = inlined_call_operand.vmem [shape: bf16[2,4,8,32], index: 13, kind: input, shape index: {}]   ;;  %s9618_s14 = inlined_call_operand.vmem [shape: f32[2,1,32], index: 14, kind: input, shape index: {}]   ;;  %s9619_s15 = inlined_call_operand.vmem [shape: f32[2,1,32], index: 15, kind: input, shape index: {}]   ;;  %s9620_s16 = inlined_call_operand.vmem [shape: f32[2,1,32], index: 16, kind: input, shape index: {}]   ;;  %s9621_s17 = inlined_call_operand.vmem [shape: f32[2,1,32], index: 17, kind: input, shape index: {}]   ;;  %s9622_s18 = inlined_call_operand.vmem [shape: bf16[2,32,128], index: 18, kind: input, shape index: {}]   ;;  %s9623_s19 = inlined_call_operand.vmem [shape: f32[2,1,128], index: 19, kind: input, shape index: {}]   ;;  %s9624_s20 = inlined_call_operand.vmem [shape: bf16[2,128,32], index: 20, kind: input, shape index: {}]   ;;  %s9625_s21 = inlined_call_operand.vmem [shape: f32[2,1,32], index: 21, kind: input, shape index: {}]   ;;  %s9626_s22 = inlined_call_operand.vmem [shape: f32[2,1,32], index: 22, kind: input, shape index: {}]   ;;  %s9627_s23 = inlined_call_operand.vmem [shape: f32[1,32], index: 23, kind: input, shape index: {}]   ;;  %s9628_s24 = inlined_call_operand.vmem [shape: f32[1,32], index: 24, kind: input, shape index: {}]   ;;  %s9629_s25 = inlined_call_operand.vmem [shape: f32[32,10], index: 25, kind: input, shape index: {}]   ;;  %s9630_s26 = inlined_call_operand.vmem [shape: f32[1,10], index: 26, kind: input, shape index: {}]   ;;  %s9631_s27 = inlined_call_operand.hbm [shape: f32[2,10], index: 27, kind: output, shape index: {}]  }
   0x1   :  { %9644 = sst [smem:[#allocation5_spill]] %s9604_s0 }
   0x2   :  { %9645 = sst [smem:[#allocation6_spill]] %s9605_s1 }
   0x3   :  { %9646 = sst [smem:[#allocation7_spill]] %s9606_s2 }
   0x4   :  { %9647 = sst [smem:[#allocation8_spill]] %s9607_s3 }
   0x5   :  { %9648 = sst [smem:[#allocation9_spill]] %s9608_s4 }
   0x6   :  { %9649 = sst [smem:[#allocation10_spill]] %s9609_s5 }
   0x7   :  { %9650 = sst [smem:[#allocation11_spill]] %s9610_s6 }
   0x8   :  { %9651 = sst [smem:[#allocation12_spill]] %s9611_s7 }
   0x9   :  { %9652 = sst [smem:[#allocation13_spill]] %s9612_s8 }
   0xa   :  { %9653 = sst [smem:[#allocation14_spill]] %s9613_s9 }
   0xb   :  { %9654 = sst [smem:[#allocation15_spill]] %s9614_s10 }
   0xc   :  { %9655 = sst [smem:[#allocation16_spill]] %s9615_s11 }
   0xd   :  { %9656 = sst [smem:[#allocation17_spill]] %s9631_s27 }
   0xe   :  { %s9657_s8 = sld [smem:[#allocation6_spill]]  ;;  %v7701_v1 = vmov 0.0   ;;  %vm7702_vm0 = vmmov 0   ;;  %vm135_vm1 = vcmask 392192   ;;  %s9658_s29 = sld [smem:[#allocation5_spill]] }
   0xf   :  { %6422 = vmatprep.subr.bf16.mxu0 %v7701_v1  ;;  %6440 = vmatprep.subr.bf16.mxu1 %v7701_v1 }
  0x10   :  { %6428 = vmatprep.mubr.msk.bf16.mxu0 %vm7702_vm0, %v7701_v1  ;;  %6444 = vmatprep.mubr.msk.bf16.mxu1 %vm7702_vm0, %v7701_v1 }
  0x14   :  { %v7358_v0 = vld [vmem:[%s9657_s8] sm:$0xff]   ;;  %v7359_v2 = vld [vmem:[%s9657_s8 + $0x8] sm:$0xff]   ;;  %v7360_v3 = vld [vmem:[%s9657_s8 + $0x10] sm:$0xff]  }
  0x15   :  { %6423 = vmatpush3.bf16.msra.mxu0 %v7358_v0  ;;  %v7361_v4 = vld [vmem:[%s9658_s29] sm:$0xff]   ;;  %v7362_v5 = vld [vmem:[%s9658_s29 + $0x8] sm:$0xff]   ;;  %v7363_v6 = vld [vmem:[%s9658_s29 + $0x10] ss:$0 sps:$4 sm:$0x11]  }
  0x16   :  { %6424 = vmatprep.subr.bf16.mxu0 %v7701_v1 }
  0x19   :  { %6425 = vmatpush3.bf16.msra.mxu0 %v7359_v2 }
  0x1a   :  { %6426 = vmatprep.subr.bf16.mxu0 %v7701_v1 }
  0x1d   :  { %6427 = vmatpush3.bf16.msra.mxu0 %v7360_v3 }
  0x1e   :  { %6472 = vmatprep.subr.bf16.mxu0 %v7701_v1 }
  0x20   :  { %6429 = vmatmul.mubr.msk.bf16.vlgmr.msra.gmra.mrb[0].mxu0 %vm135_vm1, %v7361_v4 }
  0x21   :  { %6432 = vmatprep.mubr.msk.bf16.mxu0 %vm7702_vm0, %v7701_v1 }
  0x28   :  { %6433 = vmatmul.mubr.msk.bf16.gmra.mrb[4].mxu0 %vm135_vm1, %v7362_v5 }
  0x29   :  { %6436 = vmatprep.mubr.msk.bf16.mxu0 %vm7702_vm0, %v7701_v1 }
  0x30   :  { %6437 = vmatmul.mubr.msk.bf16.gmra.mrb[8].mxu0 %vm135_vm1, %v7363_v6 }
  0x31   :  { %6476 = vmatprep.mubr.msk.bf16.mxu0 %vm7702_vm0, %v7701_v1 }
  0x32   :  { %32 = vsyncpa [#allocation3], 0  ;;  %s9659_s4 = sld [smem:[#allocation7_spill]]  ;;  %vm208_vm2 = vcmask 261120   ;;  %vm221_vm3 = vcmask 254976   ;;  %s9660_s11 = sld [smem:[#allocation12_spill]] }
  0x33   :  { %s9661_s7 = sld [smem:[#allocation16_spill]]  ;;  %s9662_s0 = sld [smem:[#allocation10_spill]]  ;;  %vm700_vm4 = vcmask 1040384   ;;  %vm553_vm5 = vcmask 64512   ;;  %vm628_vm6 = vcmask 277504   ;;  %vm641_vm7 = vcmask 271360  }
  0x34   :  { %s9663_s1 = sld [smem:[#allocation11_spill]]  ;;  %s9664_s3 = sld [smem:[#allocation14_spill]]  ;;  %vm1230_vm8 = vcmask 1043456   ;;  %vm5535_vm9 = vcmask 1041408   ;;  %vm5693_vm10 = vcmask 74752  }
  0x35   :  { %s9665_s5 = sld [smem:[#allocation13_spill]]  ;;  %s9666_s2 = sld [smem:[#allocation15_spill]] }
  0x36   :  { %s9667_s30 = sld [smem:[#allocation8_spill]]  ;;  %s9668_s28 = sld [smem:[#allocation9_spill]] }
  0x38   :  { %v99_v7 = vld [vmem:[%s9659_s4] sm:$0xff]  ;;  %v100_v9 = vld [vmem:[%s9659_s4 + $0x8] sm:$0xff]  ;;  %v101_v16 = vld [vmem:[%s9659_s4 + $0x10] sm:$0xff] }
  0x39   :  { %v102_v19 = vld [vmem:[%s9659_s4 + $0x18] sm:$0xff]  ;;  %v103_v26 = vld [vmem:[%s9659_s4 + $0x20] sm:$0x3]  ;;  %v7366_v61 = vld [vmem:[%s9660_s11 + $0x8] sm:$0xff]  }
  0x3a   :  { %v7364_v59 = vld [vmem:[%s9660_s11] sm:$0xff]   ;;  %v7367_v62 = vld [vmem:[%s9661_s7 + $0x8] sm:$0xff]  }
  0x3b   :  { %v7365_v60 = vld [vmem:[%s9661_s7] sm:$0xff]   ;;  %6441 = vmatpush3.bf16.msra.mxu1 %v7364_v59 }
  0x3c   :  { %6473 = vmatpush3.bf16.msra.mxu0 %v7365_v60  ;;  %6442 = vmatprep.subr.bf16.mxu1 %v7701_v1 }
  0x3d   :  { %6474 = vmatprep.subr.bf16.mxu0 %v7701_v1 }
  0x3f   :  { %6443 = vmatpush3.bf16.msra.mxu1 %v7366_v61 }
  0x40   :  { %6475 = vmatpush3.bf16.msra.mxu0 %v7367_v62  ;;  %6456 = vmatprep.subr.bf16.mxu1 %v7701_v1 }
  0x41   :  { %6506 = vmatprep.subr.bf16.mxu0 %v7701_v1 }
  0xf3   :  { %v179_v8 = vpop.f32.mrb[0].mxu0 }
  0xf4   :  { %v7884_v10 = vadd.f32 %v179_v8, %v99_v7  ;;  %v6430_v11 = vpop.f32.mrb[1].mxu0 }
  0xf5   :  { %v182_v12 = vpop.f32.mrb[2].mxu0 }
  0xf6   :  { %v7886_v13 = vadd.f32 %v182_v12, %v100_v9  ;;  %v6431_v14 = vpop.f32.mrb[3].mxu0  ;;  %v209_v15 = vsel %vm208_vm2, %v7884_v10, 0.0 }
  0xf7   :  { %210 = vadd.xlane.f32.xlu0 %v209_v15 }
  0xf8   :  { %v212_v17 = vsel %vm208_vm2, %v7886_v13, 0.0 }
  0xfb   :  { %213 = vadd.xlane.f32.xlu0 %v212_v17  ;;  %v187_v18 = vpop.f32.mrb[4].mxu0  ;;  %v5718_v17 = vld [vmem:[%s9662_s0] ss:$0 sm:$0xff] }
  0xfc   :  { %v7898_v20 = vadd.f32 %v187_v18, %v101_v16  ;;  %v6434_v21 = vpop.f32.mrb[5].mxu0 }
  0xfd   :  { %v190_v22 = vpop.f32.mrb[6].mxu0 }
  0xfe   :  { %v7900_v23 = vadd.f32 %v190_v22, %v102_v19  ;;  %v6435_v24 = vpop.f32.mrb[7].mxu0  ;;  %v215_v25 = vsel %vm208_vm2, %v7898_v20, 0.0 }
  0xff   :  { %216 = vadd.xlane.f32.xlu1 %v215_v25  ;;  %v5719_v25 = vld [vmem:[%s9663_s1] ss:$0 sm:$0xff] }
 0x100   :  { %v218_v27 = vsel %vm208_vm2, %v7900_v23, 0.0 }
 0x103   :  { %219 = vadd.xlane.f32.xlu1 %v218_v27  ;;  %v195_v28 = vpop.f32.mrb[8].mxu0 }
 0x104   :  { %v7909_v29 = vadd.f32 %v195_v28, %v103_v26  ;;  %v6438_v30 = vpop.f32.mrb[9].mxu0 }
 0x105   :  { %v198_v31 = vpop.f32.mrb[10].mxu0 }
 0x106   :  { %v222_v32 = vsel %vm221_vm3, %v7909_v29, 0.0  ;;  %v6439_v33 = vpop.f32.mrb[11].mxu0 }
 0x107   :  { %223 = vadd.xlane.f32.xlu0 %v222_v32  ;;  %v7368_v33 = vld [vmem:[%s9664_s3] sm:$0xff]  }
 0x184   :  { %v211_v34 = vpop.xlane.xlu0 %210 }
 0x185   :  { %v226_v35 = vmul.f32 0.03125, %v211_v34 }
 0x187   :  { %v231_v36 = vsub.f32 %v7884_v10, %v226_v35 }
 0x188   :  { %v214_v37 = vpop.xlane.xlu0 %213 }
 0x189   :  { %v227_v38 = vmul.f32 0.03125, %v214_v37  ;;  %v236_v39 = vmul.f32 %v231_v36, %v231_v36 }
 0x18b   :  { %v232_v40 = vsub.f32 %v7886_v13, %v227_v38  ;;  %v241_v41 = vsel %vm208_vm2, %v236_v39, 0.0  ;;  %v7369_v38 = vld [vmem:[%s9664_s3 + $0x8] sm:$0xff]  }
 0x18c   :  { %v217_v42 = vpop.xlane.xlu1 %216  ;;  %242 = vadd.xlane.f32.xlu1 %v241_v41 }
 0x18d   :  { %v228_v43 = vmul.f32 0.03125, %v217_v42  ;;  %v237_v44 = vmul.f32 %v232_v40, %v232_v40 }
 0x18f   :  { %v233_v45 = vsub.f32 %v7898_v20, %v228_v43  ;;  %v244_v46 = vsel %vm208_vm2, %v237_v44, 0.0 }
 0x190   :  { %v220_v47 = vpop.xlane.xlu1 %219  ;;  %245 = vadd.xlane.f32.xlu0 %v244_v46 }
 0x191   :  { %v229_v48 = vmul.f32 0.03125, %v220_v47  ;;  %v238_v49 = vmul.f32 %v233_v45, %v233_v45  ;;  %v8003_v47 = vld [vmem:[%s9665_s5] ss:$0 sm:$0xff] }
 0x193   :  { %v234_v50 = vsub.f32 %v7900_v23, %v229_v48  ;;  %v247_v51 = vsel %vm208_vm2, %v238_v49, 0.0  ;;  %v5732_v49 = vld [vmem:[%s9616_s12] ss:$0 sm:$0xff] }
 0x194   :  { %248 = vadd.xlane.f32.xlu1 %v247_v51  ;;  %v224_v52 = vpop.xlane.xlu0 %223 }
 0x195   :  { %v230_v53 = vmul.f32 0.03125, %v224_v52  ;;  %v239_v54 = vmul.f32 %v234_v50, %v234_v50 }
 0x197   :  { %v7921_v55 = vsub.f32 %v7909_v29, %v230_v53  ;;  %v250_v56 = vsel %vm208_vm2, %v239_v54, 0.0 }
 0x198   :  { %251 = vadd.xlane.f32.xlu0 %v250_v56 }
 0x199   :  { %v240_v57 = vmul.f32 %v7921_v55, %v7921_v55 }
 0x19b   :  { %v253_v58 = vsel %vm221_vm3, %v240_v57, 0.0 }
 0x19c   :  { %254 = vadd.xlane.f32.xlu1 %v253_v58 }
 0x219   :  { %v243_v63 = vpop.xlane.xlu1 %242 }
 0x21a   :  { %v256_v0 = vmul.f32 0.03125, %v243_v63 }
 0x21c   :  { %v261_v2 = vadd.f32 1e-06, %v256_v0 }
 0x21d   :  { %v246_v3 = vpop.xlane.xlu0 %245 }
 0x21e   :  { %7432 = vrsqrt.f32 %v261_v2  ;;  %v257_v4 = vmul.f32 0.03125, %v246_v3 }
 0x220   :  { %v262_v5 = vadd.f32 1e-06, %v257_v4 }
 0x221   :  { %v249_v6 = vpop.xlane.xlu1 %248 }
 0x222   :  { %7434 = vrsqrt.f32 %v262_v5  ;;  %v258_v7 = vmul.f32 0.03125, %v249_v6 }
 0x224   :  { %v263_v8 = vadd.f32 1e-06, %v258_v7 }
 0x225   :  { %v252_v9 = vpop.xlane.xlu0 %251 }
 0x226   :  { %7436 = vrsqrt.f32 %v263_v8  ;;  %v259_v11 = vmul.f32 0.03125, %v252_v9 }
 0x228   :  { %v7433_v12 = vpop.eup %7432  ;;  %v264_v14 = vadd.f32 1e-06, %v259_v11 }
 0x229   :  { %v271_v15 = vmul.f32 %v7433_v12, %v231_v36  ;;  %v255_v16 = vpop.xlane.xlu1 %254 }
 0x22a   :  { %7438 = vrsqrt.f32 %v264_v14  ;;  %v260_v18 = vmul.f32 0.03125, %v255_v16 }
 0x22b   :  { %v282_v22 = vmul.f32 %v5718_v17, %v271_v15 }
 0x22c   :  { %v7435_v19 = vpop.eup %7434  ;;  %v265_v21 = vadd.f32 1e-06, %v260_v18 }
 0x22d   :  { %v272_v24 = vmul.f32 %v7435_v19, %v232_v40  ;;  %v293_v28 = vadd.f32 %v5719_v25, %v282_v22 }
 0x22e   :  { %7440 = vrsqrt.f32 %v265_v21 }
 0x22f   :  { %v283_v26 = vmul.f32 %v5718_v17, %v272_v24 }
 0x230   :  { %v7437_v27 = vpop.eup %7436 }
 0x231   :  { %v294_v30 = vadd.f32 %v5719_v25, %v283_v26  ;;  %v273_v31 = vmul.f32 %v7437_v27, %v233_v45 }
 0x233   :  { %v7949_v32 = vpack.c.bf16 %v294_v30, %v293_v28  ;;  %v284_v35 = vmul.f32 %v5718_v17, %v273_v31  ;;  %v5726_v30 = vld [vmem:[%s9666_s2] ss:$0 sm:$0xff] }
 0x234   :  { %v7439_v34 = vpop.eup %7438 }
 0x235   :  { %v274_v36 = vmul.f32 %v7439_v34, %v234_v50  ;;  %6445 = vmatmul.mubr.msk.bf16.vlgmr.msra.gmra.mrb[0].mxu1 %vm208_vm2, %v7949_v32  ;;  %6477 = vmatmul.mubr.msk.bf16.vlgmr.msra.gmra.mrb[12].mxu0 %vm208_vm2, %v7949_v32  ;;  %v295_v40 = vadd.f32 %v5719_v25, %v284_v35 }
 0x236   :  { %6448 = vmatprep.mubr.msk.bf16.mxu1 %vm7702_vm0, %v7701_v1  ;;  %6480 = vmatprep.mubr.msk.bf16.mxu0 %vm7702_vm0, %v7701_v1 }
 0x237   :  { %v285_v37 = vmul.f32 %v5718_v17, %v274_v36  ;;  %6457 = vmatpush3.bf16.msra.mxu1 %v7368_v33 }
 0x238   :  { %v7441_v39 = vpop.eup %7440  ;;  %6458 = vmatprep.subr.bf16.mxu1 %v7701_v1 }
 0x239   :  { %v296_v41 = vadd.f32 %v5719_v25, %v285_v37  ;;  %v275_v42 = vmul.f32 %v7441_v39, %v7921_v55 }
 0x23b   :  { %v7967_v43 = vpack.c.bf16 %v296_v41, %v295_v40  ;;  %v286_v44 = vmul.f32 %v5718_v17, %v275_v42  ;;  %6459 = vmatpush3.bf16.msra.mxu1 %v7369_v38 }
 0x23c   :  { %6488 = vmatprep.subr.bf16.mxu1 %v7701_v1 }
 0x23d   :  { %6449 = vmatmul.mubr.msk.bf16.gmra.mrb[4].mxu1 %vm208_vm2, %v7967_v43  ;;  %6481 = vmatmul.mubr.msk.bf16.gmra.mrb[16].mxu0 %vm208_vm2, %v7967_v43  ;;  %v297_v45 = vadd.f32 %v5719_v25, %v286_v44 }
 0x23e   :  { %6452 = vmatprep.mubr.msk.bf16.mxu1 %vm7702_vm0, %v7701_v1  ;;  %6484 = vmatprep.mubr.msk.bf16.mxu0 %vm7702_vm0, %v7701_v1 }
 0x23f   :  { %v7978_v46 = vpack.c.bf16 %v297_v45, %v297_v45 }
 0x245   :  { %6453 = vmatmul.mubr.msk.bf16.gmra.mrb[8].mxu1 %vm208_vm2, %v7978_v46  ;;  %6485 = vmatmul.mubr.msk.bf16.gmra.mrb[20].mxu0 %vm208_vm2, %v7978_v46 }
 0x246   :  { %6460 = vmatprep.mubr.msk.bf16.mxu1 %vm7702_vm0, %v7701_v1  ;;  %6512 = vmatprep.mubr.msk.bf16.mxu0 %vm7702_vm0, %v7701_v1 }
 0x24d   :  { %6461 = vmatmul.mubr.msk.bf16.vlgmr.msra.gmra.mrb[12].mxu1 %vm208_vm2, %v7949_v32 }
 0x24e   :  { %6464 = vmatprep.mubr.msk.bf16.mxu1 %vm7702_vm0, %v7701_v1 }
 0x255   :  { %6465 = vmatmul.mubr.msk.bf16.gmra.mrb[16].mxu1 %vm208_vm2, %v7967_v43 }
 0x256   :  { %6468 = vmatprep.mubr.msk.bf16.mxu1 %vm7702_vm0, %v7701_v1 }
 0x25d   :  { %6469 = vmatmul.mubr.msk.bf16.gmra.mrb[20].mxu1 %vm208_vm2, %v7978_v46 }
 0x25e   :  { %6494 = vmatprep.mubr.msk.bf16.mxu1 %vm7702_vm0, %v7701_v1 }
 0x308   :  { %v367_v48 = vpop.f32.mrb[0].mxu1  ;;  %v525_v50 = vpop.f32.mrb[12].mxu0 }
 0x309   :  { %v6446_v51 = vpop.f32.mrb[1].mxu1  ;;  %v6478_v52 = vpop.f32.mrb[13].mxu0  ;;  %v8009_v55 = vadd.f32 %v8003_v47, %v367_v48  ;;  %v526_v56 = vadd.f32 %v5732_v49, %v525_v50 }
 0x30a   :  { %v370_v53 = vpop.f32.mrb[2].mxu1  ;;  %v528_v54 = vpop.f32.mrb[14].mxu0 }
 0x30b   :  { %v8012_v57 = vadd.f32 %v8003_v47, %v370_v53  ;;  %v529_v58 = vadd.f32 %v5732_v49, %v528_v54  ;;  %v6447_v59 = vpop.f32.mrb[3].mxu1  ;;  %v6479_v60 = vpop.f32.mrb[15].mxu0 }
 0x30c   :  { %v8054_v60 = vld [vmem:[%s9667_s30] sm:$0xff] }
 0x30d   :  { %v547_v61 = vpack.c.bf16 %v8012_v57, %v8009_v55  ;;  %v8016_v62 = vpack.c.bf16 %v529_v58, %v526_v56 }
 0x30f   :  { %6507 = vmatpush3.bf16.msra.mxu0 %v8016_v62 }
 0x310   :  { %v375_v63 = vpop.f32.mrb[4].mxu1  ;;  %v533_v0 = vpop.f32.mrb[16].mxu0  ;;  %6508 = vmatprep.subr.bf16.mxu0 %v7701_v1 }
 0x311   :  { %v6450_v2 = vpop.f32.mrb[5].mxu1  ;;  %v6482_v3 = vpop.f32.mrb[17].mxu0  ;;  %v376_v6 = vadd.f32 %v8003_v47, %v375_v63  ;;  %v534_v7 = vadd.f32 %v5732_v49, %v533_v0 }
 0x312   :  { %v378_v4 = vpop.f32.mrb[6].mxu1  ;;  %v536_v5 = vpop.f32.mrb[18].mxu0 }
 0x313   :  { %v379_v8 = vadd.f32 %v8003_v47, %v378_v4  ;;  %v537_v9 = vadd.f32 %v5732_v49, %v536_v5  ;;  %v6451_v11 = vpop.f32.mrb[7].mxu1  ;;  %v6483_v12 = vpop.f32.mrb[19].mxu0 }
 0x315   :  { %v548_v14 = vpack.c.bf16 %v379_v8, %v376_v6  ;;  %v689_v15 = vpack.c.bf16 %v537_v9, %v534_v7  ;;  %v8068_v6 = vld [vmem:[%s9667_s30 + $0x10] sm:$0xff]  ;;  %v8073_v8 = vld [vmem:[%s9667_s30 + $0x18] sm:$0xff] }
 0x317   :  { %6509 = vmatpush3.bf16.msra.mxu0 %v689_v15 }
 0x318   :  { %v383_v16 = vpop.f32.mrb[8].mxu1  ;;  %v541_v17 = vpop.f32.mrb[20].mxu0  ;;  %6510 = vmatprep.subr.bf16.mxu0 %v7701_v1 }
 0x319   :  { %v542_v18 = vadd.f32 %v5732_v49, %v541_v17  ;;  %v6454_v19 = vpop.f32.mrb[9].mxu1  ;;  %v6486_v21 = vpop.f32.mrb[21].mxu0  ;;  %v384_v55 = vadd.f32 %v8003_v47, %v383_v16 }
 0x31a   :  { %v386_v22 = vpop.f32.mrb[10].mxu1  ;;  %v544_v24 = vpop.f32.mrb[22].mxu0 }
 0x31b   :  { %v690_v25 = vpack.c.bf16 %v542_v18, %v542_v18  ;;  %v6455_v26 = vpop.f32.mrb[11].mxu1  ;;  %v6487_v27 = vpop.f32.mrb[23].mxu0  ;;  %v549_v57 = vpack.c.bf16 %v384_v55, %v384_v55  ;;  %v8082_v18 = vld [vmem:[%s9667_s30 + $0x20] sm:$0x3] }
 0x31d   :  { %v702_v28 = vsel %vm700_vm4, %v690_v25, 0 }
 0x31e   :  { %6511 = vmatpush3.bf16.msra.mxu0 %v702_v28 }
 0x31f   :  { %6540 = vmatprep.subr.bf16.mxu0 %v7701_v1 }
 0x320   :  { %v446_v31 = vpop.f32.mrb[12].mxu1 }
 0x321   :  { %v6462_v33 = vpop.f32.mrb[13].mxu1  ;;  %v447_v35 = vadd.f32 %v5726_v30, %v446_v31 }
 0x322   :  { %v449_v34 = vpop.f32.mrb[14].mxu1 }
 0x323   :  { %v450_v36 = vadd.f32 %v5726_v30, %v449_v34  ;;  %v6463_v37 = vpop.f32.mrb[15].mxu1 }
 0x325   :  { %v550_v38 = vpack.c.bf16 %v450_v36, %v447_v35 }
 0x327   :  { %v564_v39 = vsel %vm553_vm5, %v550_v38, 0 }
 0x328   :  { %v454_v40 = vpop.f32.mrb[16].mxu1  ;;  %6489 = vmatpush3.bf16.xpose.msra.mxu1 %v564_v39 }
 0x329   :  { %v6466_v41 = vpop.f32.mrb[17].mxu1  ;;  %6490 = vmatprep.subr.bf16.mxu1 %v7701_v1  ;;  %v455_v44 = vadd.f32 %v5726_v30, %v454_v40 }
 0x32a   :  { %v457_v42 = vpop.f32.mrb[18].mxu1 }
 0x32b   :  { %v458_v45 = vadd.f32 %v5726_v30, %v457_v42  ;;  %v6467_v48 = vpop.f32.mrb[19].mxu1 }
 0x32d   :  { %v551_v49 = vpack.c.bf16 %v458_v45, %v455_v44 }
 0x32f   :  { %v567_v50 = vsel %vm553_vm5, %v551_v49, 0 }
 0x330   :  { %v462_v51 = vpop.f32.mrb[20].mxu1  ;;  %6491 = vmatpush3.bf16.xpose.msra.mxu1 %v567_v50 }
 0x331   :  { %v463_v52 = vadd.f32 %v5726_v30, %v462_v51  ;;  %v6470_v53 = vpop.f32.mrb[21].mxu1  ;;  %6492 = vmatprep.subr.bf16.mxu1 %v7701_v1 }
 0x332   :  { %v465_v54 = vpop.f32.mrb[22].mxu1 }
 0x333   :  { %v552_v56 = vpack.c.bf16 %v463_v52, %v463_v52  ;;  %v6471_v58 = vpop.f32.mrb[23].mxu1 }
 0x335   :  { %v570_v59 = vsel %vm553_vm5, %v552_v56, 0 }
 0x338   :  { %6493 = vmatpush3.bf16.xpose.msra.mxu1 %v570_v59 }
 0x339   :  { %7348 = vmatprep.subr.bf16.mxu1 %v7701_v1 }
 0x33f   :  { %6495 = vmatmul.mubr.msk.bf16.vlgmr.msra.gmra.mrb[24].mxu1 %vm553_vm5, %v547_v61 }
 0x340   :  { %7351 = vmatpush3.bf16.msra.mxu1 %v8016_v62  ;;  %6498 = vmatprep.mubr.msk.bf16.mxu1 %vm7702_vm0, %v7701_v1  ;;  %v8059_v62 = vld [vmem:[%s9667_s30 + $0x8] sm:$0xff] }
 0x341   :  { %7349 = vmatprep.subr.bf16.mxu1 %v7701_v1 }
 0x344   :  { %7352 = vmatpush3.bf16.msra.mxu1 %v689_v15 }
 0x345   :  { %7350 = vmatprep.subr.bf16.mxu1 %v7701_v1 }
 0x347   :  { %6499 = vmatmul.mubr.msk.bf16.gmra.mrb[28].mxu1 %vm553_vm5, %v548_v14 }
 0x348   :  { %7353 = vmatpush3.bf16.msra.mxu1 %v702_v28  ;;  %6502 = vmatprep.mubr.msk.bf16.mxu1 %vm7702_vm0, %v7701_v1 }
 0x349   :  { %6524 = vmatprep.subr.bf16.mxu1 %v7701_v1 }
 0x34f   :  { %6503 = vmatmul.mubr.msk.bf16.gmra.mrb[32].mxu1 %vm553_vm5, %v549_v57 }
 0x350   :  { %6520 = vmatprep.mubr.msk.bf16.mxu1 %vm7702_vm0, %v7701_v1 }
 0x412   :  { %v606_v61 = vpop.f32.mrb[24].mxu1 }
 0x413   :  { %v6496_v47 = vpop.f32.mrb[25].mxu1  ;;  %v607_v63 = vadd.f32 %v606_v61, %v8054_v60 }
 0x414   :  { %v609_v0 = vpop.f32.mrb[26].mxu1 }
 0x415   :  { %v6497_v2 = vpop.f32.mrb[27].mxu1  ;;  %v629_v3 = vsel %vm628_vm6, %v607_v63, -inf  ;;  %v610_v4 = vadd.f32 %v609_v0, %v8059_v62 }
 0x416   :  { %630 = vmax.xlane.f32.xlu0 %v629_v3  ;;  %v7370_v3 = vld [vmem:[%s9664_s3 + $0x10] sm:$0xff]  }
 0x417   :  { %v632_v5 = vsel %vm628_vm6, %v610_v4, -inf }
 0x418   :  { %633 = vmax.xlane.f32.xlu1 %v632_v5 }
 0x41a   :  { %v614_v7 = vpop.f32.mrb[28].mxu1 }
 0x41b   :  { %v6500_v9 = vpop.f32.mrb[29].mxu1  ;;  %v615_v11 = vadd.f32 %v614_v7, %v8068_v6 }
 0x41c   :  { %v617_v12 = vpop.f32.mrb[30].mxu1  ;;  %v7371_v9 = vld [vmem:[%s9664_s3 + $0x18] sm:$0xff]  }
 0x41d   :  { %v6501_v14 = vpop.f32.mrb[31].mxu1  ;;  %v635_v15 = vsel %vm628_vm6, %v615_v11, -inf  ;;  %v618_v16 = vadd.f32 %v617_v12, %v8073_v8 }
 0x41e   :  { %636 = vmax.xlane.f32.xlu0 %v635_v15 }
 0x41f   :  { %v638_v17 = vsel %vm628_vm6, %v618_v16, -inf }
 0x420   :  { %639 = vmax.xlane.f32.xlu1 %v638_v17 }
 0x422   :  { %v622_v19 = vpop.f32.mrb[32].mxu1 }
 0x423   :  { %v6504_v21 = vpop.f32.mrb[33].mxu1  ;;  %v623_v22 = vadd.f32 %v622_v19, %v8082_v18  ;;  %v7372_v19 = vld [vmem:[%s9660_s11 + $0x10] sm:$0xff]  }
 0x424   :  { %v625_v24 = vpop.f32.mrb[34].mxu1 }
 0x425   :  { %v6505_v25 = vpop.f32.mrb[35].mxu1  ;;  %v642_v26 = vsel %vm641_vm7, %v623_v22, -inf  ;;  %v7374_v24 = vld [vmem:[%s9661_s7 + $0x10] sm:$0xff]  }
 0x426   :  { %643 = vmax.xlane.f32.xlu0 %v642_v26  ;;  %v7375_v25 = vld [vmem:[%s9661_s7 + $0x18] sm:$0xff]  }
 0x4a3   :  { %v631_v27 = vpop.xlane.xlu0 %630 }
 0x4a4   :  { %v645_v28 = vsub.f32 %v607_v63, %v631_v27 }
 0x4a5   :  { %v634_v30 = vpop.xlane.xlu1 %633 }
 0x4a6   :  { %v650_v31 = vmul.f32 1.442695, %v645_v28  ;;  %v646_v33 = vsub.f32 %v610_v4, %v634_v30 }
 0x4a8   :  { %7442 = vpow2.f32 %v650_v31  ;;  %v652_v34 = vmul.f32 1.442695, %v646_v33 }
 0x4aa   :  { %7444 = vpow2.f32 %v652_v34 }
 0x4ab   :  { %v637_v35 = vpop.xlane.xlu0 %636 }
 0x4ac   :  { %v647_v36 = vsub.f32 %v615_v11, %v637_v35 }
 0x4ad   :  { %v640_v37 = vpop.xlane.xlu1 %639 }
 0x4ae   :  { %v654_v38 = vmul.f32 1.442695, %v647_v36  ;;  %v648_v39 = vsub.f32 %v618_v16, %v640_v37 }
 0x4b0   :  { %7446 = vpow2.f32 %v654_v38  ;;  %v656_v40 = vmul.f32 1.442695, %v648_v39 }
 0x4b2   :  { %v7443_v41 = vpop.eup %7442  ;;  %7448 = vpow2.f32 %v656_v40 }
 0x4b3   :  { %v644_v42 = vpop.xlane.xlu0 %643  ;;  %v660_v44 = vsel %vm628_vm6, %v7443_v41, 0.0 }
 0x4b4   :  { %v7445_v45 = vpop.eup %7444  ;;  %v649_v48 = vsub.f32 %v623_v22, %v644_v42  ;;  %661 = vadd.xlane.f32.xlu1 %v660_v44  ;;  %v7373_v22 = vld [vmem:[%s9660_s11 + $0x18] sm:$0xff]  }
 0x4b5   :  { %v663_v49 = vsel %vm628_vm6, %v7445_v45, 0.0 }
 0x4b6   :  { %v658_v50 = vmul.f32 1.442695, %v649_v48  ;;  %664 = vadd.xlane.f32.xlu0 %v663_v49 }
 0x4b8   :  { %7450 = vpow2.f32 %v658_v50 }
 0x4ba   :  { %v7447_v51 = vpop.eup %7446 }
 0x4bb   :  { %v666_v52 = vsel %vm628_vm6, %v7447_v51, 0.0 }
 0x4bc   :  { %v7449_v53 = vpop.eup %7448  ;;  %667 = vadd.xlane.f32.xlu1 %v666_v52 }
 0x4bd   :  { %v669_v54 = vsel %vm628_vm6, %v7449_v53, 0.0 }
 0x4be   :  { %670 = vadd.xlane.f32.xlu0 %v669_v54 }
 0x4c2   :  { %v7451_v56 = vpop.eup %7450 }
 0x4c3   :  { %v672_v58 = vsel %vm641_vm7, %v7451_v56, 0.0 }
 0x4c4   :  { %673 = vadd.xlane.f32.xlu1 %v672_v58 }
 0x541   :  { %v662_v59 = vpop.xlane.xlu1 %661 }
 0x542   :  { %7452 = vrcp.f32 %v662_v59 }
 0x543   :  { %v665_v55 = vpop.xlane.xlu0 %664 }
 0x544   :  { %7454 = vrcp.f32 %v665_v55 }
 0x549   :  { %v668_v57 = vpop.xlane.xlu1 %667 }
 0x54a   :  { %7456 = vrcp.f32 %v668_v57 }
 0x54b   :  { %v671_v61 = vpop.xlane.xlu0 %670 }
 0x54c   :  { %v7453_v47 = vpop.eup %7452  ;;  %7458 = vrcp.f32 %v671_v61 }
 0x54d   :  { %v680_v0 = vmul.f32 %v7453_v47, %v7443_v41  ;;  %v5760_v41 = vld [vmem:[%s9666_s2 + $0x1] ss:$0 sm:$0xff] }
 0x54e   :  { %v7455_v63 = vpop.eup %7454 }
 0x54f   :  { %v681_v2 = vmul.f32 %v7455_v63, %v7445_v45 }
 0x551   :  { %v685_v4 = vpack.c.bf16 %v681_v2, %v680_v0  ;;  %v674_v5 = vpop.xlane.xlu1 %673 }
 0x552   :  { %7460 = vrcp.f32 %v674_v5 }
 0x553   :  { %6513 = vmatmul.mubr.msk.bf16.vlgmr.msra.gmra.mrb[24].mxu0 %vm628_vm6, %v685_v4 }
 0x554   :  { %v7457_v7 = vpop.eup %7456  ;;  %6516 = vmatprep.mubr.msk.bf16.mxu0 %vm7702_vm0, %v7701_v1  ;;  %6541 = vmatpush3.bf16.msra.mxu0 %v7370_v3 }
 0x555   :  { %6542 = vmatprep.subr.bf16.mxu0 %v7701_v1  ;;  %v682_v12 = vmul.f32 %v7457_v7, %v7447_v51 }
 0x556   :  { %v7459_v11 = vpop.eup %7458 }
 0x557   :  { %v683_v14 = vmul.f32 %v7459_v11, %v7449_v53  ;;  %v5749_v53 = vld [vmem:[%s9665_s5 + $0x1] ss:$0 sm:$0xff] }
 0x558   :  { %6543 = vmatpush3.bf16.msra.mxu0 %v7371_v9 }
 0x559   :  { %v686_v15 = vpack.c.bf16 %v683_v14, %v682_v12  ;;  %6572 = vmatprep.subr.bf16.mxu0 %v7701_v1 }
 0x55b   :  { %6517 = vmatmul.mubr.msk.bf16.gmra.mrb[28].mxu0 %vm628_vm6, %v686_v15 }
 0x55c   :  { %v7461_v16 = vpop.eup %7460  ;;  %6544 = vmatprep.mubr.msk.bf16.mxu0 %vm7702_vm0, %v7701_v1 }
 0x55d   :  { %v684_v17 = vmul.f32 %v7461_v16, %v7451_v56 }
 0x55f   :  { %v687_v21 = vpack.c.bf16 %v684_v17, %v684_v17 }
 0x561   :  { %6521 = vmatmul.mubr.msk.bf16.vlgmr.msra.gmra.mrb[36].mxu1 %vm628_vm6, %v687_v21 }
 0x562   :  { %6525 = vmatpush3.bf16.msra.mxu1 %v7372_v19  ;;  %6528 = vmatprep.mubr.msk.bf16.mxu1 %vm7702_vm0, %v7701_v1 }
 0x563   :  { %6545 = vmatmul.mubr.msk.bf16.vlgmr.msra.gmra.mrb[32].mxu0 %vm208_vm2, %v7949_v32  ;;  %6526 = vmatprep.subr.bf16.mxu1 %v7701_v1 }
 0x564   :  { %6548 = vmatprep.mubr.msk.bf16.mxu0 %vm7702_vm0, %v7701_v1 }
 0x566   :  { %6527 = vmatpush3.bf16.msra.mxu1 %v7373_v22 }
 0x567   :  { %6556 = vmatprep.subr.bf16.mxu1 %v7701_v1 }
 0x569   :  { %6529 = vmatmul.mubr.msk.bf16.vlgmr.msra.gmra.mrb[40].mxu1 %vm208_vm2, %v7949_v32 }
 0x56a   :  { %6532 = vmatprep.mubr.msk.bf16.mxu1 %vm7702_vm0, %v7701_v1  ;;  %6557 = vmatpush3.bf16.msra.mxu1 %v7374_v24 }
 0x56b   :  { %6549 = vmatmul.mubr.msk.bf16.gmra.mrb[36].mxu0 %vm208_vm2, %v7967_v43  ;;  %6558 = vmatprep.subr.bf16.mxu1 %v7701_v1 }
 0x56c   :  { %6552 = vmatprep.mubr.msk.bf16.mxu0 %vm7702_vm0, %v7701_v1 }
 0x56e   :  { %6559 = vmatpush3.bf16.msra.mxu1 %v7375_v25 }
 0x56f   :  { %6590 = vmatprep.subr.bf16.mxu1 %v7701_v1 }
 0x571   :  { %6533 = vmatmul.mubr.msk.bf16.gmra.mrb[44].mxu1 %vm208_vm2, %v7967_v43 }
 0x572   :  { %6536 = vmatprep.mubr.msk.bf16.mxu1 %vm7702_vm0, %v7701_v1 }
 0x573   :  { %6553 = vmatmul.mubr.msk.bf16.gmra.mrb[40].mxu0 %vm208_vm2, %v7978_v46 }
 0x574   :  { %6578 = vmatprep.mubr.msk.bf16.mxu0 %vm7702_vm0, %v7701_v1 }
 0x579   :  { %6537 = vmatmul.mubr.msk.bf16.gmra.mrb[48].mxu1 %vm208_vm2, %v7978_v46 }
 0x57a   :  { %6560 = vmatprep.mubr.msk.bf16.mxu1 %vm7702_vm0, %v7701_v1 }
 0x581   :  { %6561 = vmatmul.mubr.msk.bf16.vlgmr.msra.gmra.mrb[52].mxu1 %vm208_vm2, %v7949_v32 }
 0x582   :  { %6564 = vmatprep.mubr.msk.bf16.mxu1 %vm7702_vm0, %v7701_v1 }
 0x589   :  { %6565 = vmatmul.mubr.msk.bf16.gmra.mrb[56].mxu1 %vm208_vm2, %v7967_v43 }
 0x58a   :  { %6568 = vmatprep.mubr.msk.bf16.mxu1 %vm7702_vm0, %v7701_v1 }
 0x591   :  { %6569 = vmatmul.mubr.msk.bf16.gmra.mrb[60].mxu1 %vm208_vm2, %v7978_v46 }
 0x592   :  { %6596 = vmatprep.mubr.msk.bf16.mxu1 %vm7702_vm0, %v7701_v1 }
 0x626   :  { %v8160_v26 = vpop.f32.mrb[24].mxu0 }
 0x627   :  { %v6514_v27 = vpop.f32.mrb[25].mxu0 }
 0x628   :  { %v8162_v28 = vpop.f32.mrb[26].mxu0 }
 0x629   :  { %v760_v30 = vpack.c.bf16 %v8162_v28, %v8160_v26  ;;  %v6515_v31 = vpop.f32.mrb[27].mxu0 }
 0x62e   :  { %v8166_v33 = vpop.f32.mrb[28].mxu0 }
 0x62f   :  { %v6518_v34 = vpop.f32.mrb[29].mxu0 }
 0x630   :  { %v8168_v35 = vpop.f32.mrb[30].mxu0 }
 0x631   :  { %v761_v36 = vpack.c.bf16 %v8168_v35, %v8166_v33  ;;  %v6519_v37 = vpop.f32.mrb[31].mxu0  ;;  %v7378_v35 = vld [vmem:[%s9660_s11 + $0x20] sm:$0xff]  }
 0x634   :  { %v8172_v38 = vpop.f32.mrb[36].mxu1 }
 0x635   :  { %v6522_v39 = vpop.f32.mrb[37].mxu1  ;;  %v762_v26 = vpack.c.bf16 %v8172_v38, %v8172_v38 }
 0x636   :  { %v757_v40 = vpop.f32.mrb[38].mxu1  ;;  %v904_v42 = vpop.f32.mrb[32].mxu0 }
 0x637   :  { %v6523_v44 = vpop.f32.mrb[39].mxu1  ;;  %v6546_v45 = vpop.f32.mrb[33].mxu0  ;;  %v905_v49 = vadd.f32 %v5760_v41, %v904_v42 }
 0x638   :  { %v907_v48 = vpop.f32.mrb[34].mxu0 }
 0x639   :  { %v908_v50 = vadd.f32 %v5760_v41, %v907_v48  ;;  %v6547_v51 = vpop.f32.mrb[35].mxu0 }
 0x63b   :  { %v1010_v52 = vpack.c.bf16 %v908_v50, %v905_v49 }
 0x63c   :  { %v823_v54 = vpop.f32.mrb[40].mxu1 }
 0x63d   :  { %v6530_v56 = vpop.f32.mrb[41].mxu1  ;;  %v1023_v58 = vsel %vm553_vm5, %v1010_v52, 0  ;;  %v824_v57 = vadd.f32 %v5749_v53, %v823_v54 }
 0x63e   :  { %v826_v59 = vpop.f32.mrb[42].mxu1  ;;  %v912_v55 = vpop.f32.mrb[36].mxu0  ;;  %6573 = vmatpush3.bf16.xpose.msra.mxu0 %v1023_v58 }
 0x63f   :  { %v827_v61 = vadd.f32 %v5749_v53, %v826_v59  ;;  %v6531_v47 = vpop.f32.mrb[43].mxu1  ;;  %v6550_v63 = vpop.f32.mrb[37].mxu0  ;;  %6574 = vmatprep.subr.bf16.mxu0 %v7701_v1  ;;  %v913_v3 = vadd.f32 %v5760_v41, %v912_v55 }
 0x640   :  { %v915_v0 = vpop.f32.mrb[38].mxu0 }
 0x641   :  { %v1007_v2 = vpack.c.bf16 %v827_v61, %v824_v57  ;;  %v916_v4 = vadd.f32 %v5760_v41, %v915_v0  ;;  %v6551_v5 = vpop.f32.mrb[39].mxu0 }
 0x643   :  { %v1011_v7 = vpack.c.bf16 %v916_v4, %v913_v3 }
 0x644   :  { %v831_v9 = vpop.f32.mrb[44].mxu1 }
 0x645   :  { %v6534_v11 = vpop.f32.mrb[45].mxu1  ;;  %v1026_v12 = vsel %vm553_vm5, %v1011_v7, 0  ;;  %v832_v16 = vadd.f32 %v5749_v53, %v831_v9 }
 0x646   :  { %v834_v14 = vpop.f32.mrb[46].mxu1  ;;  %v920_v15 = vpop.f32.mrb[40].mxu0  ;;  %6575 = vmatpush3.bf16.xpose.msra.mxu0 %v1026_v12 }
 0x647   :  { %v835_v17 = vadd.f32 %v5749_v53, %v834_v14  ;;  %v921_v19 = vadd.f32 %v5760_v41, %v920_v15  ;;  %v6535_v21 = vpop.f32.mrb[47].mxu1  ;;  %v6554_v22 = vpop.f32.mrb[41].mxu0  ;;  %6576 = vmatprep.subr.bf16.mxu0 %v7701_v1  ;;  %v5771_v41 = vld [vmem:[%s9616_s12 + $0x1] ss:$0 sm:$0xff] }
 0x648   :  { %v923_v24 = vpop.f32.mrb[42].mxu0 }
 0x649   :  { %v1008_v25 = vpack.c.bf16 %v835_v17, %v832_v16  ;;  %v1012_v27 = vpack.c.bf16 %v921_v19, %v921_v19  ;;  %v6555_v31 = vpop.f32.mrb[43].mxu0 }
 0x64b   :  { %v1029_v39 = vsel %vm553_vm5, %v1012_v27, 0 }
 0x64c   :  { %v839_v34 = vpop.f32.mrb[48].mxu1 }
 0x64d   :  { %v6538_v37 = vpop.f32.mrb[49].mxu1  ;;  %v840_v59 = vadd.f32 %v5749_v53, %v839_v34 }
 0x64e   :  { %v842_v40 = vpop.f32.mrb[50].mxu1  ;;  %6577 = vmatpush3.bf16.xpose.msra.mxu0 %v1029_v39 }
 0x64f   :  { %v6539_v42 = vpop.f32.mrb[51].mxu1  ;;  %6608 = vmatprep.subr.bf16.mxu0 %v7701_v1  ;;  %v1009_v63 = vpack.c.bf16 %v840_v59, %v840_v59 }
 0x654   :  { %v985_v44 = vpop.f32.mrb[52].mxu1 }
 0x655   :  { %v6562_v45 = vpop.f32.mrb[53].mxu1  ;;  %6579 = vmatmul.mubr.msk.bf16.vlgmr.msra.gmra.mrb[44].mxu0 %vm553_vm5, %v1007_v2  ;;  %v986_v49 = vadd.f32 %v5771_v41, %v985_v44 }
 0x656   :  { %v988_v48 = vpop.f32.mrb[54].mxu1  ;;  %6582 = vmatprep.mubr.msk.bf16.mxu0 %vm7702_vm0, %v7701_v1 }
 0x657   :  { %v989_v50 = vadd.f32 %v5771_v41, %v988_v48  ;;  %v6563_v51 = vpop.f32.mrb[55].mxu1 }
 0x659   :  { %v1145_v52 = vpack.c.bf16 %v989_v50, %v986_v49 }
 0x65b   :  { %6591 = vmatpush3.bf16.msra.mxu1 %v1145_v52 }
 0x65c   :  { %v993_v54 = vpop.f32.mrb[56].mxu1  ;;  %6592 = vmatprep.subr.bf16.mxu1 %v7701_v1 }
 0x65d   :  { %v6566_v56 = vpop.f32.mrb[57].mxu1  ;;  %6583 = vmatmul.mubr.msk.bf16.gmra.mrb[48].mxu0 %vm553_vm5, %v1008_v25  ;;  %v994_v55 = vadd.f32 %v5771_v41, %v993_v54 }
 0x65e   :  { %v996_v58 = vpop.f32.mrb[58].mxu1  ;;  %6586 = vmatprep.mubr.msk.bf16.mxu0 %vm7702_vm0, %v7701_v1 }
 0x65f   :  { %v997_v57 = vadd.f32 %v5771_v41, %v996_v58  ;;  %v6567_v61 = vpop.f32.mrb[59].mxu1 }
 0x661   :  { %v1146_v47 = vpack.c.bf16 %v997_v57, %v994_v55 }
 0x663   :  { %6593 = vmatpush3.bf16.msra.mxu1 %v1146_v47 }
 0x664   :  { %v1001_v0 = vpop.f32.mrb[60].mxu1  ;;  %6594 = vmatprep.subr.bf16.mxu1 %v7701_v1 }
 0x665   :  { %v1002_v2 = vadd.f32 %v5771_v41, %v1001_v0  ;;  %v6570_v3 = vpop.f32.mrb[61].mxu1  ;;  %6587 = vmatmul.mubr.msk.bf16.gmra.mrb[52].mxu0 %vm553_vm5, %v1009_v63 }
 0x666   :  { %v1004_v4 = vpop.f32.mrb[62].mxu1  ;;  %6610 = vmatprep.mubr.msk.bf16.mxu0 %vm7702_vm0, %v7701_v1 }
 0x667   :  { %v1147_v5 = vpack.c.bf16 %v1002_v2, %v1002_v2  ;;  %v6571_v7 = vpop.f32.mrb[63].mxu1 }
 0x669   :  { %v1158_v53 = vsel %vm700_vm4, %v1147_v5, 0 }
 0x66a   :  { %6595 = vmatpush3.bf16.msra.mxu1 %v1158_v53 }
 0x66b   :  { %6622 = vmatprep.subr.bf16.mxu1 %v7701_v1 }
 0x728   :  { %v1065_v9 = vpop.f32.mrb[44].mxu0 }
 0x729   :  { %v6580_v11 = vpop.f32.mrb[45].mxu0  ;;  %v1066_v12 = vadd.f32 %v1065_v9, %v8054_v60 }
 0x72a   :  { %v1068_v14 = vpop.f32.mrb[46].mxu0 }
 0x72b   :  { %v6581_v15 = vpop.f32.mrb[47].mxu0  ;;  %v1087_v16 = vsel %vm628_vm6, %v1066_v12, -inf  ;;  %v1069_v17 = vadd.f32 %v1068_v14, %v8059_v62 }
 0x72c   :  { %1088 = vmax.xlane.f32.xlu0 %v1087_v16 }
 0x72d   :  { %v1090_v19 = vsel %vm628_vm6, %v1069_v17, -inf }
 0x72e   :  { %1091 = vmax.xlane.f32.xlu1 %v1090_v19 }
 0x730   :  { %v1073_v21 = vpop.f32.mrb[48].mxu0 }
 0x731   :  { %v6584_v22 = vpop.f32.mrb[49].mxu0  ;;  %v1074_v24 = vadd.f32 %v1073_v21, %v8068_v6 }
 0x732   :  { %v1076_v25 = vpop.f32.mrb[50].mxu0 }
 0x733   :  { %v6585_v27 = vpop.f32.mrb[51].mxu0  ;;  %v1093_v31 = vsel %vm628_vm6, %v1074_v24, -inf  ;;  %v1077_v60 = vadd.f32 %v1076_v25, %v8073_v8 }
 0x734   :  { %1094 = vmax.xlane.f32.xlu0 %v1093_v31 }
 0x735   :  { %v1096_v34 = vsel %vm628_vm6, %v1077_v60, -inf }
 0x736   :  { %1097 = vmax.xlane.f32.xlu1 %v1096_v34 }
 0x738   :  { %v1081_v37 = vpop.f32.mrb[52].mxu0 }
 0x739   :  { %v6588_v62 = vpop.f32.mrb[53].mxu0  ;;  %v1082_v39 = vadd.f32 %v1081_v37, %v8082_v18 }
 0x73a   :  { %v1084_v40 = vpop.f32.mrb[54].mxu0 }
 0x73b   :  { %v6589_v42 = vpop.f32.mrb[55].mxu0  ;;  %v1099_v41 = vsel %vm641_vm7, %v1082_v39, -inf }
 0x73c   :  { %1100 = vmax.xlane.f32.xlu0 %v1099_v41 }
 0x7b9   :  { %v1089_v44 = vpop.xlane.xlu0 %1088 }
 0x7ba   :  { %v1102_v45 = vsub.f32 %v1066_v12, %v1089_v44  ;;  %v5783_v12 = vld [vmem:[%s9617_s13 + $0x4] sm:$0xf] }
 0x7bb   :  { %v1092_v48 = vpop.xlane.xlu1 %1091  ;;  %v1232_v14 = vsel %vm1230_vm8, %v5783_v12, 0 }
 0x7bc   :  { %v1107_v49 = vmul.f32 1.442695, %v1102_v45  ;;  %v1103_v50 = vsub.f32 %v1069_v17, %v1092_v48  ;;  %6609 = vmatpush3.bf16.msra.mxu0 %v1232_v14  ;;  %v7376_v48 = vld [vmem:[%s9664_s3 + $0x20] sm:$0xff]  }
 0x7bd   :  { %6636 = vmatprep.subr.bf16.mxu0 %v7701_v1 }
 0x7be   :  { %7462 = vpow2.f32 %v1107_v49  ;;  %v1109_v51 = vmul.f32 1.442695, %v1103_v50  ;;  %v7377_v49 = vld [vmem:[%s9664_s3 + $0x28] sm:$0xff]  }
 0x7bf   :  { %v7379_v50 = vld [vmem:[%s9660_s11 + $0x28] sm:$0xff]  }
 0x7c0   :  { %7464 = vpow2.f32 %v1109_v51 }
 0x7c1   :  { %v1095_v52 = vpop.xlane.xlu0 %1094 }
 0x7c2   :  { %v1104_v54 = vsub.f32 %v1074_v24, %v1095_v52  ;;  %v763_v24 = vld [vmem:[%s9617_s13] sm:$0xf] }
 0x7c3   :  { %v1098_v56 = vpop.xlane.xlu1 %1097  ;;  %v1300_v34 = vsel %vm1230_vm8, %v763_v24, 0 }
 0x7c4   :  { %v1111_v58 = vmul.f32 1.442695, %v1104_v54  ;;  %v1105_v59 = vsub.f32 %v1077_v60, %v1098_v56 }
 0x7c6   :  { %7466 = vpow2.f32 %v1111_v58  ;;  %v1113_v55 = vmul.f32 1.442695, %v1105_v59 }
 0x7c8   :  { %v7463_v57 = vpop.eup %7462  ;;  %7468 = vpow2.f32 %v1113_v55 }
 0x7c9   :  { %v1101_v61 = vpop.xlane.xlu0 %1100  ;;  %v1117_v47 = vsel %vm628_vm6, %v7463_v57, 0.0 }
 0x7ca   :  { %v7465_v63 = vpop.eup %7464  ;;  %v1106_v0 = vsub.f32 %v1082_v39, %v1101_v61  ;;  %1118 = vadd.xlane.f32.xlu1 %v1117_v47 }
 0x7cb   :  { %v1120_v2 = vsel %vm628_vm6, %v7465_v63, 0.0 }
 0x7cc   :  { %v1115_v3 = vmul.f32 1.442695, %v1106_v0  ;;  %1121 = vadd.xlane.f32.xlu0 %v1120_v2 }
 0x7ce   :  { %7470 = vpow2.f32 %v1115_v3  ;;  %v7380_v3 = vld [vmem:[%s9661_s7 + $0x20] sm:$0xff]  }
 0x7d0   :  { %v7467_v4 = vpop.eup %7466 }
 0x7d1   :  { %v1123_v5 = vsel %vm628_vm6, %v7467_v4, 0.0 }
 0x7d2   :  { %v7469_v7 = vpop.eup %7468  ;;  %1124 = vadd.xlane.f32.xlu1 %v1123_v5  ;;  %v7381_v5 = vld [vmem:[%s9661_s7 + $0x28] sm:$0xff]  }
 0x7d3   :  { %v1126_v53 = vsel %vm628_vm6, %v7469_v7, 0.0 }
 0x7d4   :  { %1127 = vadd.xlane.f32.xlu0 %v1126_v53 }
 0x7d8   :  { %v7471_v9 = vpop.eup %7470 }
 0x7d9   :  { %v1129_v11 = vsel %vm641_vm7, %v7471_v9, 0.0 }
 0x7da   :  { %1130 = vadd.xlane.f32.xlu1 %v1129_v11 }
 0x857   :  { %v1119_v15 = vpop.xlane.xlu1 %1118 }
 0x858   :  { %7472 = vrcp.f32 %v1119_v15 }
 0x859   :  { %v1122_v16 = vpop.xlane.xlu0 %1121 }
 0x85a   :  { %7474 = vrcp.f32 %v1122_v16 }
 0x85f   :  { %v1125_v17 = vpop.xlane.xlu1 %1124 }
 0x860   :  { %7476 = vrcp.f32 %v1125_v17  ;;  %v5806_v17 = vld [vmem:[%s9666_s2 + $0x2] ss:$0 sm:$0xff] }
 0x861   :  { %v1128_v19 = vpop.xlane.xlu0 %1127 }
 0x862   :  { %v7473_v21 = vpop.eup %7472  ;;  %7478 = vrcp.f32 %v1128_v19 }
 0x863   :  { %v1137_v25 = vmul.f32 %v7473_v21, %v7463_v57 }
 0x864   :  { %v7475_v22 = vpop.eup %7474 }
 0x865   :  { %v1138_v27 = vmul.f32 %v7475_v22, %v7465_v63 }
 0x867   :  { %v1142_v31 = vpack.c.bf16 %v1138_v27, %v1137_v25  ;;  %v1131_v60 = vpop.xlane.xlu1 %1130 }
 0x868   :  { %7480 = vrcp.f32 %v1131_v60 }
 0x869   :  { %6597 = vmatmul.mubr.msk.bf16.vlgmr.msra.gmra.mrb[64].mxu1 %vm628_vm6, %v1142_v31 }
 0x86a   :  { %v7477_v37 = vpop.eup %7476  ;;  %6600 = vmatprep.mubr.msk.bf16.mxu1 %vm7702_vm0, %v7701_v1  ;;  %6623 = vmatpush3.bf16.msra.mxu1 %v1300_v34 }
 0x86b   :  { %6652 = vmatprep.subr.bf16.mxu1 %v7701_v1  ;;  %v1139_v39 = vmul.f32 %v7477_v37, %v7467_v4 }
 0x86c   :  { %v7479_v62 = vpop.eup %7478 }
 0x86d   :  { %v1140_v40 = vmul.f32 %v7479_v62, %v7469_v7 }
 0x86f   :  { %v1143_v42 = vpack.c.bf16 %v1140_v40, %v1139_v39 }
 0x871   :  { %6601 = vmatmul.mubr.msk.bf16.gmra.mrb[68].mxu1 %vm628_vm6, %v1143_v42 }
 0x872   :  { %v7481_v41 = vpop.eup %7480  ;;  %6604 = vmatprep.mubr.msk.bf16.mxu1 %vm7702_vm0, %v7701_v1 }
 0x873   :  { %v1141_v44 = vmul.f32 %v7481_v41, %v7471_v9 }
 0x875   :  { %v1144_v45 = vpack.c.bf16 %v1141_v44, %v1141_v44 }
 0x879   :  { %6605 = vmatmul.mubr.msk.bf16.gmra.mrb[72].mxu1 %vm628_vm6, %v1144_v45 }
 0x87a   :  { %6624 = vmatprep.mubr.msk.bf16.mxu1 %vm7702_vm0, %v7701_v1 }
 0x881   :  { %6625 = vmatmul.mubr.msk.bf16.vlgmr.msra.gmra.mrb[76].mxu1 %vm553_vm5, %v760_v30 }
 0x882   :  { %6628 = vmatprep.mubr.msk.bf16.mxu1 %vm7702_vm0, %v7701_v1  ;;  %6653 = vmatpush3.bf16.msra.mxu1 %v7376_v48 }
 0x883   :  { %6654 = vmatprep.subr.bf16.mxu1 %v7701_v1 }
 0x886   :  { %6655 = vmatpush3.bf16.msra.mxu1 %v7377_v49 }
 0x887   :  { %6684 = vmatprep.subr.bf16.mxu1 %v7701_v1 }
 0x889   :  { %6629 = vmatmul.mubr.msk.bf16.gmra.mrb[80].mxu1 %vm553_vm5, %v761_v36 }
 0x88a   :  { %6632 = vmatprep.mubr.msk.bf16.mxu1 %vm7702_vm0, %v7701_v1 }
 0x891   :  { %6633 = vmatmul.mubr.msk.bf16.gmra.mrb[84].mxu1 %vm553_vm5, %v762_v26 }
 0x892   :  { %6656 = vmatprep.mubr.msk.bf16.mxu1 %vm7702_vm0, %v7701_v1 }
 0x899   :  { %6657 = vmatmul.mubr.msk.bf16.vlgmr.msra.gmra.mrb[88].mxu1 %vm208_vm2, %v7949_v32 }
 0x89a   :  { %6660 = vmatprep.mubr.msk.bf16.mxu1 %vm7702_vm0, %v7701_v1 }
 0x8a1   :  { %6661 = vmatmul.mubr.msk.bf16.gmra.mrb[92].mxu1 %vm208_vm2, %v7967_v43 }
 0x8a2   :  { %6664 = vmatprep.mubr.msk.bf16.mxu1 %vm7702_vm0, %v7701_v1 }
 0x8a9   :  { %6665 = vmatmul.mubr.msk.bf16.gmra.mrb[96].mxu1 %vm208_vm2, %v7978_v46 }
 0x8aa   :  { %6690 = vmatprep.mubr.msk.bf16.mxu1 %vm7702_vm0, %v7701_v1 }
 0x93c   :  { %v1194_v28 = vpop.f32.mrb[64].mxu1 }
 0x93d   :  { %v6598_v30 = vpop.f32.mrb[65].mxu1 }
 0x93e   :  { %v1197_v33 = vpop.f32.mrb[66].mxu1 }
 0x93f   :  { %v1216_v36 = vpack.c.bf16 %v1197_v33, %v1194_v28  ;;  %v6599_v38 = vpop.f32.mrb[67].mxu1 }
 0x941   :  { %6611 = vmatmul.mubr.msk.bf16.vlgmr.msra.gmra.mrb[56].mxu0 %vm553_vm5, %v1216_v36 }
 0x942   :  { %6614 = vmatprep.mubr.msk.bf16.mxu0 %vm7702_vm0, %v7701_v1  ;;  %6637 = vmatpush3.bf16.msra.mxu0 %v7378_v35 }
 0x943   :  { %6638 = vmatprep.subr.bf16.mxu0 %v7701_v1 }
 0x944   :  { %v1202_v51 = vpop.f32.mrb[68].mxu1 }
 0x945   :  { %v6602_v52 = vpop.f32.mrb[69].mxu1 }
 0x946   :  { %v1205_v54 = vpop.f32.mrb[70].mxu1  ;;  %6639 = vmatpush3.bf16.msra.mxu0 %v7379_v50 }
 0x947   :  { %v1217_v56 = vpack.c.bf16 %v1205_v54, %v1202_v51  ;;  %v6603_v58 = vpop.f32.mrb[71].mxu1  ;;  %6668 = vmatprep.subr.bf16.mxu0 %v7701_v1 }
 0x949   :  { %6615 = vmatmul.mubr.msk.bf16.gmra.mrb[60].mxu0 %vm553_vm5, %v1217_v56 }
 0x94a   :  { %6618 = vmatprep.mubr.msk.bf16.mxu0 %vm7702_vm0, %v7701_v1 }
 0x94c   :  { %v1210_v59 = vpop.f32.mrb[72].mxu1 }
 0x94d   :  { %v6606_v55 = vpop.f32.mrb[73].mxu1  ;;  %v1218_v61 = vpack.c.bf16 %v1210_v59, %v1210_v59 }
 0x94e   :  { %v1213_v57 = vpop.f32.mrb[74].mxu1 }
 0x94f   :  { %v6607_v47 = vpop.f32.mrb[75].mxu1 }
 0x951   :  { %6619 = vmatmul.mubr.msk.bf16.gmra.mrb[64].mxu0 %vm553_vm5, %v1218_v61 }
 0x952   :  { %6640 = vmatprep.mubr.msk.bf16.mxu0 %vm7702_vm0, %v7701_v1 }
 0x954   :  { %v1336_v63 = vpop.f32.mrb[76].mxu1 }
 0x955   :  { %v6626_v0 = vpop.f32.mrb[77].mxu1 }
 0x956   :  { %v8290_v2 = vpop.f32.mrb[78].mxu1 }
 0x957   :  { %v6627_v4 = vpop.f32.mrb[79].mxu1 }
 0x958   :  { %v5795_v4 = vld [vmem:[%s9665_s5 + $0x2] ss:$0 sm:$0xff] }
 0x959   :  { %6641 = vmatmul.mubr.msk.bf16.vlgmr.msra.gmra.mrb[68].mxu0 %vm208_vm2, %v7949_v32 }
 0x95a   :  { %6644 = vmatprep.mubr.msk.bf16.mxu0 %vm7702_vm0, %v7701_v1  ;;  %6669 = vmatpush3.bf16.msra.mxu0 %v7380_v3 }
 0x95b   :  { %6670 = vmatprep.subr.bf16.mxu0 %v7701_v1 }
 0x95c   :  { %v1344_v7 = vpop.f32.mrb[80].mxu1 }
 0x95d   :  { %v6630_v53 = vpop.f32.mrb[81].mxu1 }
 0x95e   :  { %v1347_v9 = vpop.f32.mrb[82].mxu1  ;;  %6671 = vmatpush3.bf16.msra.mxu0 %v7381_v5 }
 0x95f   :  { %v6631_v11 = vpop.f32.mrb[83].mxu1  ;;  %6702 = vmatprep.subr.bf16.mxu0 %v7701_v1 }
 0x961   :  { %6645 = vmatmul.mubr.msk.bf16.gmra.mrb[72].mxu0 %vm208_vm2, %v7967_v43 }
 0x962   :  { %6648 = vmatprep.mubr.msk.bf16.mxu0 %vm7702_vm0, %v7701_v1 }
 0x964   :  { %v1352_v12 = vpop.f32.mrb[84].mxu1 }
 0x965   :  { %v6634_v14 = vpop.f32.mrb[85].mxu1 }
 0x966   :  { %v1355_v15 = vpop.f32.mrb[86].mxu1 }
 0x967   :  { %v6635_v16 = vpop.f32.mrb[87].mxu1 }
 0x969   :  { %6649 = vmatmul.mubr.msk.bf16.gmra.mrb[76].mxu0 %vm208_vm2, %v7978_v46 }
 0x96a   :  { %6672 = vmatprep.mubr.msk.bf16.mxu0 %vm7702_vm0, %v7701_v1 }
 0x96c   :  { %v1498_v19 = vpop.f32.mrb[88].mxu1 }
 0x96d   :  { %v6658_v21 = vpop.f32.mrb[89].mxu1  ;;  %v1499_v24 = vadd.f32 %v5806_v17, %v1498_v19 }
 0x96e   :  { %v1501_v22 = vpop.f32.mrb[90].mxu1 }
 0x96f   :  { %v1502_v25 = vadd.f32 %v5806_v17, %v1501_v22  ;;  %v6659_v27 = vpop.f32.mrb[91].mxu1 }
 0x971   :  { %v1604_v31 = vpack.c.bf16 %v1502_v25, %v1499_v24  ;;  %6673 = vmatmul.mubr.msk.bf16.vlgmr.msra.gmra.mrb[80].mxu0 %vm208_vm2, %v7949_v32 }
 0x972   :  { %6676 = vmatprep.mubr.msk.bf16.mxu0 %vm7702_vm0, %v7701_v1 }
 0x973   :  { %v1617_v60 = vsel %vm553_vm5, %v1604_v31, 0 }
 0x974   :  { %v1506_v34 = vpop.f32.mrb[92].mxu1  ;;  %6685 = vmatpush3.bf16.xpose.msra.mxu1 %v1617_v60 }
 0x975   :  { %v6662_v37 = vpop.f32.mrb[93].mxu1  ;;  %6686 = vmatprep.subr.bf16.mxu1 %v7701_v1  ;;  %v1507_v39 = vadd.f32 %v5806_v17, %v1506_v34 }
 0x976   :  { %v1509_v62 = vpop.f32.mrb[94].mxu1  ;;  %v5817_v37 = vld [vmem:[%s9616_s12 + $0x2] ss:$0 sm:$0xff] }
 0x977   :  { %v1510_v40 = vadd.f32 %v5806_v17, %v1509_v62  ;;  %v6663_v42 = vpop.f32.mrb[95].mxu1 }
 0x979   :  { %v1605_v41 = vpack.c.bf16 %v1510_v40, %v1507_v39  ;;  %6677 = vmatmul.mubr.msk.bf16.gmra.mrb[84].mxu0 %vm208_vm2, %v7967_v43 }
 0x97a   :  { %6680 = vmatprep.mubr.msk.bf16.mxu0 %vm7702_vm0, %v7701_v1 }
 0x97b   :  { %v1620_v44 = vsel %vm553_vm5, %v1605_v41, 0 }
 0x97c   :  { %v1514_v45 = vpop.f32.mrb[96].mxu1  ;;  %6687 = vmatpush3.bf16.xpose.msra.mxu1 %v1620_v44 }
 0x97d   :  { %v1515_v48 = vadd.f32 %v5806_v17, %v1514_v45  ;;  %v6666_v49 = vpop.f32.mrb[97].mxu1  ;;  %6688 = vmatprep.subr.bf16.mxu1 %v7701_v1 }
 0x97e   :  { %v1517_v26 = vpop.f32.mrb[98].mxu1 }
 0x97f   :  { %v1606_v28 = vpack.c.bf16 %v1515_v48, %v1515_v48  ;;  %v6667_v30 = vpop.f32.mrb[99].mxu1 }
 0x981   :  { %6681 = vmatmul.mubr.msk.bf16.gmra.mrb[88].mxu0 %vm208_vm2, %v7978_v46  ;;  %v1623_v33 = vsel %vm553_vm5, %v1606_v28, 0 }
 0x982   :  { %6708 = vmatprep.mubr.msk.bf16.mxu0 %vm7702_vm0, %v7701_v1 }
 0x984   :  { %6689 = vmatpush3.bf16.xpose.msra.mxu1 %v1623_v33 }
 0x985   :  { %6720 = vmatprep.subr.bf16.mxu1 %v7701_v1 }
 0xa14   :  { %v1268_v35 = vpop.f32.mrb[56].mxu0 }
 0xa15   :  { %v6612_v36 = vpop.f32.mrb[57].mxu0  ;;  %v8333_v38 = vadd.f32 %v1336_v63, %v1268_v35 }
 0xa16   :  { %v1271_v50 = vpop.f32.mrb[58].mxu0 }
 0xa17   :  { %v6613_v51 = vpop.f32.mrb[59].mxu0  ;;  %v8336_v52 = vadd.f32 %v8290_v2, %v1271_v50 }
 0xa1c   :  { %v1276_v54 = vpop.f32.mrb[60].mxu0 }
 0xa1d   :  { %v6616_v56 = vpop.f32.mrb[61].mxu0  ;;  %v8338_v58 = vadd.f32 %v1344_v7, %v1276_v54 }
 0xa1e   :  { %v1279_v59 = vpop.f32.mrb[62].mxu0 }
 0xa1f   :  { %v6617_v55 = vpop.f32.mrb[63].mxu0  ;;  %v8340_v57 = vadd.f32 %v1347_v9, %v1279_v59 }
 0xa24   :  { %v1284_v61 = vpop.f32.mrb[64].mxu0 }
 0xa25   :  { %v8342_v47 = vadd.f32 %v1352_v12, %v1284_v61  ;;  %v6620_v0 = vpop.f32.mrb[65].mxu0 }
 0xa26   :  { %v1287_v3 = vpop.f32.mrb[66].mxu0  ;;  %v8366_v0 = vld [vmem:[%s9667_s30] sm:$0xff] }
 0xa27   :  { %v6621_v63 = vpop.f32.mrb[67].mxu0 }
 0xa2c   :  { %v1417_v2 = vpop.f32.mrb[68].mxu0 }
 0xa2d   :  { %v6642_v5 = vpop.f32.mrb[69].mxu0  ;;  %v1418_v11 = vadd.f32 %v5795_v4, %v1417_v2  ;;  %v8372_v2 = vld [vmem:[%s9667_s30 + $0x8] sm:$0xff] }
 0xa2e   :  { %v1420_v53 = vpop.f32.mrb[70].mxu0 }
 0xa2f   :  { %v1421_v7 = vadd.f32 %v5795_v4, %v1420_v53  ;;  %v6643_v14 = vpop.f32.mrb[71].mxu0 }
 0xa31   :  { %v1601_v15 = vpack.c.bf16 %v1421_v7, %v1418_v11 }
 0xa33   :  { %6691 = vmatmul.mubr.msk.bf16.vlgmr.msra.gmra.mrb[100].mxu1 %vm553_vm5, %v1601_v15 }
 0xa34   :  { %v1425_v9 = vpop.f32.mrb[72].mxu0  ;;  %6694 = vmatprep.mubr.msk.bf16.mxu1 %vm7702_vm0, %v7701_v1 }
 0xa35   :  { %v6646_v12 = vpop.f32.mrb[73].mxu0  ;;  %v1426_v17 = vadd.f32 %v5795_v4, %v1425_v9 }
 0xa36   :  { %v1428_v16 = vpop.f32.mrb[74].mxu0 }
 0xa37   :  { %v1429_v19 = vadd.f32 %v5795_v4, %v1428_v16  ;;  %v6647_v21 = vpop.f32.mrb[75].mxu0 }
 0xa39   :  { %v1602_v22 = vpack.c.bf16 %v1429_v19, %v1426_v17 }
 0xa3b   :  { %6695 = vmatmul.mubr.msk.bf16.gmra.mrb[104].mxu1 %vm553_vm5, %v1602_v22 }
 0xa3c   :  { %v1433_v24 = vpop.f32.mrb[76].mxu0  ;;  %6698 = vmatprep.mubr.msk.bf16.mxu1 %vm7702_vm0, %v7701_v1 }
 0xa3d   :  { %v1434_v25 = vadd.f32 %v5795_v4, %v1433_v24  ;;  %v6650_v27 = vpop.f32.mrb[77].mxu0 }
 0xa3e   :  { %v1436_v31 = vpop.f32.mrb[78].mxu0 }
 0xa3f   :  { %v6651_v60 = vpop.f32.mrb[79].mxu0  ;;  %v1603_v34 = vpack.c.bf16 %v1434_v25, %v1434_v25 }
 0xa43   :  { %6699 = vmatmul.mubr.msk.bf16.gmra.mrb[108].mxu1 %vm553_vm5, %v1603_v34 }
 0xa44   :  { %v1579_v62 = vpop.f32.mrb[80].mxu0  ;;  %6722 = vmatprep.mubr.msk.bf16.mxu1 %vm7702_vm0, %v7701_v1 }
 0xa45   :  { %v6674_v39 = vpop.f32.mrb[81].mxu0  ;;  %v1580_v42 = vadd.f32 %v5817_v37, %v1579_v62 }
 0xa46   :  { %v1582_v40 = vpop.f32.mrb[82].mxu0 }
 0xa47   :  { %v1583_v41 = vadd.f32 %v5817_v37, %v1582_v40  ;;  %v6675_v44 = vpop.f32.mrb[83].mxu0 }
 0xa49   :  { %v1739_v45 = vpack.c.bf16 %v1583_v41, %v1580_v42 }
 0xa4b   :  { %6703 = vmatpush3.bf16.msra.mxu0 %v1739_v45 }
 0xa4c   :  { %v1587_v48 = vpop.f32.mrb[84].mxu0  ;;  %6704 = vmatprep.subr.bf16.mxu0 %v7701_v1 }
 0xa4d   :  { %v6678_v49 = vpop.f32.mrb[85].mxu0  ;;  %v1588_v28 = vadd.f32 %v5817_v37, %v1587_v48 }
 0xa4e   :  { %v1590_v26 = vpop.f32.mrb[86].mxu0 }
 0xa4f   :  { %v1591_v30 = vadd.f32 %v5817_v37, %v1590_v26  ;;  %v6679_v33 = vpop.f32.mrb[87].mxu0 }
 0xa51   :  { %v1740_v35 = vpack.c.bf16 %v1591_v30, %v1588_v28 }
 0xa53   :  { %6705 = vmatpush3.bf16.msra.mxu0 %v1740_v35 }
 0xa54   :  { %v1595_v36 = vpop.f32.mrb[88].mxu0  ;;  %6706 = vmatprep.subr.bf16.mxu0 %v7701_v1 }
 0xa55   :  { %v1596_v50 = vadd.f32 %v5817_v37, %v1595_v36  ;;  %v6682_v51 = vpop.f32.mrb[89].mxu0 }
 0xa56   :  { %v1598_v54 = vpop.f32.mrb[90].mxu0 }
 0xa57   :  { %v1741_v56 = vpack.c.bf16 %v1596_v50, %v1596_v50  ;;  %v6683_v59 = vpop.f32.mrb[91].mxu0 }
 0xa59   :  { %v1752_v55 = vsel %vm700_vm4, %v1741_v56, 0 }
 0xa5a   :  { %6707 = vmatpush3.bf16.msra.mxu0 %v1752_v55  ;;  %v5829_v55 = vld [vmem:[%s9617_s13 + $0x8] sm:$0xf] }
 0xa5b   :  { %6734 = vmatprep.subr.bf16.mxu0 %v7701_v1 }
 0xb06   :  { %v1659_v61 = vpop.f32.mrb[100].mxu1 }
 0xb07   :  { %v1660_v3 = vadd.f32 %v8366_v0, %v1659_v61  ;;  %v6692_v63 = vpop.f32.mrb[101].mxu1  ;;  %v1825_v61 = vsel %vm1230_vm8, %v5829_v55, 0 }
 0xb08   :  { %v1662_v4 = vpop.f32.mrb[102].mxu1  ;;  %6721 = vmatpush3.bf16.msra.mxu1 %v1825_v61 }
 0xb09   :  { %v1663_v5 = vadd.f32 %v8372_v2, %v1662_v4  ;;  %v6693_v53 = vpop.f32.mrb[103].mxu1  ;;  %v1681_v11 = vsel %vm628_vm6, %v1660_v3, -inf  ;;  %6750 = vmatprep.subr.bf16.mxu1 %v7701_v1 }
 0xb0a   :  { %1682 = vmax.xlane.f32.xlu0 %v1681_v11 }
 0xb0b   :  { %v1684_v7 = vsel %vm628_vm6, %v1663_v5, -inf }
 0xb0c   :  { %1685 = vmax.xlane.f32.xlu1 %v1684_v7 }
 0xb0e   :  { %v1667_v14 = vpop.f32.mrb[104].mxu1 }
 0xb0f   :  { %v1668_v15 = vadd.f32 %v1667_v14, %v8068_v6  ;;  %v6696_v9 = vpop.f32.mrb[105].mxu1 }
 0xb10   :  { %v1670_v12 = vpop.f32.mrb[106].mxu1 }
 0xb11   :  { %v1671_v16 = vadd.f32 %v1670_v12, %v8073_v8  ;;  %v6697_v17 = vpop.f32.mrb[107].mxu1  ;;  %v1687_v19 = vsel %vm628_vm6, %v1668_v15, -inf }
 0xb12   :  { %1688 = vmax.xlane.f32.xlu0 %v1687_v19  ;;  %v7383_v17 = vld [vmem:[%s9660_s11 + $0x38] sm:$0xff]  }
 0xb13   :  { %v1690_v21 = vsel %vm628_vm6, %v1671_v16, -inf }
 0xb14   :  { %1691 = vmax.xlane.f32.xlu1 %v1690_v21 }
 0xb16   :  { %v1675_v22 = vpop.f32.mrb[108].mxu1 }
 0xb17   :  { %v1676_v24 = vadd.f32 %v1675_v22, %v8082_v18  ;;  %v6700_v25 = vpop.f32.mrb[109].mxu1 }
 0xb18   :  { %v1678_v27 = vpop.f32.mrb[110].mxu1 }
 0xb19   :  { %v6701_v31 = vpop.f32.mrb[111].mxu1  ;;  %v1693_v60 = vsel %vm641_vm7, %v1676_v24, -inf }
 0xb1a   :  { %1694 = vmax.xlane.f32.xlu0 %v1693_v60  ;;  %v7384_v60 = vld [vmem:[%s9661_s7 + $0x30] sm:$0xff]  }
 0xb97   :  { %v1683_v6 = vpop.xlane.xlu0 %1682 }
 0xb98   :  { %v1696_v34 = vsub.f32 %v1660_v3, %v1683_v6  ;;  %v7385_v6 = vld [vmem:[%s9661_s7 + $0x38] sm:$0xff]  }
 0xb99   :  { %v1686_v37 = vpop.xlane.xlu1 %1685 }
 0xb9a   :  { %v1701_v8 = vmul.f32 1.442695, %v1696_v34  ;;  %v1697_v62 = vsub.f32 %v1663_v5, %v1686_v37 }
 0xb9c   :  { %7482 = vpow2.f32 %v1701_v8  ;;  %v1703_v39 = vmul.f32 1.442695, %v1697_v62  ;;  %v7386_v62 = vld [vmem:[%s9664_s3 + $0x30] sm:$0xff]  }
 0xb9e   :  { %7484 = vpow2.f32 %v1703_v39 }
 0xb9f   :  { %v1689_v40 = vpop.xlane.xlu0 %1688 }
 0xba0   :  { %v1698_v42 = vsub.f32 %v1668_v15, %v1689_v40  ;;  %v7382_v15 = vld [vmem:[%s9660_s11 + $0x30] sm:$0xff]  }
 0xba1   :  { %v1692_v41 = vpop.xlane.xlu1 %1691 }
 0xba2   :  { %v1705_v44 = vmul.f32 1.442695, %v1698_v42  ;;  %v1699_v45 = vsub.f32 %v1671_v16, %v1692_v41  ;;  %v7387_v42 = vld [vmem:[%s9664_s3 + $0x38] sm:$0xff]  }
 0xba4   :  { %7486 = vpow2.f32 %v1705_v44  ;;  %v1707_v18 = vmul.f32 1.442695, %v1699_v45 }
 0xba6   :  { %v7483_v48 = vpop.eup %7482  ;;  %7488 = vpow2.f32 %v1707_v18 }
 0xba7   :  { %v1695_v49 = vpop.xlane.xlu0 %1694  ;;  %v1711_v26 = vsel %vm628_vm6, %v7483_v48, 0.0 }
 0xba8   :  { %v7485_v28 = vpop.eup %7484  ;;  %v1700_v30 = vsub.f32 %v1676_v24, %v1695_v49  ;;  %1712 = vadd.xlane.f32.xlu1 %v1711_v26 }
 0xba9   :  { %v1714_v33 = vsel %vm628_vm6, %v7485_v28, 0.0 }
 0xbaa   :  { %v1709_v35 = vmul.f32 1.442695, %v1700_v30  ;;  %1715 = vadd.xlane.f32.xlu0 %v1714_v33 }
 0xbac   :  { %7490 = vpow2.f32 %v1709_v35  ;;  %v8462_v35 = vld [vmem:[%s9665_s5 + $0x3] ss:$0 sm:$0xff] }
 0xbae   :  { %v7487_v36 = vpop.eup %7486 }
 0xbaf   :  { %v1717_v50 = vsel %vm628_vm6, %v7487_v36, 0.0 }
 0xbb0   :  { %v7489_v51 = vpop.eup %7488  ;;  %1718 = vadd.xlane.f32.xlu1 %v1717_v50 }
 0xbb1   :  { %v1720_v54 = vsel %vm628_vm6, %v7489_v51, 0.0 }
 0xbb2   :  { %1721 = vadd.xlane.f32.xlu0 %v1720_v54 }
 0xbb6   :  { %v7491_v56 = vpop.eup %7490 }
 0xbb7   :  { %v1723_v59 = vsel %vm641_vm7, %v7491_v56, 0.0 }
 0xbb8   :  { %1724 = vadd.xlane.f32.xlu1 %v1723_v59 }
 0xc35   :  { %v1713_v3 = vpop.xlane.xlu1 %1712 }
 0xc36   :  { %7492 = vrcp.f32 %v1713_v3 }
 0xc37   :  { %v1716_v63 = vpop.xlane.xlu0 %1715 }
 0xc38   :  { %7494 = vrcp.f32 %v1716_v63 }
 0xc3d   :  { %v1719_v4 = vpop.xlane.xlu1 %1718 }
 0xc3e   :  { %7496 = vrcp.f32 %v1719_v4 }
 0xc3f   :  { %v1722_v5 = vpop.xlane.xlu0 %1721 }
 0xc40   :  { %v7493_v53 = vpop.eup %7492  ;;  %7498 = vrcp.f32 %v1722_v5 }
 0xc41   :  { %v1731_v7 = vmul.f32 %v7493_v53, %v7483_v48 }
 0xc42   :  { %v7495_v11 = vpop.eup %7494 }
 0xc43   :  { %v1732_v14 = vmul.f32 %v7495_v11, %v7485_v28 }
 0xc45   :  { %v1736_v9 = vpack.c.bf16 %v1732_v14, %v1731_v7  ;;  %v1725_v12 = vpop.xlane.xlu1 %1724 }
 0xc46   :  { %7500 = vrcp.f32 %v1725_v12 }
 0xc47   :  { %6709 = vmatmul.mubr.msk.bf16.vlgmr.msra.gmra.mrb[92].mxu0 %vm628_vm6, %v1736_v9  ;;  %v5860_v9 = vld [vmem:[%s9616_s12 + $0x3] ss:$0 sm:$0xff] }
 0xc48   :  { %v7497_v16 = vpop.eup %7496  ;;  %6712 = vmatprep.mubr.msk.bf16.mxu0 %vm7702_vm0, %v7701_v1  ;;  %6735 = vmatpush3.bf16.msra.mxu0 %v7382_v15 }
 0xc49   :  { %6736 = vmatprep.subr.bf16.mxu0 %v7701_v1  ;;  %v1733_v21 = vmul.f32 %v7497_v16, %v7487_v36 }
 0xc4a   :  { %v7499_v19 = vpop.eup %7498 }
 0xc4b   :  { %v1734_v22 = vmul.f32 %v7499_v19, %v7489_v51 }
 0xc4c   :  { %6737 = vmatpush3.bf16.msra.mxu0 %v7383_v17 }
 0xc4d   :  { %v1737_v24 = vpack.c.bf16 %v1734_v22, %v1733_v21  ;;  %6766 = vmatprep.subr.bf16.mxu0 %v7701_v1 }
 0xc4f   :  { %6713 = vmatmul.mubr.msk.bf16.gmra.mrb[96].mxu0 %vm628_vm6, %v1737_v24 }
 0xc50   :  { %v7501_v25 = vpop.eup %7500  ;;  %6716 = vmatprep.mubr.msk.bf16.mxu0 %vm7702_vm0, %v7701_v1 }
 0xc51   :  { %v1735_v27 = vmul.f32 %v7501_v25, %v7491_v56 }
 0xc53   :  { %v1738_v31 = vpack.c.bf16 %v1735_v27, %v1735_v27 }
 0xc57   :  { %6717 = vmatmul.mubr.msk.bf16.gmra.mrb[100].mxu0 %vm628_vm6, %v1738_v31 }
 0xc58   :  { %6738 = vmatprep.mubr.msk.bf16.mxu0 %vm7702_vm0, %v7701_v1 }
 0xc5f   :  { %6739 = vmatmul.mubr.msk.bf16.vlgmr.msra.gmra.mrb[104].mxu0 %vm208_vm2, %v7949_v32 }
 0xc60   :  { %6742 = vmatprep.mubr.msk.bf16.mxu0 %vm7702_vm0, %v7701_v1  ;;  %6767 = vmatpush3.bf16.msra.mxu0 %v7384_v60 }
 0xc61   :  { %6768 = vmatprep.subr.bf16.mxu0 %v7701_v1 }
 0xc64   :  { %6769 = vmatpush3.bf16.msra.mxu0 %v7385_v6 }
 0xc65   :  { %6800 = vmatprep.subr.bf16.mxu0 %v7701_v1 }
 0xc67   :  { %6743 = vmatmul.mubr.msk.bf16.gmra.mrb[108].mxu0 %vm208_vm2, %v7967_v43 }
 0xc68   :  { %6746 = vmatprep.mubr.msk.bf16.mxu0 %vm7702_vm0, %v7701_v1 }
 0xc6f   :  { %6747 = vmatmul.mubr.msk.bf16.gmra.mrb[112].mxu0 %vm208_vm2, %v7978_v46 }
 0xc70   :  { %6770 = vmatprep.mubr.msk.bf16.mxu0 %vm7702_vm0, %v7701_v1 }
 0xc77   :  { %6771 = vmatmul.mubr.msk.bf16.vlgmr.msra.gmra.mrb[116].mxu0 %vm208_vm2, %v7949_v32 }
 0xc78   :  { %6774 = vmatprep.mubr.msk.bf16.mxu0 %vm7702_vm0, %v7701_v1 }
 0xc7f   :  { %6775 = vmatmul.mubr.msk.bf16.gmra.mrb[120].mxu0 %vm208_vm2, %v7967_v43 }
 0xc80   :  { %6778 = vmatprep.mubr.msk.bf16.mxu0 %vm7702_vm0, %v7701_v1 }
 0xc87   :  { %6779 = vmatmul.mubr.msk.bf16.gmra.mrb[124].mxu0 %vm208_vm2, %v7978_v46 }
 0xc88   :  { %6806 = vmatprep.mubr.msk.bf16.mxu0 %vm7702_vm0, %v7701_v1 }
 0xd1a   :  { %v1788_v34 = vpop.f32.mrb[92].mxu0 }
 0xd1b   :  { %v6710_v37 = vpop.f32.mrb[93].mxu0 }
 0xd1c   :  { %v1791_v8 = vpop.f32.mrb[94].mxu0 }
 0xd1d   :  { %v1810_v39 = vpack.c.bf16 %v1791_v8, %v1788_v34  ;;  %v6711_v40 = vpop.f32.mrb[95].mxu0 }
 0xd1f   :  { %6723 = vmatmul.mubr.msk.bf16.vlgmr.msra.gmra.mrb[112].mxu1 %vm553_vm5, %v1810_v39 }
 0xd20   :  { %6726 = vmatprep.mubr.msk.bf16.mxu1 %vm7702_vm0, %v7701_v1  ;;  %6751 = vmatpush3.bf16.msra.mxu1 %v7386_v62 }
 0xd21   :  { %6752 = vmatprep.subr.bf16.mxu1 %v7701_v1 }
 0xd22   :  { %v1796_v41 = vpop.f32.mrb[96].mxu0 }
 0xd23   :  { %v6714_v44 = vpop.f32.mrb[97].mxu0 }
 0xd24   :  { %v1799_v45 = vpop.f32.mrb[98].mxu0  ;;  %6753 = vmatpush3.bf16.msra.mxu1 %v7387_v42 }
 0xd25   :  { %v1811_v18 = vpack.c.bf16 %v1799_v45, %v1796_v41  ;;  %v6715_v48 = vpop.f32.mrb[99].mxu0  ;;  %6782 = vmatprep.subr.bf16.mxu1 %v7701_v1 }
 0xd27   :  { %6727 = vmatmul.mubr.msk.bf16.gmra.mrb[116].mxu1 %vm553_vm5, %v1811_v18 }
 0xd28   :  { %6730 = vmatprep.mubr.msk.bf16.mxu1 %vm7702_vm0, %v7701_v1 }
 0xd2a   :  { %v1804_v49 = vpop.f32.mrb[100].mxu0 }
 0xd2b   :  { %v6718_v26 = vpop.f32.mrb[101].mxu0  ;;  %v1812_v30 = vpack.c.bf16 %v1804_v49, %v1804_v49 }
 0xd2c   :  { %v1807_v28 = vpop.f32.mrb[102].mxu0 }
 0xd2d   :  { %v6719_v33 = vpop.f32.mrb[103].mxu0 }
 0xd2f   :  { %6731 = vmatmul.mubr.msk.bf16.gmra.mrb[120].mxu1 %vm553_vm5, %v1812_v30 }
 0xd30   :  { %6754 = vmatprep.mubr.msk.bf16.mxu1 %vm7702_vm0, %v7701_v1 }
 0xd32   :  { %v1947_v36 = vpop.f32.mrb[104].mxu0 }
 0xd33   :  { %v6740_v50 = vpop.f32.mrb[105].mxu0  ;;  %v8465_v54 = vadd.f32 %v8462_v35, %v1947_v36 }
 0xd34   :  { %v1950_v51 = vpop.f32.mrb[106].mxu0 }
 0xd35   :  { %v8468_v56 = vadd.f32 %v8462_v35, %v1950_v51  ;;  %v6741_v59 = vpop.f32.mrb[107].mxu0 }
 0xd37   :  { %v2131_v55 = vpack.c.bf16 %v8468_v56, %v8465_v54  ;;  %6755 = vmatmul.mubr.msk.bf16.vlgmr.msra.gmra.mrb[124].mxu1 %vm208_vm2, %v7949_v32 }
 0xd38   :  { %6758 = vmatprep.mubr.msk.bf16.mxu1 %vm7702_vm0, %v7701_v1 }
 0xd3a   :  { %v1955_v61 = vpop.f32.mrb[108].mxu0 }
 0xd3b   :  { %v6744_v3 = vpop.f32.mrb[109].mxu0  ;;  %v8477_v4 = vadd.f32 %v8462_v35, %v1955_v61 }
 0xd3c   :  { %v1958_v63 = vpop.f32.mrb[110].mxu0 }
 0xd3d   :  { %v8480_v5 = vadd.f32 %v8462_v35, %v1958_v63  ;;  %v6745_v53 = vpop.f32.mrb[111].mxu0 }
 0xd3f   :  { %v2132_v11 = vpack.c.bf16 %v8480_v5, %v8477_v4  ;;  %6759 = vmatmul.mubr.msk.bf16.gmra.mrb[128].mxu1 %vm208_vm2, %v7967_v43 }
 0xd40   :  { %6762 = vmatprep.mubr.msk.bf16.mxu1 %vm7702_vm0, %v7701_v1 }
 0xd42   :  { %v8488_v32 = vpop.f32.mrb[112].mxu0 }
 0xd43   :  { %v6748_v7 = vpop.f32.mrb[113].mxu0 }
 0xd44   :  { %v1966_v14 = vpop.f32.mrb[114].mxu0 }
 0xd45   :  { %v6749_v15 = vpop.f32.mrb[115].mxu0 }
 0xd47   :  { %6763 = vmatmul.mubr.msk.bf16.gmra.mrb[132].mxu1 %vm208_vm2, %v7978_v46 }
 0xd48   :  { %6788 = vmatprep.mubr.msk.bf16.mxu1 %vm7702_vm0, %v7701_v1 }
 0xd4a   :  { %v2109_v12 = vpop.f32.mrb[116].mxu0 }
 0xd4b   :  { %v6772_v43 = vpop.f32.mrb[117].mxu0  ;;  %v2110_v17 = vadd.f32 %v5860_v9, %v2109_v12 }
 0xd4c   :  { %v2112_v16 = vpop.f32.mrb[118].mxu0 }
 0xd4d   :  { %v2113_v19 = vadd.f32 %v5860_v9, %v2112_v16  ;;  %v6773_v21 = vpop.f32.mrb[119].mxu0 }
 0xd4f   :  { %v2269_v22 = vpack.c.bf16 %v2113_v19, %v2110_v17 }
 0xd51   :  { %6801 = vmatpush3.bf16.msra.mxu0 %v2269_v22 }
 0xd52   :  { %v2117_v24 = vpop.f32.mrb[120].mxu0  ;;  %6802 = vmatprep.subr.bf16.mxu0 %v7701_v1 }
 0xd53   :  { %v6776_v25 = vpop.f32.mrb[121].mxu0  ;;  %v2118_v27 = vadd.f32 %v5860_v9, %v2117_v24 }
 0xd54   :  { %v2120_v46 = vpop.f32.mrb[122].mxu0 }
 0xd55   :  { %v2121_v31 = vadd.f32 %v5860_v9, %v2120_v46  ;;  %v6777_v60 = vpop.f32.mrb[123].mxu0 }
 0xd57   :  { %v2270_v6 = vpack.c.bf16 %v2121_v31, %v2118_v27 }
 0xd59   :  { %6803 = vmatpush3.bf16.msra.mxu0 %v2270_v6 }
 0xd5a   :  { %v2125_v34 = vpop.f32.mrb[124].mxu0  ;;  %6804 = vmatprep.subr.bf16.mxu0 %v7701_v1 }
 0xd5b   :  { %v2126_v37 = vadd.f32 %v5860_v9, %v2125_v34  ;;  %v6780_v8 = vpop.f32.mrb[125].mxu0  ;;  %v1964_v34 = vadd.f32 %v8462_v35, %v8488_v32  ;;  %v7664_v32 = vld [vmem:[%s9667_s30 + $0x10] sm:$0xff] }
 0xd5c   :  { %v2128_v62 = vpop.f32.mrb[126].mxu0 }
 0xd5d   :  { %v2271_v39 = vpack.c.bf16 %v2126_v37, %v2126_v37  ;;  %v6781_v40 = vpop.f32.mrb[127].mxu0  ;;  %v2133_v37 = vpack.c.bf16 %v1964_v34, %v1964_v34 }
 0xd5f   :  { %v2282_v42 = vsel %vm700_vm4, %v2271_v39, 0 }
 0xd60   :  { %6805 = vmatpush3.bf16.msra.mxu0 %v2282_v42 }
 0xd61   :  { %6832 = vmatprep.subr.bf16.mxu0 %v7701_v1 }
 0xdf2   :  { %v1861_v41 = vpop.f32.mrb[112].mxu1 }
 0xdf3   :  { %v8502_v44 = vadd.f32 %v1861_v41, %v8333_v38  ;;  %v6724_v45 = vpop.f32.mrb[113].mxu1 }
 0xdf4   :  { %v1864_v18 = vpop.f32.mrb[114].mxu1 }
 0xdf5   :  { %v8505_v48 = vadd.f32 %v1864_v18, %v8336_v52  ;;  %v6725_v49 = vpop.f32.mrb[115].mxu1  ;;  %v5849_v52 = vld [vmem:[%s9666_s2 + $0x3] ss:$0 sm:$0xff] }
 0xdfa   :  { %v1869_v26 = vpop.f32.mrb[116].mxu1 }
 0xdfb   :  { %v8508_v28 = vadd.f32 %v1869_v26, %v8338_v58  ;;  %v6728_v30 = vpop.f32.mrb[117].mxu1  ;;  %v7666_v26 = vld [vmem:[%s9667_s30 + $0x20] sm:$0x3] }
 0xdfc   :  { %v1872_v33 = vpop.f32.mrb[118].mxu1 }
 0xdfd   :  { %v8511_v36 = vadd.f32 %v1872_v33, %v8340_v57  ;;  %v6729_v50 = vpop.f32.mrb[119].mxu1 }
 0xe02   :  { %v1877_v51 = vpop.f32.mrb[120].mxu1 }
 0xe03   :  { %v8514_v38 = vadd.f32 %v1877_v51, %v8342_v47  ;;  %v6732_v59 = vpop.f32.mrb[121].mxu1 }
 0xe04   :  { %v1880_v61 = vpop.f32.mrb[122].mxu1 }
 0xe05   :  { %v6733_v3 = vpop.f32.mrb[123].mxu1 }
 0xe0a   :  { %v2028_v63 = vpop.f32.mrb[124].mxu1 }
 0xe0b   :  { %v6756_v58 = vpop.f32.mrb[125].mxu1  ;;  %v2029_v7 = vadd.f32 %v5849_v52, %v2028_v63 }
 0xe0c   :  { %v2031_v53 = vpop.f32.mrb[126].mxu1 }
 0xe0d   :  { %v2032_v14 = vadd.f32 %v5849_v52, %v2031_v53  ;;  %v6757_v15 = vpop.f32.mrb[127].mxu1 }
 0xe0f   :  { %v2134_v57 = vpack.c.bf16 %v2032_v14, %v2029_v7 }
 0xe11   :  { %v2147_v9 = vsel %vm553_vm5, %v2134_v57, 0 }
 0xe12   :  { %v2036_v12 = vpop.f32.mrb[128].mxu1  ;;  %6783 = vmatpush3.bf16.xpose.msra.mxu1 %v2147_v9 }
 0xe13   :  { %v6760_v47 = vpop.f32.mrb[129].mxu1  ;;  %6784 = vmatprep.subr.bf16.mxu1 %v7701_v1  ;;  %v2037_v16 = vadd.f32 %v5849_v52, %v2036_v12 }
 0xe14   :  { %v2039_v43 = vpop.f32.mrb[130].mxu1 }
 0xe15   :  { %v2040_v17 = vadd.f32 %v5849_v52, %v2039_v43  ;;  %v6761_v19 = vpop.f32.mrb[131].mxu1 }
 0xe17   :  { %v2135_v21 = vpack.c.bf16 %v2040_v17, %v2037_v16 }
 0xe19   :  { %v2150_v22 = vsel %vm553_vm5, %v2135_v21, 0 }
 0xe1a   :  { %v2044_v24 = vpop.f32.mrb[132].mxu1  ;;  %6785 = vmatpush3.bf16.xpose.msra.mxu1 %v2150_v22 }
 0xe1b   :  { %v2045_v25 = vadd.f32 %v5849_v52, %v2044_v24  ;;  %v6764_v46 = vpop.f32.mrb[133].mxu1  ;;  %6786 = vmatprep.subr.bf16.mxu1 %v7701_v1 }
 0xe1c   :  { %v2047_v27 = vpop.f32.mrb[134].mxu1 }
 0xe1d   :  { %v2136_v31 = vpack.c.bf16 %v2045_v25, %v2045_v25  ;;  %v6765_v60 = vpop.f32.mrb[135].mxu1 }
 0xe1f   :  { %v2153_v6 = vsel %vm553_vm5, %v2136_v31, 0 }
 0xe22   :  { %6787 = vmatpush3.bf16.xpose.msra.mxu1 %v2153_v6  ;;  %v5872_v6 = vld [vmem:[%s9617_s13 + $0xc] sm:$0xf] }
 0xe23   :  { %6818 = vmatprep.subr.bf16.mxu1 %v7701_v1  ;;  %v2355_v34 = vsel %vm1230_vm8, %v5872_v6, 0 }
 0xe29   :  { %6789 = vmatmul.mubr.msk.bf16.vlgmr.msra.gmra.mrb[136].mxu1 %vm553_vm5, %v2131_v55 }
 0xe2a   :  { %6792 = vmatprep.mubr.msk.bf16.mxu1 %vm7702_vm0, %v7701_v1  ;;  %6819 = vmatpush3.bf16.msra.mxu1 %v2355_v34 }
 0xe2b   :  { %6848 = vmatprep.subr.bf16.mxu1 %v7701_v1 }
 0xe31   :  { %6793 = vmatmul.mubr.msk.bf16.gmra.mrb[140].mxu1 %vm553_vm5, %v2132_v11 }
 0xe32   :  { %6796 = vmatprep.mubr.msk.bf16.mxu1 %vm7702_vm0, %v7701_v1 }
 0xe39   :  { %6797 = vmatmul.mubr.msk.bf16.gmra.mrb[144].mxu1 %vm553_vm5, %v2133_v37 }
 0xe3a   :  { %6820 = vmatprep.mubr.msk.bf16.mxu1 %vm7702_vm0, %v7701_v1 }
 0xefc   :  { %v2189_v54 = vpop.f32.mrb[136].mxu1 }
 0xefd   :  { %v2190_v56 = vadd.f32 %v8366_v0, %v2189_v54  ;;  %v6790_v55 = vpop.f32.mrb[137].mxu1  ;;  %v7665_v0 = vld [vmem:[%s9667_s30 + $0x18] sm:$0xff] }
 0xefe   :  { %v2192_v8 = vpop.f32.mrb[138].mxu1 }
 0xeff   :  { %v2193_v4 = vadd.f32 %v8372_v2, %v2192_v8  ;;  %v6791_v5 = vpop.f32.mrb[139].mxu1  ;;  %v2211_v11 = vsel %vm628_vm6, %v2190_v56, -inf }
 0xf00   :  { %2212 = vmax.xlane.f32.xlu0 %v2211_v11 }
 0xf01   :  { %v2214_v62 = vsel %vm628_vm6, %v2193_v4, -inf }
 0xf02   :  { %2215 = vmax.xlane.f32.xlu1 %v2214_v62 }
 0xf04   :  { %v2197_v35 = vpop.f32.mrb[140].mxu1 }
 0xf05   :  { %v2198_v39 = vadd.f32 %v7664_v32, %v2197_v35  ;;  %v6794_v40 = vpop.f32.mrb[141].mxu1 }
 0xf06   :  { %v2200_v42 = vpop.f32.mrb[142].mxu1 }
 0xf07   :  { %v2201_v2 = vadd.f32 %v7665_v0, %v2200_v42  ;;  %v6795_v41 = vpop.f32.mrb[143].mxu1  ;;  %v2217_v45 = vsel %vm628_vm6, %v2198_v39, -inf }
 0xf08   :  { %2218 = vmax.xlane.f32.xlu0 %v2217_v45 }
 0xf09   :  { %v2220_v18 = vsel %vm628_vm6, %v2201_v2, -inf }
 0xf0a   :  { %2221 = vmax.xlane.f32.xlu1 %v2220_v18 }
 0xf0c   :  { %v2205_v49 = vpop.f32.mrb[144].mxu1 }
 0xf0d   :  { %v2206_v30 = vadd.f32 %v7666_v26, %v2205_v49  ;;  %v6798_v33 = vpop.f32.mrb[145].mxu1 }
 0xf0e   :  { %v2208_v50 = vpop.f32.mrb[146].mxu1 }
 0xf0f   :  { %v6799_v51 = vpop.f32.mrb[147].mxu1  ;;  %v2223_v59 = vsel %vm641_vm7, %v2206_v30, -inf }
 0xf10   :  { %2224 = vmax.xlane.f32.xlu0 %v2223_v59 }
 0xf8d   :  { %v2213_v61 = vpop.xlane.xlu0 %2212 }
 0xf8e   :  { %v2226_v3 = vsub.f32 %v2190_v56, %v2213_v61 }
 0xf8f   :  { %v2216_v52 = vpop.xlane.xlu1 %2215 }
 0xf90   :  { %v2231_v63 = vmul.f32 1.442695, %v2226_v3  ;;  %v2227_v58 = vsub.f32 %v2193_v4, %v2216_v52 }
 0xf92   :  { %7502 = vpow2.f32 %v2231_v63  ;;  %v2233_v53 = vmul.f32 1.442695, %v2227_v58 }
 0xf94   :  { %7504 = vpow2.f32 %v2233_v53 }
 0xf95   :  { %v2219_v7 = vpop.xlane.xlu0 %2218 }
 0xf96   :  { %v2228_v14 = vsub.f32 %v2198_v39, %v2219_v7 }
 0xf97   :  { %v2222_v15 = vpop.xlane.xlu1 %2221 }
 0xf98   :  { %v2235_v57 = vmul.f32 1.442695, %v2228_v14  ;;  %v2229_v9 = vsub.f32 %v2201_v2, %v2222_v15  ;;  %v5876_v15 = vld [vmem:[%s9618_s14] ss:$0 sm:$0xff] }
 0xf9a   :  { %7506 = vpow2.f32 %v2235_v57  ;;  %v2237_v12 = vmul.f32 1.442695, %v2229_v9 }
 0xf9c   :  { %v7503_v47 = vpop.eup %7502  ;;  %7508 = vpow2.f32 %v2237_v12  ;;  %v5877_v12 = vld [vmem:[%s9619_s15] ss:$0 sm:$0xff] }
 0xf9d   :  { %v2225_v43 = vpop.xlane.xlu0 %2224  ;;  %v2241_v16 = vsel %vm628_vm6, %v7503_v47, 0.0 }
 0xf9e   :  { %v7505_v17 = vpop.eup %7504  ;;  %v2230_v19 = vsub.f32 %v2206_v30, %v2225_v43  ;;  %2242 = vadd.xlane.f32.xlu1 %v2241_v16 }
 0xf9f   :  { %v2244_v21 = vsel %vm628_vm6, %v7505_v17, 0.0 }
 0xfa0   :  { %v2239_v22 = vmul.f32 1.442695, %v2230_v19  ;;  %2245 = vadd.xlane.f32.xlu0 %v2244_v21 }
 0xfa2   :  { %7510 = vpow2.f32 %v2239_v22 }
 0xfa4   :  { %v7507_v24 = vpop.eup %7506 }
 0xfa5   :  { %v2247_v25 = vsel %vm628_vm6, %v7507_v24, 0.0 }
 0xfa6   :  { %v7509_v46 = vpop.eup %7508  ;;  %2248 = vadd.xlane.f32.xlu1 %v2247_v25 }
 0xfa7   :  { %v2250_v27 = vsel %vm628_vm6, %v7509_v46, 0.0 }
 0xfa8   :  { %2251 = vadd.xlane.f32.xlu0 %v2250_v27 }
 0xfac   :  { %v7511_v31 = vpop.eup %7510 }
 0xfad   :  { %v2253_v60 = vsel %vm641_vm7, %v7511_v31, 0.0 }
 0xfae   :  { %2254 = vadd.xlane.f32.xlu1 %v2253_v60 }
0x102b   :  { %v2243_v37 = vpop.xlane.xlu1 %2242 }
0x102c   :  { %7512 = vrcp.f32 %v2243_v37 }
0x102d   :  { %v2246_v54 = vpop.xlane.xlu0 %2245 }
0x102e   :  { %7514 = vrcp.f32 %v2246_v54 }
0x1033   :  { %v2249_v56 = vpop.xlane.xlu1 %2248 }
0x1034   :  { %7516 = vrcp.f32 %v2249_v56 }
0x1035   :  { %v2252_v55 = vpop.xlane.xlu0 %2251 }
0x1036   :  { %v7513_v8 = vpop.eup %7512  ;;  %7518 = vrcp.f32 %v2252_v55 }
0x1037   :  { %v2261_v5 = vmul.f32 %v7513_v8, %v7503_v47 }
0x1038   :  { %v7515_v4 = vpop.eup %7514 }
0x1039   :  { %v2262_v11 = vmul.f32 %v7515_v4, %v7505_v17 }
0x103b   :  { %v2266_v62 = vpack.c.bf16 %v2262_v11, %v2261_v5  ;;  %v2255_v35 = vpop.xlane.xlu1 %2254 }
0x103c   :  { %7520 = vrcp.f32 %v2255_v35 }
0x103d   :  { %6807 = vmatmul.mubr.msk.bf16.vlgmr.msra.gmra.mrb[128].mxu0 %vm628_vm6, %v2266_v62 }
0x103e   :  { %v7517_v32 = vpop.eup %7516  ;;  %6810 = vmatprep.mubr.msk.bf16.mxu0 %vm7702_vm0, %v7701_v1 }
0x103f   :  { %v2263_v40 = vmul.f32 %v7517_v32, %v7507_v24 }
0x1040   :  { %v7519_v39 = vpop.eup %7518 }
0x1041   :  { %v2264_v42 = vmul.f32 %v7519_v39, %v7509_v46 }
0x1043   :  { %v2267_v0 = vpack.c.bf16 %v2264_v42, %v2263_v40 }
0x1045   :  { %6811 = vmatmul.mubr.msk.bf16.gmra.mrb[132].mxu0 %vm628_vm6, %v2267_v0 }
0x1046   :  { %v7521_v2 = vpop.eup %7520  ;;  %6814 = vmatprep.mubr.msk.bf16.mxu0 %vm7702_vm0, %v7701_v1 }
0x1047   :  { %v2265_v41 = vmul.f32 %v7521_v2, %v7511_v31 }
0x1049   :  { %v2268_v45 = vpack.c.bf16 %v2265_v41, %v2265_v41 }
0x104d   :  { %6815 = vmatmul.mubr.msk.bf16.gmra.mrb[136].mxu0 %vm628_vm6, %v2268_v45 }
0x104e   :  { %6836 = vmatprep.mubr.msk.bf16.mxu0 %vm7702_vm0, %v7701_v1 }
0x1110   :  { %v2318_v18 = vpop.f32.mrb[128].mxu0 }
0x1111   :  { %v6808_v49 = vpop.f32.mrb[129].mxu0 }
0x1112   :  { %v2321_v26 = vpop.f32.mrb[130].mxu0 }
0x1113   :  { %v2340_v30 = vpack.c.bf16 %v2321_v26, %v2318_v18  ;;  %v6809_v33 = vpop.f32.mrb[131].mxu0 }
0x1115   :  { %6821 = vmatmul.mubr.msk.bf16.vlgmr.msra.gmra.mrb[148].mxu1 %vm553_vm5, %v2340_v30 }
0x1116   :  { %6824 = vmatprep.mubr.msk.bf16.mxu1 %vm7702_vm0, %v7701_v1 }
0x1118   :  { %v2326_v50 = vpop.f32.mrb[132].mxu0 }
0x1119   :  { %v6812_v51 = vpop.f32.mrb[133].mxu0 }
0x111a   :  { %v2329_v59 = vpop.f32.mrb[134].mxu0 }
0x111b   :  { %v2341_v61 = vpack.c.bf16 %v2329_v59, %v2326_v50  ;;  %v6813_v3 = vpop.f32.mrb[135].mxu0 }
0x111d   :  { %6825 = vmatmul.mubr.msk.bf16.gmra.mrb[152].mxu1 %vm553_vm5, %v2341_v61 }
0x111e   :  { %6828 = vmatprep.mubr.msk.bf16.mxu1 %vm7702_vm0, %v7701_v1 }
0x1120   :  { %v2334_v52 = vpop.f32.mrb[136].mxu0 }
0x1121   :  { %v6816_v63 = vpop.f32.mrb[137].mxu0  ;;  %v2342_v53 = vpack.c.bf16 %v2334_v52, %v2334_v52 }
0x1122   :  { %v2337_v58 = vpop.f32.mrb[138].mxu0 }
0x1123   :  { %v6817_v7 = vpop.f32.mrb[139].mxu0 }
0x1125   :  { %6829 = vmatmul.mubr.msk.bf16.gmra.mrb[156].mxu1 %vm553_vm5, %v2342_v53 }
0x1126   :  { %6864 = vmatprep.mubr.msk.bf16.mxu1 %vm7702_vm0, %v7701_v1 }
0x11e8   :  { %v2391_v14 = vpop.f32.mrb[148].mxu1 }
0x11e9   :  { %v2413_v57 = vadd.f32 %v2391_v14, %v8502_v44  ;;  %v6822_v9 = vpop.f32.mrb[149].mxu1 }
0x11ea   :  { %v2394_v47 = vpop.f32.mrb[150].mxu1 }
0x11eb   :  { %v2425_v43 = vadd.f32 %v5876_v15, %v2413_v57  ;;  %v2414_v16 = vadd.f32 %v2394_v47, %v8505_v48  ;;  %v6823_v17 = vpop.f32.mrb[151].mxu1  ;;  %v7389_v57 = vld [vmem:[%s9622_s18 + $0x8] sm:$0xff]  }
0x11ed   :  { %v2437_v19 = vmul.f32 %v5877_v12, %v2425_v43  ;;  %v2426_v21 = vadd.f32 %v5876_v15, %v2414_v16 }
0x11ef   :  { %v2438_v22 = vmul.f32 %v5877_v12, %v2426_v21  ;;  %v8595_v24 = vadd.f32 %v2437_v19, %v7884_v10 }
0x11f0   :  { %v2399_v25 = vpop.f32.mrb[152].mxu1 }
0x11f1   :  { %v2415_v46 = vadd.f32 %v2399_v25, %v8508_v28  ;;  %v6826_v44 = vpop.f32.mrb[153].mxu1  ;;  %v2449_v27 = vsel %vm208_vm2, %v8595_v24, 0.0  ;;  %v8601_v31 = vadd.f32 %v2438_v22, %v7886_v13 }
0x11f2   :  { %2450 = vadd.xlane.f32.xlu0 %v2449_v27  ;;  %v2402_v60 = vpop.f32.mrb[154].mxu1 }
0x11f3   :  { %v2427_v48 = vadd.f32 %v5876_v15, %v2415_v46  ;;  %v2416_v6 = vadd.f32 %v2402_v60, %v8511_v36  ;;  %v6827_v34 = vpop.f32.mrb[155].mxu1  ;;  %v2452_v10 = vsel %vm208_vm2, %v8601_v31, 0.0  ;;  %v5878_v60 = vld [vmem:[%s9620_s16] ss:$0 sm:$0xff] }
0x11f4   :  { %2453 = vadd.xlane.f32.xlu1 %v2452_v10 }
0x11f5   :  { %v2439_v37 = vmul.f32 %v5877_v12, %v2427_v48  ;;  %v2428_v54 = vadd.f32 %v5876_v15, %v2416_v6 }
0x11f7   :  { %v2440_v28 = vmul.f32 %v5877_v12, %v2428_v54  ;;  %v8607_v56 = vadd.f32 %v2439_v37, %v7898_v20 }
0x11f8   :  { %v2407_v55 = vpop.f32.mrb[156].mxu1 }
0x11f9   :  { %v2417_v13 = vadd.f32 %v2407_v55, %v8514_v38  ;;  %v6830_v8 = vpop.f32.mrb[157].mxu1  ;;  %v2455_v4 = vsel %vm208_vm2, %v8607_v56, 0.0  ;;  %v8613_v36 = vadd.f32 %v2440_v28, %v7900_v23  ;;  %v5879_v28 = vld [vmem:[%s9621_s17] ss:$0 sm:$0xff] }
0x11fa   :  { %2456 = vadd.xlane.f32.xlu0 %v2455_v4  ;;  %v2410_v5 = vpop.f32.mrb[158].mxu1 }
0x11fb   :  { %v2429_v11 = vadd.f32 %v5876_v15, %v2417_v13  ;;  %v6831_v62 = vpop.f32.mrb[159].mxu1  ;;  %v2458_v35 = vsel %vm208_vm2, %v8613_v36, 0.0  ;;  %v7388_v15 = vld [vmem:[%s9622_s18] sm:$0xff]  }
0x11fc   :  { %2459 = vadd.xlane.f32.xlu1 %v2458_v35  ;;  %6833 = vmatpush3.bf16.msra.mxu0 %v7388_v15 }
0x11fd   :  { %v2441_v20 = vmul.f32 %v5877_v12, %v2429_v11  ;;  %6834 = vmatprep.subr.bf16.mxu0 %v7701_v1 }
0x11ff   :  { %v8618_v32 = vadd.f32 %v2441_v20, %v7909_v29 }
0x1200   :  { %6835 = vmatpush3.bf16.msra.mxu0 %v7389_v57 }
0x1201   :  { %v2461_v38 = vsel %vm221_vm3, %v8618_v32, 0.0  ;;  %6876 = vmatprep.subr.bf16.mxu0 %v7701_v1 }
0x1202   :  { %2462 = vadd.xlane.f32.xlu0 %v2461_v38 }
0x127f   :  { %v2451_v39 = vpop.xlane.xlu0 %2450 }
0x1280   :  { %v2464_v40 = vmul.f32 0.03125, %v2451_v39 }
0x1281   :  { %v2454_v23 = vpop.xlane.xlu1 %2453 }
0x1282   :  { %v2469_v42 = vsub.f32 %v8595_v24, %v2464_v40  ;;  %v2465_v0 = vmul.f32 0.03125, %v2454_v23 }
0x1284   :  { %v2470_v2 = vsub.f32 %v8601_v31, %v2465_v0  ;;  %v2474_v41 = vmul.f32 %v2469_v42, %v2469_v42 }
0x1286   :  { %v2479_v45 = vsel %vm208_vm2, %v2474_v41, 0.0  ;;  %v2475_v18 = vmul.f32 %v2470_v2, %v2470_v2 }
0x1287   :  { %v2457_v49 = vpop.xlane.xlu0 %2456  ;;  %2480 = vadd.xlane.f32.xlu1 %v2479_v45 }
0x1288   :  { %v2466_v29 = vmul.f32 0.03125, %v2457_v49  ;;  %v2482_v26 = vsel %vm208_vm2, %v2475_v18, 0.0  ;;  %v7390_v49 = vld [vmem:[%s9624_s20] sm:$0xff]  }
0x1289   :  { %v2460_v30 = vpop.xlane.xlu1 %2459  ;;  %2483 = vadd.xlane.f32.xlu0 %v2482_v26  ;;  %6849 = vmatpush3.bf16.msra.mxu1 %v7390_v49  ;;  %v7392_v26 = vld [vmem:[%s9624_s20 + $0x10] sm:$0xff]  }
0x128a   :  { %v2471_v33 = vsub.f32 %v8607_v56, %v2466_v29  ;;  %v2467_v50 = vmul.f32 0.03125, %v2460_v30  ;;  %6850 = vmatprep.subr.bf16.mxu1 %v7701_v1  ;;  %v7391_v29 = vld [vmem:[%s9624_s20 + $0x8] sm:$0xff]   ;;  %v7393_v30 = vld [vmem:[%s9624_s20 + $0x18] sm:$0xff]  }
0x128c   :  { %v2472_v51 = vsub.f32 %v8613_v36, %v2467_v50  ;;  %v2476_v59 = vmul.f32 %v2471_v33, %v2471_v33  ;;  %v7395_v50 = vld [vmem:[%s9624_s20 + $0x28] sm:$0xff]  }
0x128d   :  { %6851 = vmatpush3.bf16.msra.mxu1 %v7391_v29 }
0x128e   :  { %v2485_v61 = vsel %vm208_vm2, %v2476_v59, 0.0  ;;  %v2477_v3 = vmul.f32 %v2472_v51, %v2472_v51  ;;  %6852 = vmatprep.subr.bf16.mxu1 %v7701_v1  ;;  %v7397_v59 = vld [vmem:[%s9624_s20 + $0x38] sm:$0xff]  }
0x128f   :  { %2486 = vadd.xlane.f32.xlu1 %v2485_v61  ;;  %v2463_v52 = vpop.xlane.xlu0 %2462  ;;  %v5880_v61 = vld [vmem:[%s9623_s19] ss:$0 sm:$0xff] }
0x1290   :  { %v2468_v63 = vmul.f32 0.03125, %v2463_v52  ;;  %v2488_v58 = vsel %vm208_vm2, %v2477_v3, 0.0 }
0x1291   :  { %2489 = vadd.xlane.f32.xlu0 %v2488_v58  ;;  %6853 = vmatpush3.bf16.msra.mxu1 %v7392_v26 }
0x1292   :  { %v2473_v53 = vsub.f32 %v8618_v32, %v2468_v63  ;;  %6854 = vmatprep.subr.bf16.mxu1 %v7701_v1 }
0x1294   :  { %v2478_v7 = vmul.f32 %v2473_v53, %v2473_v53 }
0x1295   :  { %6855 = vmatpush3.bf16.msra.mxu1 %v7393_v30 }
0x1296   :  { %v2491_v14 = vsel %vm221_vm3, %v2478_v7, 0.0  ;;  %6856 = vmatprep.subr.bf16.mxu1 %v7701_v1 }
0x1297   :  { %2492 = vadd.xlane.f32.xlu1 %v2491_v14 }
0x1314   :  { %v2481_v9 = vpop.xlane.xlu1 %2480 }
0x1315   :  { %v2494_v12 = vmul.f32 0.03125, %v2481_v9 }
0x1316   :  { %v2484_v47 = vpop.xlane.xlu0 %2483 }
0x1317   :  { %v2499_v43 = vadd.f32 1e-06, %v2494_v12  ;;  %v2495_v16 = vmul.f32 0.03125, %v2484_v47 }
0x1319   :  { %7522 = vrsqrt.f32 %v2499_v43  ;;  %v2500_v17 = vadd.f32 1e-06, %v2495_v16 }
0x131b   :  { %7524 = vrsqrt.f32 %v2500_v17 }
0x131c   :  { %v2487_v19 = vpop.xlane.xlu1 %2486 }
0x131d   :  { %v2496_v21 = vmul.f32 0.03125, %v2487_v19 }
0x131e   :  { %v2490_v22 = vpop.xlane.xlu0 %2489 }
0x131f   :  { %v2501_v25 = vadd.f32 1e-06, %v2496_v21  ;;  %v2497_v46 = vmul.f32 0.03125, %v2490_v22 }
0x1321   :  { %7526 = vrsqrt.f32 %v2501_v25  ;;  %v2502_v44 = vadd.f32 1e-06, %v2497_v46 }
0x1323   :  { %v7523_v27 = vpop.eup %7522  ;;  %7528 = vrsqrt.f32 %v2502_v44 }
0x1324   :  { %v2509_v48 = vmul.f32 %v7523_v27, %v2469_v42  ;;  %v2493_v6 = vpop.xlane.xlu1 %2492 }
0x1325   :  { %v7525_v34 = vpop.eup %7524  ;;  %v2498_v10 = vmul.f32 0.03125, %v2493_v6 }
0x1326   :  { %v2520_v37 = vmul.f32 %v5878_v60, %v2509_v48  ;;  %v2510_v54 = vmul.f32 %v7525_v34, %v2470_v2 }
0x1327   :  { %v2503_v55 = vadd.f32 1e-06, %v2498_v10 }
0x1328   :  { %v2521_v13 = vmul.f32 %v5878_v60, %v2510_v54  ;;  %v2531_v8 = vadd.f32 %v5879_v28, %v2520_v37 }
0x1329   :  { %7530 = vrsqrt.f32 %v2503_v55 }
0x132a   :  { %v2532_v4 = vadd.f32 %v5879_v28, %v2521_v13 }
0x132b   :  { %v7527_v5 = vpop.eup %7526 }
0x132c   :  { %v2511_v11 = vmul.f32 %v7527_v5, %v2471_v33  ;;  %v2536_v62 = vpack.c.bf16 %v2532_v4, %v2531_v8  ;;  %v7394_v33 = vld [vmem:[%s9624_s20 + $0x20] sm:$0xff]  }
0x132d   :  { %v7529_v35 = vpop.eup %7528  ;;  %6857 = vmatpush3.bf16.msra.mxu1 %v7394_v33 }
0x132e   :  { %v2512_v20 = vmul.f32 %v7529_v35, %v2472_v51  ;;  %6837 = vmatmul.mubr.msk.bf16.vlgmr.msra.gmra.mrb[140].mxu0 %vm208_vm2, %v2536_v62  ;;  %v2522_v38 = vmul.f32 %v5878_v60, %v2511_v11  ;;  %6858 = vmatprep.subr.bf16.mxu1 %v7701_v1  ;;  %v7396_v51 = vld [vmem:[%s9624_s20 + $0x30] sm:$0xff]  }
0x132f   :  { %6840 = vmatprep.mubr.msk.bf16.mxu0 %vm7702_vm0, %v7701_v1 }
0x1330   :  { %v2523_v39 = vmul.f32 %v5878_v60, %v2512_v20  ;;  %v2533_v40 = vadd.f32 %v5879_v28, %v2522_v38 }
0x1331   :  { %6859 = vmatpush3.bf16.msra.mxu1 %v7395_v50 }
0x1332   :  { %v2534_v23 = vadd.f32 %v5879_v28, %v2523_v39  ;;  %6860 = vmatprep.subr.bf16.mxu1 %v7701_v1 }
0x1333   :  { %v7531_v42 = vpop.eup %7530 }
0x1334   :  { %v2537_v0 = vpack.c.bf16 %v2534_v23, %v2533_v40  ;;  %v2513_v2 = vmul.f32 %v7531_v42, %v2473_v53 }
0x1335   :  { %6861 = vmatpush3.bf16.msra.mxu1 %v7396_v51 }
0x1336   :  { %6841 = vmatmul.mubr.msk.bf16.gmra.mrb[144].mxu0 %vm208_vm2, %v2537_v0  ;;  %v2524_v41 = vmul.f32 %v5878_v60, %v2513_v2  ;;  %6862 = vmatprep.subr.bf16.mxu1 %v7701_v1 }
0x1337   :  { %6844 = vmatprep.mubr.msk.bf16.mxu0 %vm7702_vm0, %v7701_v1 }
0x1338   :  { %v2535_v45 = vadd.f32 %v5879_v28, %v2524_v41 }
0x1339   :  { %6863 = vmatpush3.bf16.msra.mxu1 %v7397_v59 }
0x133a   :  { %v2538_v18 = vpack.c.bf16 %v2535_v45, %v2535_v45  ;;  %6908 = vmatprep.subr.bf16.mxu1 %v7701_v1 }
0x133e   :  { %6845 = vmatmul.mubr.msk.bf16.gmra.mrb[148].mxu0 %vm208_vm2, %v2538_v18 }
0x133f   :  { %6880 = vmatprep.mubr.msk.bf16.mxu0 %vm7702_vm0, %v7701_v1 }
0x1401   :  { %v2605_v3 = vpop.f32.mrb[140].mxu0 }
0x1402   :  { %v2606_v52 = vadd.f32 %v5880_v61, %v2605_v3  ;;  %v6838_v63 = vpop.f32.mrb[141].mxu0 }
0x1403   :  { %v2608_v58 = vpop.f32.mrb[142].mxu0 }
0x1404   :  { %v2632_v53 = vmul.f32 0.044715, %v2606_v52  ;;  %v2609_v7 = vadd.f32 %v5880_v61, %v2608_v58  ;;  %v6839_v14 = vpop.f32.mrb[143].mxu0  ;;  %v2627_v0 = vmul.f32 0.5, %v2606_v52 }
0x1406   :  { %v2637_v15 = vmul.f32 %v2632_v53, %v2606_v52  ;;  %v2633_v57 = vmul.f32 0.044715, %v2609_v7  ;;  %v2628_v2 = vmul.f32 0.5, %v2609_v7 }
0x1408   :  { %v2642_v9 = vmul.f32 %v2637_v15, %v2606_v52  ;;  %v2638_v12 = vmul.f32 %v2633_v57, %v2609_v7  ;;  %v5886_v15 = vld [vmem:[%s9625_s21] ss:$0 sm:$0xff] }
0x1409   :  { %v2613_v47 = vpop.f32.mrb[144].mxu0 }
0x140a   :  { %v2647_v43 = vadd.f32 %v2642_v9, %v2606_v52  ;;  %v2643_v16 = vmul.f32 %v2638_v12, %v2609_v7  ;;  %v2614_v17 = vadd.f32 %v5880_v61, %v2613_v47  ;;  %v6842_v19 = vpop.f32.mrb[145].mxu0  ;;  %v5895_v9 = vld [vmem:[%s9626_s22] ss:$0 sm:$0xff] }
0x140b   :  { %v2616_v21 = vpop.f32.mrb[146].mxu0 }
0x140c   :  { %v2652_v22 = vmul.f32 0.7978846, %v2647_v43  ;;  %v2648_v25 = vadd.f32 %v2643_v16, %v2609_v7  ;;  %v2634_v46 = vmul.f32 0.044715, %v2614_v17  ;;  %v2617_v44 = vadd.f32 %v5880_v61, %v2616_v21  ;;  %v6843_v27 = vpop.f32.mrb[147].mxu0 }
0x140d   :  { %v2629_v50 = vmul.f32 0.5, %v2614_v17 }
0x140e   :  { %7532 = vtanh.f32 %v2652_v22  ;;  %v2653_v60 = vmul.f32 0.7978846, %v2648_v25  ;;  %v2639_v48 = vmul.f32 %v2634_v46, %v2614_v17  ;;  %v2635_v6 = vmul.f32 0.044715, %v2617_v44 }
0x140f   :  { %v2630_v51 = vmul.f32 0.5, %v2617_v44 }
0x1410   :  { %7534 = vtanh.f32 %v2653_v60  ;;  %v2644_v34 = vmul.f32 %v2639_v48, %v2614_v17  ;;  %v2640_v10 = vmul.f32 %v2635_v6, %v2617_v44 }
0x1411   :  { %v2621_v37 = vpop.f32.mrb[148].mxu0 }
0x1412   :  { %v2645_v54 = vmul.f32 %v2640_v10, %v2617_v44  ;;  %v2622_v28 = vadd.f32 %v5880_v61, %v2621_v37  ;;  %v6846_v55 = vpop.f32.mrb[149].mxu0  ;;  %v2649_v13 = vadd.f32 %v2644_v34, %v2614_v17 }
0x1413   :  { %v2624_v8 = vpop.f32.mrb[150].mxu0 }
0x1414   :  { %v2636_v4 = vmul.f32 0.044715, %v2622_v28  ;;  %v6847_v5 = vpop.f32.mrb[151].mxu0  ;;  %v2650_v11 = vadd.f32 %v2645_v54, %v2617_v44  ;;  %v2654_v62 = vmul.f32 0.7978846, %v2649_v13  ;;  %v2631_v58 = vmul.f32 0.5, %v2622_v28 }
0x1416   :  { %v2641_v35 = vmul.f32 %v2636_v4, %v2622_v28  ;;  %v2655_v20 = vmul.f32 0.7978846, %v2650_v11  ;;  %7536 = vtanh.f32 %v2654_v62 }
0x1418   :  { %v7533_v38 = vpop.eup %7532  ;;  %7538 = vtanh.f32 %v2655_v20  ;;  %v2646_v39 = vmul.f32 %v2641_v35, %v2622_v28 }
0x1419   :  { %v2662_v40 = vadd.f32 1.0, %v7533_v38 }
0x141a   :  { %v7535_v23 = vpop.eup %7534  ;;  %v2651_v42 = vadd.f32 %v2646_v39, %v2622_v28 }
0x141b   :  { %v2663_v41 = vadd.f32 1.0, %v7535_v23  ;;  %v2667_v18 = vmul.f32 %v2662_v40, %v2627_v0 }
0x141c   :  { %v2656_v45 = vmul.f32 0.7978846, %v2651_v42 }
0x141d   :  { %v2668_v49 = vmul.f32 %v2663_v41, %v2628_v2 }
0x141e   :  { %7540 = vtanh.f32 %v2656_v45 }
0x141f   :  { %v2672_v29 = vpack.c.bf16 %v2668_v49, %v2667_v18 }
0x1420   :  { %v7537_v26 = vpop.eup %7536 }
0x1421   :  { %6865 = vmatmul.mubr.bf16.vlgmr.msra.gmra.mrb[160].mxu1 %v2672_v29  ;;  %v2664_v30 = vadd.f32 1.0, %v7537_v26 }
0x1422   :  { %v7539_v33 = vpop.eup %7538  ;;  %6868 = vmatprep.mubr.msk.bf16.mxu1 %vm7702_vm0, %v7701_v1 }
0x1423   :  { %v2665_v59 = vadd.f32 1.0, %v7539_v33  ;;  %v2669_v61 = vmul.f32 %v2664_v30, %v2629_v50 }
0x1425   :  { %v2670_v3 = vmul.f32 %v2665_v59, %v2630_v51 }
0x1427   :  { %v2673_v52 = vpack.c.bf16 %v2670_v3, %v2669_v61 }
0x1428   :  { %v7541_v63 = vpop.eup %7540 }
0x1429   :  { %6869 = vmatmul.mubr.bf16.gmra.mrb[164].mxu1 %v2673_v52  ;;  %v2666_v53 = vadd.f32 1.0, %v7541_v63 }
0x142a   :  { %6872 = vmatprep.mubr.msk.bf16.mxu1 %vm7702_vm0, %v7701_v1 }
0x142b   :  { %v2671_v7 = vmul.f32 %v2666_v53, %v2631_v58  ;;  %v7398_v58 = vld [vmem:[%s9660_s11 + $0x40] sm:$0xff]  }
0x142c   :  { %v7399_v53 = vld [vmem:[%s9661_s7 + $0x40] sm:$0xff]   ;;  %6877 = vmatpush3.bf16.msra.mxu0 %v7398_v58 }
0x142d   :  { %v2674_v14 = vpack.c.bf16 %v2671_v7, %v2671_v7  ;;  %6909 = vmatpush3.bf16.msra.mxu1 %v7399_v53  ;;  %6878 = vmatprep.subr.bf16.mxu0 %v7701_v1  ;;  %v7400_v7 = vld [vmem:[%s9660_s11 + $0x48] sm:$0xff]  }
0x142e   :  { %6910 = vmatprep.subr.bf16.mxu1 %v7701_v1 }
0x1430   :  { %6879 = vmatpush3.bf16.msra.mxu0 %v7400_v7 }
0x1431   :  { %6873 = vmatmul.mubr.bf16.gmra.mrb[168].mxu1 %v2674_v14  ;;  %v7401_v14 = vld [vmem:[%s9661_s7 + $0x48] sm:$0xff]   ;;  %6892 = vmatprep.subr.bf16.mxu0 %v7701_v1 }
0x1432   :  { %6912 = vmatprep.mubr.msk.bf16.mxu1 %vm7702_vm0, %v7701_v1  ;;  %6911 = vmatpush3.bf16.msra.mxu1 %v7401_v14 }
0x1433   :  { %6942 = vmatprep.subr.bf16.mxu1 %v7701_v1 }
0x14f4   :  { %v2780_v57 = vpop.f32.mrb[160].mxu1 }
0x14f5   :  { %v2781_v12 = vadd.f32 %v5886_v15, %v2780_v57  ;;  %v6866_v47 = vpop.f32.mrb[161].mxu1 }
0x14f6   :  { %v2783_v43 = vpop.f32.mrb[162].mxu1 }
0x14f7   :  { %v2809_v16 = vmul.f32 %v5895_v9, %v2781_v12  ;;  %v2784_v17 = vadd.f32 %v5886_v15, %v2783_v43  ;;  %v6867_v19 = vpop.f32.mrb[163].mxu1 }
0x14f9   :  { %v8703_v21 = vadd.f32 %v2809_v16, %v8595_v24  ;;  %v2810_v22 = vmul.f32 %v5895_v9, %v2784_v17 }
0x14fb   :  { %v8706_v25 = vadd.f32 %v2810_v22, %v8601_v31  ;;  %v2823_v46 = vsel %vm208_vm2, %v8703_v21, 0.0 }
0x14fc   :  { %2824 = vadd.xlane.f32.xlu0 %v2823_v46  ;;  %v2788_v44 = vpop.f32.mrb[164].mxu1 }
0x14fd   :  { %v2789_v27 = vadd.f32 %v5886_v15, %v2788_v44  ;;  %v6870_v60 = vpop.f32.mrb[165].mxu1  ;;  %v2826_v48 = vsel %vm208_vm2, %v8706_v25, 0.0 }
0x14fe   :  { %2827 = vadd.xlane.f32.xlu1 %v2826_v48  ;;  %v2791_v6 = vpop.f32.mrb[166].mxu1  ;;  %v5898_v60 = vld [vmem:[%s9662_s0 + $0x1] ss:$0 sm:$0xff] }
0x14ff   :  { %v2811_v34 = vmul.f32 %v5895_v9, %v2789_v27  ;;  %v2792_v10 = vadd.f32 %v5886_v15, %v2791_v6  ;;  %v6871_v24 = vpop.f32.mrb[167].mxu1 }
0x1501   :  { %v8713_v37 = vadd.f32 %v2811_v34, %v8607_v56  ;;  %v2812_v31 = vmul.f32 %v5895_v9, %v2792_v10 }
0x1503   :  { %v8716_v54 = vadd.f32 %v2812_v31, %v8613_v36  ;;  %v2829_v28 = vsel %vm208_vm2, %v8713_v37, 0.0 }
0x1504   :  { %2830 = vadd.xlane.f32.xlu0 %v2829_v28  ;;  %v2796_v55 = vpop.f32.mrb[168].mxu1  ;;  %v5899_v28 = vld [vmem:[%s9663_s1 + $0x1] ss:$0 sm:$0xff] }
0x1505   :  { %v2797_v13 = vadd.f32 %v5886_v15, %v2796_v55  ;;  %v6874_v8 = vpop.f32.mrb[169].mxu1  ;;  %v2832_v4 = vsel %vm208_vm2, %v8716_v54, 0.0 }
0x1506   :  { %2833 = vadd.xlane.f32.xlu1 %v2832_v4  ;;  %v2799_v5 = vpop.f32.mrb[170].mxu1 }
0x1507   :  { %v2813_v11 = vmul.f32 %v5895_v9, %v2797_v13  ;;  %v6875_v62 = vpop.f32.mrb[171].mxu1 }
0x1509   :  { %v8723_v56 = vadd.f32 %v2813_v11, %v8618_v32 }
0x150b   :  { %v2835_v36 = vsel %vm221_vm3, %v8723_v56, 0.0 }
0x150c   :  { %2836 = vadd.xlane.f32.xlu0 %v2835_v36  ;;  %v7402_v36 = vld [vmem:[%s9664_s3 + $0x40] sm:$0xff]  }
0x1589   :  { %v2825_v35 = vpop.xlane.xlu0 %2824 }
0x158a   :  { %v2838_v20 = vmul.f32 0.03125, %v2825_v35 }
0x158b   :  { %v2828_v38 = vpop.xlane.xlu1 %2827 }
0x158c   :  { %v2843_v39 = vsub.f32 %v8703_v21, %v2838_v20  ;;  %v2839_v40 = vmul.f32 0.03125, %v2828_v38 }
0x158e   :  { %v2844_v23 = vsub.f32 %v8706_v25, %v2839_v40  ;;  %v2848_v42 = vmul.f32 %v2843_v39, %v2843_v39  ;;  %v7403_v40 = vld [vmem:[%s9664_s3 + $0x48] sm:$0xff]  }
0x1590   :  { %v2853_v0 = vsel %vm208_vm2, %v2848_v42, 0.0  ;;  %v2849_v2 = vmul.f32 %v2844_v23, %v2844_v23 }
0x1591   :  { %v2831_v41 = vpop.xlane.xlu0 %2830  ;;  %2854 = vadd.xlane.f32.xlu1 %v2853_v0 }
0x1592   :  { %v2840_v32 = vmul.f32 0.03125, %v2831_v41  ;;  %v2856_v45 = vsel %vm208_vm2, %v2849_v2, 0.0 }
0x1593   :  { %v2834_v18 = vpop.xlane.xlu1 %2833  ;;  %2857 = vadd.xlane.f32.xlu0 %v2856_v45 }
0x1594   :  { %v2845_v49 = vsub.f32 %v8713_v37, %v2840_v32  ;;  %v2841_v29 = vmul.f32 0.03125, %v2834_v18 }
0x1596   :  { %v2846_v26 = vsub.f32 %v8716_v54, %v2841_v29  ;;  %v2850_v30 = vmul.f32 %v2845_v49, %v2845_v49 }
0x1598   :  { %v2859_v33 = vsel %vm208_vm2, %v2850_v30, 0.0  ;;  %v2851_v50 = vmul.f32 %v2846_v26, %v2846_v26 }
0x1599   :  { %2860 = vadd.xlane.f32.xlu1 %v2859_v33  ;;  %v2837_v51 = vpop.xlane.xlu0 %2836 }
0x159a   :  { %v2842_v59 = vmul.f32 0.03125, %v2837_v51  ;;  %v2862_v61 = vsel %vm208_vm2, %v2851_v50, 0.0 }
0x159b   :  { %2863 = vadd.xlane.f32.xlu0 %v2862_v61 }
0x159c   :  { %v8736_v3 = vsub.f32 %v8723_v56, %v2842_v59 }
0x159e   :  { %v2852_v52 = vmul.f32 %v8736_v3, %v8736_v3 }
0x15a0   :  { %v2865_v63 = vsel %vm221_vm3, %v2852_v52, 0.0 }
0x15a1   :  { %2866 = vadd.xlane.f32.xlu1 %v2865_v63 }
0x161e   :  { %v2855_v15 = vpop.xlane.xlu1 %2854 }
0x161f   :  { %v2868_v57 = vmul.f32 0.03125, %v2855_v15 }
0x1620   :  { %v2858_v9 = vpop.xlane.xlu0 %2857 }
0x1621   :  { %v2873_v12 = vadd.f32 1e-06, %v2868_v57  ;;  %v2869_v47 = vmul.f32 0.03125, %v2858_v9 }
0x1623   :  { %7542 = vrsqrt.f32 %v2873_v12  ;;  %v2874_v43 = vadd.f32 1e-06, %v2869_v47 }
0x1625   :  { %7544 = vrsqrt.f32 %v2874_v43 }
0x1626   :  { %v2861_v16 = vpop.xlane.xlu1 %2860 }
0x1627   :  { %v2870_v17 = vmul.f32 0.03125, %v2861_v16 }
0x1628   :  { %v2864_v19 = vpop.xlane.xlu0 %2863 }
0x1629   :  { %v2875_v22 = vadd.f32 1e-06, %v2870_v17  ;;  %v2871_v46 = vmul.f32 0.03125, %v2864_v19 }
0x162b   :  { %7546 = vrsqrt.f32 %v2875_v22  ;;  %v2876_v44 = vadd.f32 1e-06, %v2871_v46 }
0x162d   :  { %v7543_v27 = vpop.eup %7542  ;;  %7548 = vrsqrt.f32 %v2876_v44 }
0x162e   :  { %v2883_v48 = vmul.f32 %v7543_v27, %v2843_v39  ;;  %v2867_v6 = vpop.xlane.xlu1 %2866 }
0x162f   :  { %v7545_v34 = vpop.eup %7544  ;;  %v2872_v10 = vmul.f32 0.03125, %v2867_v6 }
0x1630   :  { %v2894_v24 = vmul.f32 %v5898_v60, %v2883_v48  ;;  %v2884_v31 = vmul.f32 %v7545_v34, %v2844_v23 }
0x1631   :  { %v2877_v55 = vadd.f32 1e-06, %v2872_v10 }
0x1632   :  { %v2895_v13 = vmul.f32 %v5898_v60, %v2884_v31  ;;  %v2905_v8 = vadd.f32 %v5899_v28, %v2894_v24 }
0x1633   :  { %7550 = vrsqrt.f32 %v2877_v55 }
0x1634   :  { %v2906_v4 = vadd.f32 %v5899_v28, %v2895_v13 }
0x1635   :  { %v7547_v5 = vpop.eup %7546 }
0x1636   :  { %v8763_v11 = vpack.c.bf16 %v2906_v4, %v2905_v8  ;;  %v2885_v62 = vmul.f32 %v7547_v5, %v2845_v49  ;;  %v8817_v49 = vld [vmem:[%s9665_s5 + $0x4] ss:$0 sm:$0xff] }
0x1637   :  { %v7549_v35 = vpop.eup %7548  ;;  %v5916_v5 = vld [vmem:[%s9666_s2 + $0x4] ss:$0 sm:$0xff] }
0x1638   :  { %v2896_v20 = vmul.f32 %v5898_v60, %v2885_v62  ;;  %v2886_v38 = vmul.f32 %v7549_v35, %v2846_v26  ;;  %6881 = vmatmul.mubr.msk.bf16.vlgmr.msra.gmra.mrb[152].mxu0 %vm208_vm2, %v8763_v11  ;;  %6913 = vmatmul.mubr.msk.bf16.vlgmr.msra.gmra.mrb[172].mxu1 %vm208_vm2, %v8763_v11  ;;  %v5927_v26 = vld [vmem:[%s9616_s12 + $0x4] ss:$0 sm:$0xff] }
0x1639   :  { %6884 = vmatprep.mubr.msk.bf16.mxu0 %vm7702_vm0, %v7701_v1  ;;  %6916 = vmatprep.mubr.msk.bf16.mxu1 %vm7702_vm0, %v7701_v1 }
0x163a   :  { %v2897_v39 = vmul.f32 %v5898_v60, %v2886_v38  ;;  %6893 = vmatpush3.bf16.msra.mxu0 %v7402_v36  ;;  %v2907_v23 = vadd.f32 %v5899_v28, %v2896_v20 }
0x163b   :  { %6894 = vmatprep.subr.bf16.mxu0 %v7701_v1 }
0x163c   :  { %v2908_v42 = vadd.f32 %v5899_v28, %v2897_v39 }
0x163d   :  { %v7551_v0 = vpop.eup %7550 }
0x163e   :  { %v8780_v2 = vpack.c.bf16 %v2908_v42, %v2907_v23  ;;  %v2887_v41 = vmul.f32 %v7551_v0, %v8736_v3  ;;  %6895 = vmatpush3.bf16.msra.mxu0 %v7403_v40 }
0x163f   :  { %6924 = vmatprep.subr.bf16.mxu0 %v7701_v1 }
0x1640   :  { %v2898_v32 = vmul.f32 %v5898_v60, %v2887_v41  ;;  %6885 = vmatmul.mubr.msk.bf16.gmra.mrb[156].mxu0 %vm208_vm2, %v8780_v2  ;;  %6917 = vmatmul.mubr.msk.bf16.gmra.mrb[176].mxu1 %vm208_vm2, %v8780_v2 }
0x1641   :  { %6888 = vmatprep.mubr.msk.bf16.mxu0 %vm7702_vm0, %v7701_v1  ;;  %6920 = vmatprep.mubr.msk.bf16.mxu1 %vm7702_vm0, %v7701_v1 }
0x1642   :  { %v2909_v45 = vadd.f32 %v5899_v28, %v2898_v32 }
0x1644   :  { %v8792_v18 = vpack.c.bf16 %v2909_v45, %v2909_v45 }
0x1648   :  { %6889 = vmatmul.mubr.msk.bf16.gmra.mrb[160].mxu0 %vm208_vm2, %v8792_v18  ;;  %6921 = vmatmul.mubr.msk.bf16.gmra.mrb[180].mxu1 %vm208_vm2, %v8792_v18 }
0x1649   :  { %6896 = vmatprep.mubr.msk.bf16.mxu0 %vm7702_vm0, %v7701_v1  ;;  %6948 = vmatprep.mubr.msk.bf16.mxu1 %vm7702_vm0, %v7701_v1 }
0x1650   :  { %6897 = vmatmul.mubr.msk.bf16.vlgmr.msra.gmra.mrb[164].mxu0 %vm208_vm2, %v8763_v11 }
0x1651   :  { %6900 = vmatprep.mubr.msk.bf16.mxu0 %vm7702_vm0, %v7701_v1 }
0x1658   :  { %6901 = vmatmul.mubr.msk.bf16.gmra.mrb[168].mxu0 %vm208_vm2, %v8780_v2 }
0x1659   :  { %6904 = vmatprep.mubr.msk.bf16.mxu0 %vm7702_vm0, %v7701_v1 }
0x1660   :  { %6905 = vmatmul.mubr.msk.bf16.gmra.mrb[172].mxu0 %vm208_vm2, %v8792_v18 }
0x1661   :  { %6930 = vmatprep.mubr.msk.bf16.mxu0 %vm7702_vm0, %v7701_v1 }
0x170b   :  { %v2981_v29 = vpop.f32.mrb[152].mxu0  ;;  %v3143_v30 = vpop.f32.mrb[172].mxu1 }
0x170c   :  { %v6882_v33 = vpop.f32.mrb[153].mxu0  ;;  %v6914_v50 = vpop.f32.mrb[173].mxu1  ;;  %v8823_v61 = vadd.f32 %v8817_v49, %v2981_v29  ;;  %v3144_v3 = vadd.f32 %v5927_v26, %v3143_v30 }
0x170d   :  { %v2984_v51 = vpop.f32.mrb[154].mxu0  ;;  %v3146_v59 = vpop.f32.mrb[174].mxu1 }
0x170e   :  { %v8826_v52 = vadd.f32 %v8817_v49, %v2984_v51  ;;  %v3147_v63 = vadd.f32 %v5927_v26, %v3146_v59  ;;  %v6883_v58 = vpop.f32.mrb[155].mxu0  ;;  %v6915_v53 = vpop.f32.mrb[175].mxu1 }
0x170f   :  { %v7404_v53 = vld [vmem:[%s9660_s11 + $0x50] sm:$0xff]  }
0x1710   :  { %v3165_v7 = vpack.c.bf16 %v8826_v52, %v8823_v61  ;;  %v3303_v14 = vpack.c.bf16 %v3147_v63, %v3144_v3 }
0x1712   :  { %6943 = vmatpush3.bf16.msra.mxu1 %v3303_v14  ;;  %v7405_v14 = vld [vmem:[%s9660_s11 + $0x58] sm:$0xff]  }
0x1713   :  { %v2989_v15 = vpop.f32.mrb[156].mxu0  ;;  %v3151_v57 = vpop.f32.mrb[176].mxu1  ;;  %6944 = vmatprep.subr.bf16.mxu1 %v7701_v1 }
0x1714   :  { %v6886_v9 = vpop.f32.mrb[157].mxu0  ;;  %v6918_v12 = vpop.f32.mrb[177].mxu1  ;;  %v2990_v16 = vadd.f32 %v8817_v49, %v2989_v15  ;;  %v3152_v17 = vadd.f32 %v5927_v26, %v3151_v57  ;;  %v8901_v57 = vld [vmem:[%s9667_s30] sm:$0xff] }
0x1715   :  { %v2992_v47 = vpop.f32.mrb[158].mxu0  ;;  %v3154_v43 = vpop.f32.mrb[178].mxu1 }
0x1716   :  { %v2993_v19 = vadd.f32 %v8817_v49, %v2992_v47  ;;  %v3155_v22 = vadd.f32 %v5927_v26, %v3154_v43  ;;  %v6887_v46 = vpop.f32.mrb[159].mxu0  ;;  %v6919_v44 = vpop.f32.mrb[179].mxu1  ;;  %v8909_v43 = vld [vmem:[%s9667_s30 + $0x8] sm:$0xff] }
0x1717   :  { %v8921_v44 = vld [vmem:[%s9667_s30 + $0x10] sm:$0xff] }
0x1718   :  { %v3166_v27 = vpack.c.bf16 %v2993_v19, %v2990_v16  ;;  %v3304_v60 = vpack.c.bf16 %v3155_v22, %v3152_v17 }
0x171a   :  { %6945 = vmatpush3.bf16.msra.mxu1 %v3304_v60 }
0x171b   :  { %v2997_v48 = vpop.f32.mrb[160].mxu0  ;;  %v3159_v6 = vpop.f32.mrb[180].mxu1  ;;  %6946 = vmatprep.subr.bf16.mxu1 %v7701_v1 }
0x171c   :  { %v3160_v34 = vadd.f32 %v5927_v26, %v3159_v6  ;;  %v6890_v10 = vpop.f32.mrb[161].mxu0  ;;  %v6922_v24 = vpop.f32.mrb[181].mxu1  ;;  %v2998_v61 = vadd.f32 %v8817_v49, %v2997_v48  ;;  %v7407_v49 = vld [vmem:[%s9661_s7 + $0x58] sm:$0xff]  }
0x171d   :  { %v3000_v31 = vpop.f32.mrb[162].mxu0  ;;  %v3162_v28 = vpop.f32.mrb[182].mxu1  ;;  %v8929_v6 = vld [vmem:[%s9667_s30 + $0x18] sm:$0xff] }
0x171e   :  { %v3305_v55 = vpack.c.bf16 %v3160_v34, %v3160_v34  ;;  %v6891_v13 = vpop.f32.mrb[163].mxu0  ;;  %v6923_v8 = vpop.f32.mrb[183].mxu1  ;;  %v3167_v52 = vpack.c.bf16 %v2998_v61, %v2998_v61 }
0x1720   :  { %v3316_v4 = vsel %vm700_vm4, %v3305_v55, 0  ;;  %v8941_v55 = vld [vmem:[%s9667_s30 + $0x20] sm:$0x3] }
0x1721   :  { %6947 = vmatpush3.bf16.msra.mxu1 %v3316_v4 }
0x1722   :  { %6976 = vmatprep.subr.bf16.mxu1 %v7701_v1 }
0x1723   :  { %v3062_v62 = vpop.f32.mrb[164].mxu0 }
0x1724   :  { %v6898_v36 = vpop.f32.mrb[165].mxu0  ;;  %v3063_v20 = vadd.f32 %v5916_v5, %v3062_v62 }
0x1725   :  { %v3065_v35 = vpop.f32.mrb[166].mxu0  ;;  %v8951_v36 = vld [vmem:[%s9665_s5 + $0x5] ss:$0 sm:$0xff] }
0x1726   :  { %v3066_v38 = vadd.f32 %v5916_v5, %v3065_v35  ;;  %v6899_v39 = vpop.f32.mrb[167].mxu0 }
0x1728   :  { %v3168_v40 = vpack.c.bf16 %v3066_v38, %v3063_v20 }
0x172a   :  { %v3181_v23 = vsel %vm553_vm5, %v3168_v40, 0 }
0x172b   :  { %v3070_v42 = vpop.f32.mrb[168].mxu0  ;;  %6925 = vmatpush3.bf16.xpose.msra.mxu0 %v3181_v23 }
0x172c   :  { %v6902_v0 = vpop.f32.mrb[169].mxu0  ;;  %6926 = vmatprep.subr.bf16.mxu0 %v7701_v1  ;;  %v3071_v32 = vadd.f32 %v5916_v5, %v3070_v42 }
0x172d   :  { %v3073_v41 = vpop.f32.mrb[170].mxu0 }
0x172e   :  { %v3074_v45 = vadd.f32 %v5916_v5, %v3073_v41  ;;  %v6903_v29 = vpop.f32.mrb[171].mxu0 }
0x1730   :  { %v3169_v26 = vpack.c.bf16 %v3074_v45, %v3071_v32 }
0x1732   :  { %v3184_v30 = vsel %vm553_vm5, %v3169_v26, 0 }
0x1733   :  { %v3078_v33 = vpop.f32.mrb[172].mxu0  ;;  %6927 = vmatpush3.bf16.xpose.msra.mxu0 %v3184_v30 }
0x1734   :  { %v3079_v50 = vadd.f32 %v5916_v5, %v3078_v33  ;;  %v6906_v51 = vpop.f32.mrb[173].mxu0  ;;  %6928 = vmatprep.subr.bf16.mxu0 %v7701_v1 }
0x1735   :  { %v3081_v59 = vpop.f32.mrb[174].mxu0 }
0x1736   :  { %v3170_v3 = vpack.c.bf16 %v3079_v50, %v3079_v50  ;;  %v6907_v63 = vpop.f32.mrb[175].mxu0 }
0x1738   :  { %v3187_v58 = vsel %vm553_vm5, %v3170_v3, 0  ;;  %v5967_v3 = vld [vmem:[%s9616_s12 + $0x5] ss:$0 sm:$0xff] }
0x173b   :  { %6929 = vmatpush3.bf16.xpose.msra.mxu0 %v3187_v58 }
0x173c   :  { %6960 = vmatprep.subr.bf16.mxu0 %v7701_v1 }
0x1742   :  { %6931 = vmatmul.mubr.msk.bf16.vlgmr.msra.gmra.mrb[176].mxu0 %vm553_vm5, %v3165_v7  ;;  %v7406_v7 = vld [vmem:[%s9661_s7 + $0x50] sm:$0xff]  }
0x1743   :  { %6934 = vmatprep.mubr.msk.bf16.mxu0 %vm7702_vm0, %v7701_v1  ;;  %6961 = vmatpush3.bf16.msra.mxu0 %v7404_v53 }
0x1744   :  { %6962 = vmatprep.subr.bf16.mxu0 %v7701_v1 }
0x1747   :  { %6963 = vmatpush3.bf16.msra.mxu0 %v7405_v14 }
0x1748   :  { %6992 = vmatprep.subr.bf16.mxu0 %v7701_v1 }
0x174a   :  { %6935 = vmatmul.mubr.msk.bf16.gmra.mrb[180].mxu0 %vm553_vm5, %v3166_v27 }
0x174b   :  { %6938 = vmatprep.mubr.msk.bf16.mxu0 %vm7702_vm0, %v7701_v1 }
0x1752   :  { %6939 = vmatmul.mubr.msk.bf16.gmra.mrb[184].mxu0 %vm553_vm5, %v3167_v52 }
0x1753   :  { %6964 = vmatprep.mubr.msk.bf16.mxu0 %vm7702_vm0, %v7701_v1 }
0x175a   :  { %6965 = vmatmul.mubr.msk.bf16.vlgmr.msra.gmra.mrb[188].mxu0 %vm208_vm2, %v8763_v11 }
0x175b   :  { %6968 = vmatprep.mubr.msk.bf16.mxu0 %vm7702_vm0, %v7701_v1  ;;  %6993 = vmatpush3.bf16.msra.mxu0 %v7406_v7 }
0x175c   :  { %6994 = vmatprep.subr.bf16.mxu0 %v7701_v1 }
0x175f   :  { %6995 = vmatpush3.bf16.msra.mxu0 %v7407_v49 }
0x1760   :  { %7026 = vmatprep.subr.bf16.mxu0 %v7701_v1 }
0x1762   :  { %6969 = vmatmul.mubr.msk.bf16.gmra.mrb[192].mxu0 %vm208_vm2, %v8780_v2 }
0x1763   :  { %6972 = vmatprep.mubr.msk.bf16.mxu0 %vm7702_vm0, %v7701_v1 }
0x176a   :  { %6973 = vmatmul.mubr.msk.bf16.gmra.mrb[196].mxu0 %vm208_vm2, %v8792_v18 }
0x176b   :  { %6996 = vmatprep.mubr.msk.bf16.mxu0 %vm7702_vm0, %v7701_v1 }
0x1772   :  { %6997 = vmatmul.mubr.msk.bf16.vlgmr.msra.gmra.mrb[200].mxu0 %vm208_vm2, %v8763_v11 }
0x1773   :  { %7000 = vmatprep.mubr.msk.bf16.mxu0 %vm7702_vm0, %v7701_v1 }
0x177a   :  { %7001 = vmatmul.mubr.msk.bf16.gmra.mrb[204].mxu0 %vm208_vm2, %v8780_v2 }
0x177b   :  { %7004 = vmatprep.mubr.msk.bf16.mxu0 %vm7702_vm0, %v7701_v1 }
0x1782   :  { %7005 = vmatmul.mubr.msk.bf16.gmra.mrb[208].mxu0 %vm208_vm2, %v8792_v18 }
0x1783   :  { %7032 = vmatprep.mubr.msk.bf16.mxu0 %vm7702_vm0, %v7701_v1 }
0x1815   :  { %v3223_v15 = vpop.f32.mrb[176].mxu0 }
0x1816   :  { %v8904_v9 = vadd.f32 %v8901_v57, %v3223_v15  ;;  %v6932_v12 = vpop.f32.mrb[177].mxu0 }
0x1817   :  { %v3226_v47 = vpop.f32.mrb[178].mxu0 }
0x1818   :  { %v8912_v16 = vadd.f32 %v8909_v43, %v3226_v47  ;;  %v6933_v17 = vpop.f32.mrb[179].mxu0  ;;  %v3245_v19 = vsel %vm628_vm6, %v8904_v9, -inf }
0x1819   :  { %3246 = vmax.xlane.f32.xlu0 %v3245_v19 }
0x181a   :  { %v3248_v22 = vsel %vm628_vm6, %v8912_v16, -inf }
0x181b   :  { %3249 = vmax.xlane.f32.xlu1 %v3248_v22 }
0x181d   :  { %v3231_v46 = vpop.f32.mrb[180].mxu0 }
0x181e   :  { %v8924_v27 = vadd.f32 %v8921_v44, %v3231_v46  ;;  %v6936_v60 = vpop.f32.mrb[181].mxu0 }
0x181f   :  { %v3234_v48 = vpop.f32.mrb[182].mxu0 }
0x1820   :  { %v8932_v34 = vadd.f32 %v8929_v6, %v3234_v48  ;;  %v6937_v10 = vpop.f32.mrb[183].mxu0  ;;  %v3251_v24 = vsel %vm628_vm6, %v8924_v27, -inf }
0x1821   :  { %3252 = vmax.xlane.f32.xlu0 %v3251_v24 }
0x1822   :  { %v3254_v31 = vsel %vm628_vm6, %v8932_v34, -inf }
0x1823   :  { %3255 = vmax.xlane.f32.xlu1 %v3254_v31 }
0x1825   :  { %v3239_v28 = vpop.f32.mrb[184].mxu0 }
0x1826   :  { %v8944_v13 = vadd.f32 %v8941_v55, %v3239_v28  ;;  %v6940_v8 = vpop.f32.mrb[185].mxu0 }
0x1827   :  { %v3242_v4 = vpop.f32.mrb[186].mxu0 }
0x1828   :  { %v6941_v5 = vpop.f32.mrb[187].mxu0  ;;  %v3257_v62 = vsel %vm641_vm7, %v8944_v13, -inf }
0x1829   :  { %3258 = vmax.xlane.f32.xlu0 %v3257_v62 }
0x182d   :  { %v3438_v35 = vpop.f32.mrb[188].mxu0 }
0x182e   :  { %v6966_v20 = vpop.f32.mrb[189].mxu0  ;;  %v8954_v39 = vadd.f32 %v8951_v36, %v3438_v35 }
0x182f   :  { %v3441_v38 = vpop.f32.mrb[190].mxu0 }
0x1830   :  { %v8957_v40 = vadd.f32 %v8951_v36, %v3441_v38  ;;  %v6967_v23 = vpop.f32.mrb[191].mxu0 }
0x1832   :  { %v3622_v42 = vpack.c.bf16 %v8957_v40, %v8954_v39 }
0x1835   :  { %v3446_v0 = vpop.f32.mrb[192].mxu0 }
0x1836   :  { %v6970_v41 = vpop.f32.mrb[193].mxu0  ;;  %v8962_v45 = vadd.f32 %v8951_v36, %v3446_v0 }
0x1837   :  { %v3449_v32 = vpop.f32.mrb[194].mxu0 }
0x1838   :  { %v8965_v29 = vadd.f32 %v8951_v36, %v3449_v32  ;;  %v6971_v26 = vpop.f32.mrb[195].mxu0 }
0x183a   :  { %v3623_v30 = vpack.c.bf16 %v8965_v29, %v8962_v45 }
0x183d   :  { %v8969_v33 = vpop.f32.mrb[196].mxu0 }
0x183e   :  { %v6974_v50 = vpop.f32.mrb[197].mxu0 }
0x183f   :  { %v3457_v51 = vpop.f32.mrb[198].mxu0 }
0x1840   :  { %v6975_v59 = vpop.f32.mrb[199].mxu0 }
0x1845   :  { %v3600_v63 = vpop.f32.mrb[200].mxu0 }
0x1846   :  { %v6998_v58 = vpop.f32.mrb[201].mxu0  ;;  %v3601_v14 = vadd.f32 %v5967_v3, %v3600_v63 }
0x1847   :  { %v3603_v53 = vpop.f32.mrb[202].mxu0 }
0x1848   :  { %v3604_v61 = vadd.f32 %v5967_v3, %v3603_v53  ;;  %v6999_v52 = vpop.f32.mrb[203].mxu0 }
0x184a   :  { %v3760_v7 = vpack.c.bf16 %v3604_v61, %v3601_v14 }
0x184c   :  { %7027 = vmatpush3.bf16.msra.mxu0 %v3760_v7 }
0x184d   :  { %v3608_v49 = vpop.f32.mrb[204].mxu0  ;;  %7028 = vmatprep.subr.bf16.mxu0 %v7701_v1 }
0x184e   :  { %v7002_v15 = vpop.f32.mrb[205].mxu0  ;;  %v3609_v47 = vadd.f32 %v5967_v3, %v3608_v49 }
0x184f   :  { %v3611_v12 = vpop.f32.mrb[206].mxu0 }
0x1850   :  { %v3612_v17 = vadd.f32 %v5967_v3, %v3611_v12  ;;  %v7003_v19 = vpop.f32.mrb[207].mxu0 }
0x1851   :  { %v7408_v19 = vld [vmem:[%s9664_s3 + $0x50] sm:$0xff]  }
0x1852   :  { %v3761_v22 = vpack.c.bf16 %v3612_v17, %v3609_v47 }
0x1854   :  { %7029 = vmatpush3.bf16.msra.mxu0 %v3761_v22 }
0x1855   :  { %v3616_v46 = vpop.f32.mrb[208].mxu0  ;;  %7030 = vmatprep.subr.bf16.mxu0 %v7701_v1 }
0x1856   :  { %v3617_v60 = vadd.f32 %v5967_v3, %v3616_v46  ;;  %v7006_v48 = vpop.f32.mrb[209].mxu0 }
0x1857   :  { %v3619_v10 = vpop.f32.mrb[210].mxu0  ;;  %v7409_v48 = vld [vmem:[%s9664_s3 + $0x58] sm:$0xff]  }
0x1858   :  { %v3762_v24 = vpack.c.bf16 %v3617_v60, %v3617_v60  ;;  %v7007_v31 = vpop.f32.mrb[211].mxu0 }
0x185a   :  { %v3773_v28 = vsel %vm700_vm4, %v3762_v24, 0 }
0x185b   :  { %7031 = vmatpush3.bf16.msra.mxu0 %v3773_v28 }
0x185c   :  { %7058 = vmatprep.subr.bf16.mxu0 %v7701_v1 }
0x18a6   :  { %v3247_v8 = vpop.xlane.xlu0 %3246 }
0x18a7   :  { %v3260_v4 = vsub.f32 %v8904_v9, %v3247_v8 }
0x18a8   :  { %v3250_v5 = vpop.xlane.xlu1 %3249 }
0x18a9   :  { %v3265_v62 = vmul.f32 1.442695, %v3260_v4  ;;  %v3261_v35 = vsub.f32 %v8912_v16, %v3250_v5 }
0x18ab   :  { %7552 = vpow2.f32 %v3265_v62  ;;  %v3267_v20 = vmul.f32 1.442695, %v3261_v35 }
0x18ad   :  { %7554 = vpow2.f32 %v3267_v20 }
0x18ae   :  { %v3253_v38 = vpop.xlane.xlu0 %3252 }
0x18af   :  { %v3262_v23 = vsub.f32 %v8924_v27, %v3253_v38 }
0x18b0   :  { %v3256_v0 = vpop.xlane.xlu1 %3255 }
0x18b1   :  { %v3269_v41 = vmul.f32 1.442695, %v3262_v23  ;;  %v3263_v32 = vsub.f32 %v8932_v34, %v3256_v0 }
0x18b3   :  { %7556 = vpow2.f32 %v3269_v41  ;;  %v3271_v26 = vmul.f32 1.442695, %v3263_v32 }
0x18b5   :  { %v7553_v50 = vpop.eup %7552  ;;  %7558 = vpow2.f32 %v3271_v26 }
0x18b6   :  { %v3259_v51 = vpop.xlane.xlu0 %3258  ;;  %v3275_v9 = vsel %vm628_vm6, %v7553_v50, 0.0 }
0x18b7   :  { %v7555_v59 = vpop.eup %7554  ;;  %v3264_v16 = vsub.f32 %v8944_v13, %v3259_v51  ;;  %3276 = vadd.xlane.f32.xlu1 %v3275_v9 }
0x18b8   :  { %v3278_v3 = vsel %vm628_vm6, %v7555_v59, 0.0 }
0x18b9   :  { %v3273_v63 = vmul.f32 1.442695, %v3264_v16  ;;  %3279 = vadd.xlane.f32.xlu0 %v3278_v3  ;;  %v5956_v3 = vld [vmem:[%s9666_s2 + $0x5] ss:$0 sm:$0xff] }
0x18bb   :  { %7560 = vpow2.f32 %v3273_v63 }
0x18bd   :  { %v7557_v27 = vpop.eup %7556 }
0x18be   :  { %v3281_v58 = vsel %vm628_vm6, %v7557_v27, 0.0 }
0x18bf   :  { %v7559_v34 = vpop.eup %7558  ;;  %3282 = vadd.xlane.f32.xlu1 %v3281_v58 }
0x18c0   :  { %v3284_v53 = vsel %vm628_vm6, %v7559_v34, 0.0 }
0x18c1   :  { %3285 = vadd.xlane.f32.xlu0 %v3284_v53 }
0x18c5   :  { %v7561_v14 = vpop.eup %7560 }
0x18c6   :  { %v3287_v61 = vsel %vm641_vm7, %v7561_v14, 0.0 }
0x18c7   :  { %3288 = vadd.xlane.f32.xlu1 %v3287_v61 }
0x1944   :  { %v3277_v52 = vpop.xlane.xlu1 %3276 }
0x1945   :  { %7562 = vrcp.f32 %v3277_v52 }
0x1946   :  { %v3280_v13 = vpop.xlane.xlu0 %3279 }
0x1947   :  { %7564 = vrcp.f32 %v3280_v13 }
0x194c   :  { %v3283_v7 = vpop.xlane.xlu1 %3282 }
0x194d   :  { %7566 = vrcp.f32 %v3283_v7 }
0x194e   :  { %v3286_v49 = vpop.xlane.xlu0 %3285 }
0x194f   :  { %v7563_v15 = vpop.eup %7562  ;;  %7568 = vrcp.f32 %v3286_v49 }
0x1950   :  { %v3295_v47 = vmul.f32 %v7563_v15, %v7553_v50 }
0x1951   :  { %v7565_v12 = vpop.eup %7564 }
0x1952   :  { %v3296_v17 = vmul.f32 %v7565_v12, %v7555_v59 }
0x1954   :  { %v3300_v22 = vpack.c.bf16 %v3296_v17, %v3295_v47  ;;  %v3289_v46 = vpop.xlane.xlu1 %3288 }
0x1955   :  { %7570 = vrcp.f32 %v3289_v46 }
0x1956   :  { %6949 = vmatmul.mubr.msk.bf16.vlgmr.msra.gmra.mrb[184].mxu1 %vm628_vm6, %v3300_v22 }
0x1957   :  { %v7567_v60 = vpop.eup %7566  ;;  %6952 = vmatprep.mubr.msk.bf16.mxu1 %vm7702_vm0, %v7701_v1  ;;  %6977 = vmatpush3.bf16.msra.mxu1 %v7408_v19 }
0x1958   :  { %6978 = vmatprep.subr.bf16.mxu1 %v7701_v1  ;;  %v3297_v24 = vmul.f32 %v7567_v60, %v7557_v27 }
0x1959   :  { %v7569_v10 = vpop.eup %7568 }
0x195a   :  { %v3298_v31 = vmul.f32 %v7569_v10, %v7559_v34 }
0x195b   :  { %6979 = vmatpush3.bf16.msra.mxu1 %v7409_v48 }
0x195c   :  { %v3301_v28 = vpack.c.bf16 %v3298_v31, %v3297_v24  ;;  %7008 = vmatprep.subr.bf16.mxu1 %v7701_v1 }
0x195e   :  { %6953 = vmatmul.mubr.msk.bf16.gmra.mrb[188].mxu1 %vm628_vm6, %v3301_v28  ;;  %v3455_v28 = vadd.f32 %v8951_v36, %v8969_v33 }
0x195f   :  { %v7571_v8 = vpop.eup %7570  ;;  %6956 = vmatprep.mubr.msk.bf16.mxu1 %vm7702_vm0, %v7701_v1 }
0x1960   :  { %v3299_v4 = vmul.f32 %v7571_v8, %v7561_v14  ;;  %v3624_v8 = vpack.c.bf16 %v3455_v28, %v3455_v28 }
0x1962   :  { %v3302_v5 = vpack.c.bf16 %v3299_v4, %v3299_v4 }
0x1966   :  { %6957 = vmatmul.mubr.msk.bf16.gmra.mrb[192].mxu1 %vm628_vm6, %v3302_v5 }
0x1967   :  { %6980 = vmatprep.mubr.msk.bf16.mxu1 %vm7702_vm0, %v7701_v1 }
0x196e   :  { %6981 = vmatmul.mubr.msk.bf16.vlgmr.msra.gmra.mrb[196].mxu1 %vm208_vm2, %v8763_v11 }
0x196f   :  { %6984 = vmatprep.mubr.msk.bf16.mxu1 %vm7702_vm0, %v7701_v1 }
0x1976   :  { %6985 = vmatmul.mubr.msk.bf16.gmra.mrb[200].mxu1 %vm208_vm2, %v8780_v2 }
0x1977   :  { %6988 = vmatprep.mubr.msk.bf16.mxu1 %vm7702_vm0, %v7701_v1 }
0x197e   :  { %6989 = vmatmul.mubr.msk.bf16.gmra.mrb[204].mxu1 %vm208_vm2, %v8792_v18 }
0x197f   :  { %7014 = vmatprep.mubr.msk.bf16.mxu1 %vm7702_vm0, %v7701_v1 }
0x1a29   :  { %v9017_v62 = vpop.f32.mrb[184].mxu1 }
0x1a2a   :  { %v6950_v35 = vpop.f32.mrb[185].mxu1 }
0x1a2b   :  { %v9019_v20 = vpop.f32.mrb[186].mxu1 }
0x1a2c   :  { %v3374_v38 = vpack.c.bf16 %v9019_v20, %v9017_v62  ;;  %v6951_v23 = vpop.f32.mrb[187].mxu1 }
0x1a31   :  { %v9023_v0 = vpop.f32.mrb[188].mxu1 }
0x1a32   :  { %v6954_v41 = vpop.f32.mrb[189].mxu1 }
0x1a33   :  { %v9025_v32 = vpop.f32.mrb[190].mxu1 }
0x1a34   :  { %v3375_v26 = vpack.c.bf16 %v9025_v32, %v9023_v0  ;;  %v6955_v50 = vpop.f32.mrb[191].mxu1  ;;  %v7412_v32 = vld [vmem:[%s9660_s11 + $0x60] sm:$0xff]  }
0x1a39   :  { %v9029_v51 = vpop.f32.mrb[192].mxu1 }
0x1a3a   :  { %v6958_v9 = vpop.f32.mrb[193].mxu1  ;;  %v3376_v62 = vpack.c.bf16 %v9029_v51, %v9029_v51 }
0x1a3b   :  { %v3371_v59 = vpop.f32.mrb[194].mxu1 }
0x1a3c   :  { %v6959_v16 = vpop.f32.mrb[195].mxu1 }
0x1a41   :  { %v3519_v63 = vpop.f32.mrb[196].mxu1 }
0x1a42   :  { %v6982_v27 = vpop.f32.mrb[197].mxu1  ;;  %v3520_v34 = vadd.f32 %v5956_v3, %v3519_v63 }
0x1a43   :  { %v3522_v58 = vpop.f32.mrb[198].mxu1 }
0x1a44   :  { %v3523_v53 = vadd.f32 %v5956_v3, %v3522_v58  ;;  %v6983_v14 = vpop.f32.mrb[199].mxu1 }
0x1a46   :  { %v3625_v61 = vpack.c.bf16 %v3523_v53, %v3520_v34 }
0x1a48   :  { %v3638_v52 = vsel %vm553_vm5, %v3625_v61, 0 }
0x1a49   :  { %v3527_v13 = vpop.f32.mrb[200].mxu1  ;;  %7009 = vmatpush3.bf16.xpose.msra.mxu1 %v3638_v52 }
0x1a4a   :  { %v6986_v7 = vpop.f32.mrb[201].mxu1  ;;  %7010 = vmatprep.subr.bf16.mxu1 %v7701_v1  ;;  %v3528_v15 = vadd.f32 %v5956_v3, %v3527_v13 }
0x1a4b   :  { %v3530_v49 = vpop.f32.mrb[202].mxu1 }
0x1a4c   :  { %v3531_v12 = vadd.f32 %v5956_v3, %v3530_v49  ;;  %v6987_v47 = vpop.f32.mrb[203].mxu1 }
0x1a4e   :  { %v3626_v17 = vpack.c.bf16 %v3531_v12, %v3528_v15 }
0x1a50   :  { %v3641_v19 = vsel %vm553_vm5, %v3626_v17, 0 }
0x1a51   :  { %v3535_v22 = vpop.f32.mrb[204].mxu1  ;;  %7011 = vmatpush3.bf16.xpose.msra.mxu1 %v3641_v19 }
0x1a52   :  { %v3536_v46 = vadd.f32 %v5956_v3, %v3535_v22  ;;  %v6990_v60 = vpop.f32.mrb[205].mxu1  ;;  %7012 = vmatprep.subr.bf16.mxu1 %v7701_v1 }
0x1a53   :  { %v3538_v48 = vpop.f32.mrb[206].mxu1 }
0x1a54   :  { %v3627_v10 = vpack.c.bf16 %v3536_v46, %v3536_v46  ;;  %v6991_v24 = vpop.f32.mrb[207].mxu1 }
0x1a56   :  { %v3644_v31 = vsel %vm553_vm5, %v3627_v10, 0 }
0x1a59   :  { %7013 = vmatpush3.bf16.xpose.msra.mxu1 %v3644_v31 }
0x1a5a   :  { %7044 = vmatprep.subr.bf16.mxu1 %v7701_v1 }
0x1a60   :  { %7015 = vmatmul.mubr.msk.bf16.vlgmr.msra.gmra.mrb[208].mxu1 %vm553_vm5, %v3622_v42 }
0x1a61   :  { %7018 = vmatprep.mubr.msk.bf16.mxu1 %vm7702_vm0, %v7701_v1 }
0x1a68   :  { %7019 = vmatmul.mubr.msk.bf16.gmra.mrb[212].mxu1 %vm553_vm5, %v3623_v30 }
0x1a69   :  { %7022 = vmatprep.mubr.msk.bf16.mxu1 %vm7702_vm0, %v7701_v1 }
0x1a70   :  { %7023 = vmatmul.mubr.msk.bf16.gmra.mrb[216].mxu1 %vm553_vm5, %v3624_v8 }
0x1a71   :  { %7046 = vmatprep.mubr.msk.bf16.mxu1 %vm7702_vm0, %v7701_v1 }
0x1b33   :  { %v3680_v39 = vpop.f32.mrb[208].mxu1 }
0x1b34   :  { %v3681_v40 = vadd.f32 %v8901_v57, %v3680_v39  ;;  %v7016_v42 = vpop.f32.mrb[209].mxu1 }
0x1b35   :  { %v3683_v4 = vpop.f32.mrb[210].mxu1 }
0x1b36   :  { %v3684_v45 = vadd.f32 %v8909_v43, %v3683_v4  ;;  %v7017_v29 = vpop.f32.mrb[211].mxu1  ;;  %v3702_v30 = vsel %vm628_vm6, %v3681_v40, -inf }
0x1b37   :  { %3703 = vmax.xlane.f32.xlu0 %v3702_v30 }
0x1b38   :  { %v3705_v5 = vsel %vm628_vm6, %v3684_v45, -inf }
0x1b39   :  { %3706 = vmax.xlane.f32.xlu1 %v3705_v5 }
0x1b3b   :  { %v3688_v36 = vpop.f32.mrb[212].mxu1 }
0x1b3c   :  { %v3689_v33 = vadd.f32 %v8921_v44, %v3688_v36  ;;  %v7020_v35 = vpop.f32.mrb[213].mxu1 }
0x1b3d   :  { %v3691_v23 = vpop.f32.mrb[214].mxu1 }
0x1b3e   :  { %v3692_v41 = vadd.f32 %v8929_v6, %v3691_v23  ;;  %v7021_v50 = vpop.f32.mrb[215].mxu1  ;;  %v3708_v9 = vsel %vm628_vm6, %v3689_v33, -inf }
0x1b3f   :  { %3709 = vmax.xlane.f32.xlu0 %v3708_v9 }
0x1b40   :  { %v3711_v59 = vsel %vm628_vm6, %v3692_v41, -inf }
0x1b41   :  { %3712 = vmax.xlane.f32.xlu1 %v3711_v59 }
0x1b43   :  { %v3696_v16 = vpop.f32.mrb[216].mxu1 }
0x1b44   :  { %v3697_v3 = vadd.f32 %v8941_v55, %v3696_v16  ;;  %v7024_v63 = vpop.f32.mrb[217].mxu1 }
0x1b45   :  { %v3699_v27 = vpop.f32.mrb[218].mxu1 }
0x1b46   :  { %v7025_v58 = vpop.f32.mrb[219].mxu1  ;;  %v3714_v34 = vsel %vm641_vm7, %v3697_v3, -inf }
0x1b47   :  { %3715 = vmax.xlane.f32.xlu0 %v3714_v34 }
0x1bc4   :  { %v3704_v53 = vpop.xlane.xlu0 %3703 }
0x1bc5   :  { %v3717_v14 = vsub.f32 %v3681_v40, %v3704_v53 }
0x1bc6   :  { %v3707_v61 = vpop.xlane.xlu1 %3706 }
0x1bc7   :  { %v3722_v52 = vmul.f32 1.442695, %v3717_v14  ;;  %v3718_v13 = vsub.f32 %v3684_v45, %v3707_v61  ;;  %v5979_v45 = vld [vmem:[%s9617_s13 + $0x14] sm:$0xf] }
0x1bc8   :  { %v3846_v29 = vsel %vm1230_vm8, %v5979_v45, 0 }
0x1bc9   :  { %7572 = vpow2.f32 %v3722_v52  ;;  %v3724_v7 = vmul.f32 1.442695, %v3718_v13  ;;  %7045 = vmatpush3.bf16.msra.mxu1 %v3846_v29  ;;  %v7410_v13 = vld [vmem:[%s9664_s3 + $0x60] sm:$0xff]  }
0x1bca   :  { %7072 = vmatprep.subr.bf16.mxu1 %v7701_v1 }
0x1bcb   :  { %7574 = vpow2.f32 %v3724_v7  ;;  %v7411_v7 = vld [vmem:[%s9664_s3 + $0x68] sm:$0xff]  }
0x1bcc   :  { %v3710_v49 = vpop.xlane.xlu0 %3709 }
0x1bcd   :  { %v3719_v15 = vsub.f32 %v3689_v33, %v3710_v49  ;;  %v7413_v49 = vld [vmem:[%s9660_s11 + $0x68] sm:$0xff]  }
0x1bce   :  { %v3713_v12 = vpop.xlane.xlu1 %3712 }
0x1bcf   :  { %v3726_v47 = vmul.f32 1.442695, %v3719_v15  ;;  %v3720_v17 = vsub.f32 %v3692_v41, %v3713_v12  ;;  %v5939_v41 = vld [vmem:[%s9617_s13 + $0x10] sm:$0xf] }
0x1bd1   :  { %7576 = vpow2.f32 %v3726_v47  ;;  %v3728_v19 = vmul.f32 1.442695, %v3720_v17 }
0x1bd3   :  { %v7573_v22 = vpop.eup %7572  ;;  %7578 = vpow2.f32 %v3728_v19 }
0x1bd4   :  { %v3716_v46 = vpop.xlane.xlu0 %3715  ;;  %v3732_v60 = vsel %vm628_vm6, %v7573_v22, 0.0 }
0x1bd5   :  { %v7575_v48 = vpop.eup %7574  ;;  %v3721_v10 = vsub.f32 %v3697_v3, %v3716_v46  ;;  %3733 = vadd.xlane.f32.xlu1 %v3732_v60  ;;  %v3914_v3 = vsel %vm1230_vm8, %v5939_v41, 0 }
0x1bd6   :  { %v3735_v24 = vsel %vm628_vm6, %v7575_v48, 0.0 }
0x1bd7   :  { %v3730_v31 = vmul.f32 1.442695, %v3721_v10  ;;  %3736 = vadd.xlane.f32.xlu0 %v3735_v24 }
0x1bd9   :  { %7580 = vpow2.f32 %v3730_v31 }
0x1bdb   :  { %v7577_v28 = vpop.eup %7576 }
0x1bdc   :  { %v3738_v8 = vsel %vm628_vm6, %v7577_v28, 0.0 }
0x1bdd   :  { %v7579_v39 = vpop.eup %7578  ;;  %3739 = vadd.xlane.f32.xlu1 %v3738_v8  ;;  %v7414_v8 = vld [vmem:[%s9661_s7 + $0x60] sm:$0xff]  }
0x1bde   :  { %v3741_v40 = vsel %vm628_vm6, %v7579_v39, 0.0 }
0x1bdf   :  { %3742 = vadd.xlane.f32.xlu0 %v3741_v40  ;;  %v7415_v40 = vld [vmem:[%s9661_s7 + $0x68] sm:$0xff]  }
0x1be3   :  { %v7581_v42 = vpop.eup %7580 }
0x1be4   :  { %v3744_v4 = vsel %vm641_vm7, %v7581_v42, 0.0 }
0x1be5   :  { %3745 = vadd.xlane.f32.xlu1 %v3744_v4 }
0x1c62   :  { %v3734_v30 = vpop.xlane.xlu1 %3733 }
0x1c63   :  { %7582 = vrcp.f32 %v3734_v30 }
0x1c64   :  { %v3737_v5 = vpop.xlane.xlu0 %3736 }
0x1c65   :  { %7584 = vrcp.f32 %v3737_v5 }
0x1c6a   :  { %v3740_v36 = vpop.xlane.xlu1 %3739 }
0x1c6b   :  { %7586 = vrcp.f32 %v3740_v36 }
0x1c6c   :  { %v3743_v33 = vpop.xlane.xlu0 %3742 }
0x1c6d   :  { %v7583_v35 = vpop.eup %7582  ;;  %7588 = vrcp.f32 %v3743_v33 }
0x1c6e   :  { %v3752_v50 = vmul.f32 %v7583_v35, %v7573_v22  ;;  %v6002_v35 = vld [vmem:[%s9666_s2 + $0x6] ss:$0 sm:$0xff] }
0x1c6f   :  { %v7585_v23 = vpop.eup %7584 }
0x1c70   :  { %v3753_v9 = vmul.f32 %v7585_v23, %v7575_v48 }
0x1c72   :  { %v3757_v59 = vpack.c.bf16 %v3753_v9, %v3752_v50  ;;  %v3746_v16 = vpop.xlane.xlu1 %3745 }
0x1c73   :  { %7590 = vrcp.f32 %v3746_v16 }
0x1c74   :  { %7033 = vmatmul.mubr.msk.bf16.vlgmr.msra.gmra.mrb[212].mxu0 %vm628_vm6, %v3757_v59 }
0x1c75   :  { %v7587_v63 = vpop.eup %7586  ;;  %7036 = vmatprep.mubr.msk.bf16.mxu0 %vm7702_vm0, %v7701_v1  ;;  %7059 = vmatpush3.bf16.msra.mxu0 %v3914_v3 }
0x1c76   :  { %7088 = vmatprep.subr.bf16.mxu0 %v7701_v1  ;;  %v3754_v58 = vmul.f32 %v7587_v63, %v7577_v28 }
0x1c77   :  { %v7589_v27 = vpop.eup %7588 }
0x1c78   :  { %v3755_v34 = vmul.f32 %v7589_v27, %v7579_v39 }
0x1c7a   :  { %v3758_v53 = vpack.c.bf16 %v3755_v34, %v3754_v58 }
0x1c7c   :  { %7037 = vmatmul.mubr.msk.bf16.gmra.mrb[216].mxu0 %vm628_vm6, %v3758_v53 }
0x1c7d   :  { %v7591_v14 = vpop.eup %7590  ;;  %7040 = vmatprep.mubr.msk.bf16.mxu0 %vm7702_vm0, %v7701_v1 }
0x1c7e   :  { %v3756_v61 = vmul.f32 %v7591_v14, %v7581_v42 }
0x1c80   :  { %v3759_v52 = vpack.c.bf16 %v3756_v61, %v3756_v61 }
0x1c84   :  { %7041 = vmatmul.mubr.msk.bf16.gmra.mrb[220].mxu0 %vm628_vm6, %v3759_v52 }
0x1c85   :  { %7060 = vmatprep.mubr.msk.bf16.mxu0 %vm7702_vm0, %v7701_v1 }
0x1c8c   :  { %7061 = vmatmul.mubr.msk.bf16.vlgmr.msra.gmra.mrb[224].mxu0 %vm553_vm5, %v3374_v38 }
0x1c8d   :  { %7064 = vmatprep.mubr.msk.bf16.mxu0 %vm7702_vm0, %v7701_v1  ;;  %7089 = vmatpush3.bf16.msra.mxu0 %v7410_v13 }
0x1c8e   :  { %7090 = vmatprep.subr.bf16.mxu0 %v7701_v1 }
0x1c91   :  { %7091 = vmatpush3.bf16.msra.mxu0 %v7411_v7 }
0x1c92   :  { %7120 = vmatprep.subr.bf16.mxu0 %v7701_v1 }
0x1c94   :  { %7065 = vmatmul.mubr.msk.bf16.gmra.mrb[228].mxu0 %vm553_vm5, %v3375_v26 }
0x1c95   :  { %7068 = vmatprep.mubr.msk.bf16.mxu0 %vm7702_vm0, %v7701_v1 }
0x1c9c   :  { %7069 = vmatmul.mubr.msk.bf16.gmra.mrb[232].mxu0 %vm553_vm5, %v3376_v62 }
0x1c9d   :  { %7092 = vmatprep.mubr.msk.bf16.mxu0 %vm7702_vm0, %v7701_v1 }
0x1ca4   :  { %7093 = vmatmul.mubr.msk.bf16.vlgmr.msra.gmra.mrb[236].mxu0 %vm208_vm2, %v8763_v11 }
0x1ca5   :  { %7096 = vmatprep.mubr.msk.bf16.mxu0 %vm7702_vm0, %v7701_v1 }
0x1cac   :  { %7097 = vmatmul.mubr.msk.bf16.gmra.mrb[240].mxu0 %vm208_vm2, %v8780_v2 }
0x1cad   :  { %7100 = vmatprep.mubr.msk.bf16.mxu0 %vm7702_vm0, %v7701_v1 }
0x1cb4   :  { %7101 = vmatmul.mubr.msk.bf16.gmra.mrb[244].mxu0 %vm208_vm2, %v8792_v18 }
0x1cb5   :  { %7126 = vmatprep.mubr.msk.bf16.mxu0 %vm7702_vm0, %v7701_v1 }
0x1d47   :  { %v3809_v20 = vpop.f32.mrb[212].mxu0 }
0x1d48   :  { %v7034_v38 = vpop.f32.mrb[213].mxu0 }
0x1d49   :  { %v3812_v0 = vpop.f32.mrb[214].mxu0 }
0x1d4a   :  { %v3831_v26 = vpack.c.bf16 %v3812_v0, %v3809_v20  ;;  %v7035_v51 = vpop.f32.mrb[215].mxu0 }
0x1d4c   :  { %7047 = vmatmul.mubr.msk.bf16.vlgmr.msra.gmra.mrb[220].mxu1 %vm553_vm5, %v3831_v26 }
0x1d4d   :  { %7050 = vmatprep.mubr.msk.bf16.mxu1 %vm7702_vm0, %v7701_v1  ;;  %7073 = vmatpush3.bf16.msra.mxu1 %v7412_v32 }
0x1d4e   :  { %7074 = vmatprep.subr.bf16.mxu1 %v7701_v1 }
0x1d4f   :  { %v3817_v15 = vpop.f32.mrb[216].mxu0 }
0x1d50   :  { %v7038_v12 = vpop.f32.mrb[217].mxu0 }
0x1d51   :  { %v3820_v47 = vpop.f32.mrb[218].mxu0  ;;  %7075 = vmatpush3.bf16.msra.mxu1 %v7413_v49 }
0x1d52   :  { %v3832_v17 = vpack.c.bf16 %v3820_v47, %v3817_v15  ;;  %v7039_v19 = vpop.f32.mrb[219].mxu0  ;;  %7104 = vmatprep.subr.bf16.mxu1 %v7701_v1 }
0x1d54   :  { %7051 = vmatmul.mubr.msk.bf16.gmra.mrb[224].mxu1 %vm553_vm5, %v3832_v17 }
0x1d55   :  { %7054 = vmatprep.mubr.msk.bf16.mxu1 %vm7702_vm0, %v7701_v1 }
0x1d57   :  { %v3825_v22 = vpop.f32.mrb[220].mxu0 }
0x1d58   :  { %v7042_v46 = vpop.f32.mrb[221].mxu0  ;;  %v3833_v48 = vpack.c.bf16 %v3825_v22, %v3825_v22 }
0x1d59   :  { %v3828_v60 = vpop.f32.mrb[222].mxu0 }
0x1d5a   :  { %v7043_v10 = vpop.f32.mrb[223].mxu0 }
0x1d5c   :  { %7055 = vmatmul.mubr.msk.bf16.gmra.mrb[228].mxu1 %vm553_vm5, %v3833_v48 }
0x1d5d   :  { %7076 = vmatprep.mubr.msk.bf16.mxu1 %vm7702_vm0, %v7701_v1 }
0x1d5f   :  { %v3950_v24 = vpop.f32.mrb[224].mxu0 }
0x1d60   :  { %v7062_v31 = vpop.f32.mrb[225].mxu0 }
0x1d61   :  { %v3953_v28 = vpop.f32.mrb[226].mxu0 }
0x1d62   :  { %v7063_v39 = vpop.f32.mrb[227].mxu0 }
0x1d64   :  { %7077 = vmatmul.mubr.msk.bf16.vlgmr.msra.gmra.mrb[232].mxu1 %vm208_vm2, %v8763_v11 }
0x1d65   :  { %7080 = vmatprep.mubr.msk.bf16.mxu1 %vm7702_vm0, %v7701_v1  ;;  %7105 = vmatpush3.bf16.msra.mxu1 %v7414_v8 }
0x1d66   :  { %7106 = vmatprep.subr.bf16.mxu1 %v7701_v1 }
0x1d67   :  { %v3958_v42 = vpop.f32.mrb[228].mxu0 }
0x1d68   :  { %v7066_v4 = vpop.f32.mrb[229].mxu0 }
0x1d69   :  { %v3961_v45 = vpop.f32.mrb[230].mxu0  ;;  %7107 = vmatpush3.bf16.msra.mxu1 %v7415_v40 }
0x1d6a   :  { %v7067_v29 = vpop.f32.mrb[231].mxu0  ;;  %7138 = vmatprep.subr.bf16.mxu1 %v7701_v1 }
0x1d6c   :  { %7081 = vmatmul.mubr.msk.bf16.gmra.mrb[236].mxu1 %vm208_vm2, %v8780_v2 }
0x1d6d   :  { %7084 = vmatprep.mubr.msk.bf16.mxu1 %vm7702_vm0, %v7701_v1 }
0x1d6f   :  { %v3966_v30 = vpop.f32.mrb[232].mxu0 }
0x1d70   :  { %v7070_v5 = vpop.f32.mrb[233].mxu0 }
0x1d71   :  { %v3969_v36 = vpop.f32.mrb[234].mxu0 }
0x1d72   :  { %v7071_v33 = vpop.f32.mrb[235].mxu0 }
0x1d74   :  { %7085 = vmatmul.mubr.msk.bf16.gmra.mrb[240].mxu1 %vm208_vm2, %v8792_v18 }
0x1d75   :  { %7108 = vmatprep.mubr.msk.bf16.mxu1 %vm7702_vm0, %v7701_v1 }
0x1d77   :  { %v4112_v23 = vpop.f32.mrb[236].mxu0 }
0x1d78   :  { %v7094_v41 = vpop.f32.mrb[237].mxu0  ;;  %v4113_v9 = vadd.f32 %v6002_v35, %v4112_v23 }
0x1d79   :  { %v4115_v50 = vpop.f32.mrb[238].mxu0 }
0x1d7a   :  { %v4116_v59 = vadd.f32 %v6002_v35, %v4115_v50  ;;  %v7095_v16 = vpop.f32.mrb[239].mxu0 }
0x1d7c   :  { %v4218_v3 = vpack.c.bf16 %v4116_v59, %v4113_v9  ;;  %7109 = vmatmul.mubr.msk.bf16.vlgmr.msra.gmra.mrb[244].mxu1 %vm208_vm2, %v8763_v11 }
0x1d7d   :  { %7112 = vmatprep.mubr.msk.bf16.mxu1 %vm7702_vm0, %v7701_v1 }
0x1d7e   :  { %v4231_v63 = vsel %vm553_vm5, %v4218_v3, 0 }
0x1d7f   :  { %v4120_v27 = vpop.f32.mrb[240].mxu0  ;;  %7121 = vmatpush3.bf16.xpose.msra.mxu0 %v4231_v63 }
0x1d80   :  { %v7098_v58 = vpop.f32.mrb[241].mxu0  ;;  %7122 = vmatprep.subr.bf16.mxu0 %v7701_v1  ;;  %v4121_v53 = vadd.f32 %v6002_v35, %v4120_v27 }
0x1d81   :  { %v4123_v34 = vpop.f32.mrb[242].mxu0 }
0x1d82   :  { %v4124_v14 = vadd.f32 %v6002_v35, %v4123_v34  ;;  %v7099_v61 = vpop.f32.mrb[243].mxu0 }
0x1d84   :  { %v4219_v52 = vpack.c.bf16 %v4124_v14, %v4121_v53  ;;  %7113 = vmatmul.mubr.msk.bf16.gmra.mrb[248].mxu1 %vm208_vm2, %v8780_v2  ;;  %v6013_v53 = vld [vmem:[%s9616_s12 + $0x6] ss:$0 sm:$0xff] }
0x1d85   :  { %7116 = vmatprep.mubr.msk.bf16.mxu1 %vm7702_vm0, %v7701_v1 }
0x1d86   :  { %v4234_v13 = vsel %vm553_vm5, %v4219_v52, 0 }
0x1d87   :  { %v4128_v7 = vpop.f32.mrb[244].mxu0  ;;  %7123 = vmatpush3.bf16.xpose.msra.mxu0 %v4234_v13 }
0x1d88   :  { %v4129_v62 = vadd.f32 %v6002_v35, %v4128_v7  ;;  %v7102_v20 = vpop.f32.mrb[245].mxu0  ;;  %7124 = vmatprep.subr.bf16.mxu0 %v7701_v1 }
0x1d89   :  { %v4131_v38 = vpop.f32.mrb[246].mxu0 }
0x1d8a   :  { %v4220_v0 = vpack.c.bf16 %v4129_v62, %v4129_v62  ;;  %v7103_v32 = vpop.f32.mrb[247].mxu0 }
0x1d8c   :  { %7117 = vmatmul.mubr.msk.bf16.gmra.mrb[252].mxu1 %vm208_vm2, %v8792_v18  ;;  %v4237_v26 = vsel %vm553_vm5, %v4220_v0, 0 }
0x1d8d   :  { %7144 = vmatprep.mubr.msk.bf16.mxu1 %vm7702_vm0, %v7701_v1 }
0x1d8f   :  { %7125 = vmatpush3.bf16.xpose.msra.mxu0 %v4237_v26 }
0x1d90   :  { %7156 = vmatprep.subr.bf16.mxu0 %v7701_v1 }
0x1e1f   :  { %v3882_v51 = vpop.f32.mrb[220].mxu1 }
0x1e20   :  { %v9186_v49 = vadd.f32 %v3950_v24, %v3882_v51  ;;  %v7048_v15 = vpop.f32.mrb[221].mxu1 }
0x1e21   :  { %v3885_v12 = vpop.f32.mrb[222].mxu1 }
0x1e22   :  { %v9188_v47 = vadd.f32 %v3953_v28, %v3885_v12  ;;  %v7049_v17 = vpop.f32.mrb[223].mxu1  ;;  %v5991_v28 = vld [vmem:[%s9665_s5 + $0x6] ss:$0 sm:$0xff] }
0x1e27   :  { %v3890_v19 = vpop.f32.mrb[224].mxu1 }
0x1e28   :  { %v9190_v22 = vadd.f32 %v3958_v42, %v3890_v19  ;;  %v7052_v46 = vpop.f32.mrb[225].mxu1 }
0x1e29   :  { %v3893_v60 = vpop.f32.mrb[226].mxu1 }
0x1e2a   :  { %v9192_v48 = vadd.f32 %v3961_v45, %v3893_v60  ;;  %v7053_v10 = vpop.f32.mrb[227].mxu1 }
0x1e2f   :  { %v3898_v31 = vpop.f32.mrb[228].mxu1 }
0x1e30   :  { %v9194_v8 = vadd.f32 %v3966_v30, %v3898_v31  ;;  %v7056_v39 = vpop.f32.mrb[229].mxu1 }
0x1e31   :  { %v3901_v40 = vpop.f32.mrb[230].mxu1 }
0x1e32   :  { %v7057_v24 = vpop.f32.mrb[231].mxu1 }
0x1e37   :  { %v4031_v4 = vpop.f32.mrb[232].mxu1 }
0x1e38   :  { %v7078_v29 = vpop.f32.mrb[233].mxu1  ;;  %v4032_v42 = vadd.f32 %v5991_v28, %v4031_v4 }
0x1e39   :  { %v4034_v5 = vpop.f32.mrb[234].mxu1 }
0x1e3a   :  { %v4035_v36 = vadd.f32 %v5991_v28, %v4034_v5  ;;  %v7079_v33 = vpop.f32.mrb[235].mxu1 }
0x1e3c   :  { %v4215_v35 = vpack.c.bf16 %v4035_v36, %v4032_v42 }
0x1e3e   :  { %7127 = vmatmul.mubr.msk.bf16.vlgmr.msra.gmra.mrb[248].mxu0 %vm553_vm5, %v4215_v35 }
0x1e3f   :  { %v4039_v45 = vpop.f32.mrb[236].mxu1  ;;  %7130 = vmatprep.mubr.msk.bf16.mxu0 %vm7702_vm0, %v7701_v1 }
0x1e40   :  { %v7082_v30 = vpop.f32.mrb[237].mxu1  ;;  %v4040_v41 = vadd.f32 %v5991_v28, %v4039_v45 }
0x1e41   :  { %v4042_v23 = vpop.f32.mrb[238].mxu1 }
0x1e42   :  { %v4043_v50 = vadd.f32 %v5991_v28, %v4042_v23  ;;  %v7083_v9 = vpop.f32.mrb[239].mxu1 }
0x1e44   :  { %v4216_v59 = vpack.c.bf16 %v4043_v50, %v4040_v41 }
0x1e46   :  { %7131 = vmatmul.mubr.msk.bf16.gmra.mrb[252].mxu0 %vm553_vm5, %v4216_v59 }
0x1e47   :  { %v4047_v16 = vpop.f32.mrb[240].mxu1  ;;  %7134 = vmatprep.mubr.msk.bf16.mxu0 %vm7702_vm0, %v7701_v1 }
0x1e48   :  { %v4048_v3 = vadd.f32 %v5991_v28, %v4047_v16  ;;  %v7086_v63 = vpop.f32.mrb[241].mxu1 }
0x1e49   :  { %v4050_v27 = vpop.f32.mrb[242].mxu1 }
0x1e4a   :  { %v7087_v58 = vpop.f32.mrb[243].mxu1  ;;  %v4217_v34 = vpack.c.bf16 %v4048_v3, %v4048_v3 }
0x1e4e   :  { %7135 = vmatmul.mubr.msk.bf16.gmra.mrb[0].mxu0 %vm553_vm5, %v4217_v34 }
0x1e4f   :  { %v4193_v14 = vpop.f32.mrb[244].mxu1  ;;  %7158 = vmatprep.mubr.msk.bf16.mxu0 %vm7702_vm0, %v7701_v1 }
0x1e50   :  { %v7110_v61 = vpop.f32.mrb[245].mxu1  ;;  %v4194_v13 = vadd.f32 %v6013_v53, %v4193_v14 }
0x1e51   :  { %v4196_v52 = vpop.f32.mrb[246].mxu1 }
0x1e52   :  { %v4197_v7 = vadd.f32 %v6013_v53, %v4196_v52  ;;  %v7111_v62 = vpop.f32.mrb[247].mxu1 }
0x1e54   :  { %v4353_v20 = vpack.c.bf16 %v4197_v7, %v4194_v13 }
0x1e56   :  { %7139 = vmatpush3.bf16.msra.mxu1 %v4353_v20 }
0x1e57   :  { %v4201_v38 = vpop.f32.mrb[248].mxu1  ;;  %7140 = vmatprep.subr.bf16.mxu1 %v7701_v1 }
0x1e58   :  { %v7114_v0 = vpop.f32.mrb[249].mxu1  ;;  %v4202_v26 = vadd.f32 %v6013_v53, %v4201_v38 }
0x1e59   :  { %v4204_v32 = vpop.f32.mrb[250].mxu1 }
0x1e5a   :  { %v4205_v51 = vadd.f32 %v6013_v53, %v4204_v32  ;;  %v7115_v15 = vpop.f32.mrb[251].mxu1 }
0x1e5c   :  { %v4354_v12 = vpack.c.bf16 %v4205_v51, %v4202_v26 }
0x1e5e   :  { %7141 = vmatpush3.bf16.msra.mxu1 %v4354_v12 }
0x1e5f   :  { %v4209_v17 = vpop.f32.mrb[252].mxu1  ;;  %7142 = vmatprep.subr.bf16.mxu1 %v7701_v1 }
0x1e60   :  { %v4210_v19 = vadd.f32 %v6013_v53, %v4209_v17  ;;  %v7118_v46 = vpop.f32.mrb[253].mxu1 }
0x1e61   :  { %v4212_v60 = vpop.f32.mrb[254].mxu1 }
0x1e62   :  { %v4355_v10 = vpack.c.bf16 %v4210_v19, %v4210_v19  ;;  %v7119_v31 = vpop.f32.mrb[255].mxu1 }
0x1e64   :  { %v4366_v39 = vsel %vm700_vm4, %v4355_v10, 0  ;;  %v6025_v10 = vld [vmem:[%s9617_s13 + $0x18] sm:$0xf] }
0x1e65   :  { %7143 = vmatpush3.bf16.msra.mxu1 %v4366_v39  ;;  %v4439_v31 = vsel %vm1230_vm8, %v6025_v10, 0 }
0x1e66   :  { %7170 = vmatprep.subr.bf16.mxu1 %v7701_v1  ;;  %7157 = vmatpush3.bf16.msra.mxu0 %v4439_v31 }
0x1e67   :  { %7186 = vmatprep.subr.bf16.mxu0 %v7701_v1 }
0x1f11   :  { %v4273_v40 = vpop.f32.mrb[248].mxu0 }
0x1f12   :  { %v4274_v24 = vadd.f32 %v8901_v57, %v4273_v40  ;;  %v7128_v28 = vpop.f32.mrb[249].mxu0 }
0x1f13   :  { %v4276_v4 = vpop.f32.mrb[250].mxu0 }
0x1f14   :  { %v4277_v29 = vadd.f32 %v8909_v43, %v4276_v4  ;;  %v7129_v5 = vpop.f32.mrb[251].mxu0  ;;  %v4295_v42 = vsel %vm628_vm6, %v4274_v24, -inf }
0x1f15   :  { %4296 = vmax.xlane.f32.xlu0 %v4295_v42 }
0x1f16   :  { %v4298_v36 = vsel %vm628_vm6, %v4277_v29, -inf }
0x1f17   :  { %4299 = vmax.xlane.f32.xlu1 %v4298_v36  ;;  %v7416_v36 = vld [vmem:[%s9660_s11 + $0x70] sm:$0xff]  }
0x1f19   :  { %v4281_v33 = vpop.f32.mrb[252].mxu0 }
0x1f1a   :  { %v4282_v35 = vadd.f32 %v8921_v44, %v4281_v33  ;;  %v7132_v45 = vpop.f32.mrb[253].mxu0 }
0x1f1b   :  { %v4284_v30 = vpop.f32.mrb[254].mxu0 }
0x1f1c   :  { %v4285_v23 = vadd.f32 %v8929_v6, %v4284_v30  ;;  %v7133_v41 = vpop.f32.mrb[255].mxu0  ;;  %v4301_v57 = vsel %vm628_vm6, %v4282_v35, -inf  ;;  %v7417_v30 = vld [vmem:[%s9660_s11 + $0x78] sm:$0xff]  }
0x1f1d   :  { %4302 = vmax.xlane.f32.xlu0 %v4301_v57 }
0x1f1e   :  { %v4304_v43 = vsel %vm628_vm6, %v4285_v23, -inf }
0x1f1f   :  { %4305 = vmax.xlane.f32.xlu1 %v4304_v43 }
0x1f21   :  { %v4289_v50 = vpop.f32.mrb[0].mxu0 }
0x1f22   :  { %v4290_v9 = vadd.f32 %v8941_v55, %v4289_v50  ;;  %v7136_v59 = vpop.f32.mrb[1].mxu0 }
0x1f23   :  { %v4292_v16 = vpop.f32.mrb[2].mxu0 }
0x1f24   :  { %v7137_v3 = vpop.f32.mrb[3].mxu0  ;;  %v4307_v63 = vsel %vm641_vm7, %v4290_v9, -inf  ;;  %v7418_v16 = vld [vmem:[%s9661_s7 + $0x70] sm:$0xff]  }
0x1f25   :  { %4308 = vmax.xlane.f32.xlu0 %v4307_v63  ;;  %v7419_v3 = vld [vmem:[%s9661_s7 + $0x78] sm:$0xff]  }
0x1fa2   :  { %v4297_v44 = vpop.xlane.xlu0 %4296 }
0x1fa3   :  { %v4310_v27 = vsub.f32 %v4274_v24, %v4297_v44 }
0x1fa4   :  { %v4300_v58 = vpop.xlane.xlu1 %4299 }
0x1fa5   :  { %v4315_v6 = vmul.f32 1.442695, %v4310_v27  ;;  %v4311_v34 = vsub.f32 %v4277_v29, %v4300_v58  ;;  %v7420_v58 = vld [vmem:[%s9664_s3 + $0x70] sm:$0xff]  }
0x1fa7   :  { %7592 = vpow2.f32 %v4315_v6  ;;  %v4317_v53 = vmul.f32 1.442695, %v4311_v34 }
0x1fa9   :  { %7594 = vpow2.f32 %v4317_v53  ;;  %v7421_v53 = vld [vmem:[%s9664_s3 + $0x78] sm:$0xff]  }
0x1faa   :  { %v4303_v14 = vpop.xlane.xlu0 %4302 }
0x1fab   :  { %v4312_v61 = vsub.f32 %v4282_v35, %v4303_v14 }
0x1fac   :  { %v4306_v52 = vpop.xlane.xlu1 %4305 }
0x1fad   :  { %v4319_v13 = vmul.f32 1.442695, %v4312_v61  ;;  %v4313_v7 = vsub.f32 %v4285_v23, %v4306_v52 }
0x1faf   :  { %7596 = vpow2.f32 %v4319_v13  ;;  %v4321_v55 = vmul.f32 1.442695, %v4313_v7 }
0x1fb1   :  { %v7593_v62 = vpop.eup %7592  ;;  %7598 = vpow2.f32 %v4321_v55 }
0x1fb2   :  { %v4309_v20 = vpop.xlane.xlu0 %4308  ;;  %v4325_v38 = vsel %vm628_vm6, %v7593_v62, 0.0 }
0x1fb3   :  { %v7595_v0 = vpop.eup %7594  ;;  %v4314_v32 = vsub.f32 %v4290_v9, %v4309_v20  ;;  %4326 = vadd.xlane.f32.xlu1 %v4325_v38 }
0x1fb4   :  { %v4328_v26 = vsel %vm628_vm6, %v7595_v0, 0.0 }
0x1fb5   :  { %v4323_v51 = vmul.f32 1.442695, %v4314_v32  ;;  %4329 = vadd.xlane.f32.xlu0 %v4328_v26  ;;  %v9304_v32 = vld [vmem:[%s9665_s5 + $0x7] ss:$0 sm:$0xff] }
0x1fb7   :  { %7600 = vpow2.f32 %v4323_v51 }
0x1fb9   :  { %v7597_v15 = vpop.eup %7596 }
0x1fba   :  { %v4331_v12 = vsel %vm628_vm6, %v7597_v15, 0.0 }
0x1fbb   :  { %v7599_v17 = vpop.eup %7598  ;;  %4332 = vadd.xlane.f32.xlu1 %v4331_v12 }
0x1fbc   :  { %v4334_v19 = vsel %vm628_vm6, %v7599_v17, 0.0 }
0x1fbd   :  { %4335 = vadd.xlane.f32.xlu0 %v4334_v19 }
0x1fc1   :  { %v7601_v46 = vpop.eup %7600 }
0x1fc2   :  { %v4337_v60 = vsel %vm641_vm7, %v7601_v46, 0.0 }
0x1fc3   :  { %4338 = vadd.xlane.f32.xlu1 %v4337_v60 }
0x2040   :  { %v4327_v39 = vpop.xlane.xlu1 %4326 }
0x2041   :  { %7602 = vrcp.f32 %v4327_v39 }
0x2042   :  { %v4330_v40 = vpop.xlane.xlu0 %4329 }
0x2043   :  { %7604 = vrcp.f32 %v4330_v40 }
0x2048   :  { %v4333_v24 = vpop.xlane.xlu1 %4332 }
0x2049   :  { %7606 = vrcp.f32 %v4333_v24 }
0x204a   :  { %v4336_v28 = vpop.xlane.xlu0 %4335 }
0x204b   :  { %v7603_v4 = vpop.eup %7602  ;;  %7608 = vrcp.f32 %v4336_v28 }
0x204c   :  { %v4345_v5 = vmul.f32 %v7603_v4, %v7593_v62 }
0x204d   :  { %v7605_v29 = vpop.eup %7604 }
0x204e   :  { %v4346_v42 = vmul.f32 %v7605_v29, %v7595_v0 }
0x2050   :  { %v4350_v33 = vpack.c.bf16 %v4346_v42, %v4345_v5  ;;  %v4339_v35 = vpop.xlane.xlu1 %4338  ;;  %v6056_v42 = vld [vmem:[%s9616_s12 + $0x7] ss:$0 sm:$0xff] }
0x2051   :  { %7610 = vrcp.f32 %v4339_v35 }
0x2052   :  { %7145 = vmatmul.mubr.msk.bf16.vlgmr.msra.gmra.mrb[0].mxu1 %vm628_vm6, %v4350_v33 }
0x2053   :  { %v7607_v45 = vpop.eup %7606  ;;  %7148 = vmatprep.mubr.msk.bf16.mxu1 %vm7702_vm0, %v7701_v1  ;;  %7171 = vmatpush3.bf16.msra.mxu1 %v7416_v36 }
0x2054   :  { %7172 = vmatprep.subr.bf16.mxu1 %v7701_v1  ;;  %v4347_v41 = vmul.f32 %v7607_v45, %v7597_v15 }
0x2055   :  { %v7609_v23 = vpop.eup %7608 }
0x2056   :  { %v4348_v57 = vmul.f32 %v7609_v23, %v7599_v17 }
0x2057   :  { %7173 = vmatpush3.bf16.msra.mxu1 %v7417_v30 }
0x2058   :  { %v4351_v43 = vpack.c.bf16 %v4348_v57, %v4347_v41  ;;  %7202 = vmatprep.subr.bf16.mxu1 %v7701_v1 }
0x205a   :  { %7149 = vmatmul.mubr.msk.bf16.gmra.mrb[4].mxu1 %vm628_vm6, %v4351_v43 }
0x205b   :  { %v7611_v50 = vpop.eup %7610  ;;  %7152 = vmatprep.mubr.msk.bf16.mxu1 %vm7702_vm0, %v7701_v1 }
0x205c   :  { %v4349_v9 = vmul.f32 %v7611_v50, %v7601_v46 }
0x205e   :  { %v4352_v59 = vpack.c.bf16 %v4349_v9, %v4349_v9 }
0x2062   :  { %7153 = vmatmul.mubr.msk.bf16.gmra.mrb[8].mxu1 %vm628_vm6, %v4352_v59 }
0x2063   :  { %7174 = vmatprep.mubr.msk.bf16.mxu1 %vm7702_vm0, %v7701_v1 }
0x206a   :  { %7175 = vmatmul.mubr.msk.bf16.vlgmr.msra.gmra.mrb[12].mxu1 %vm208_vm2, %v8763_v11 }
0x206b   :  { %7178 = vmatprep.mubr.msk.bf16.mxu1 %vm7702_vm0, %v7701_v1  ;;  %7203 = vmatpush3.bf16.msra.mxu1 %v7418_v16 }
0x206c   :  { %7204 = vmatprep.subr.bf16.mxu1 %v7701_v1 }
0x206f   :  { %7205 = vmatpush3.bf16.msra.mxu1 %v7419_v3 }
0x2070   :  { %7236 = vmatprep.subr.bf16.mxu1 %v7701_v1 }
0x2072   :  { %7179 = vmatmul.mubr.msk.bf16.gmra.mrb[16].mxu1 %vm208_vm2, %v8780_v2 }
0x2073   :  { %7182 = vmatprep.mubr.msk.bf16.mxu1 %vm7702_vm0, %v7701_v1 }
0x207a   :  { %7183 = vmatmul.mubr.msk.bf16.gmra.mrb[20].mxu1 %vm208_vm2, %v8792_v18 }
0x207b   :  { %7206 = vmatprep.mubr.msk.bf16.mxu1 %vm7702_vm0, %v7701_v1 }
0x2082   :  { %7207 = vmatmul.mubr.msk.bf16.vlgmr.msra.gmra.mrb[24].mxu1 %vm208_vm2, %v8763_v11 }
0x2083   :  { %7210 = vmatprep.mubr.msk.bf16.mxu1 %vm7702_vm0, %v7701_v1 }
0x208a   :  { %7211 = vmatmul.mubr.msk.bf16.gmra.mrb[28].mxu1 %vm208_vm2, %v8780_v2 }
0x208b   :  { %7214 = vmatprep.mubr.msk.bf16.mxu1 %vm7702_vm0, %v7701_v1 }
0x2092   :  { %7215 = vmatmul.mubr.msk.bf16.gmra.mrb[32].mxu1 %vm208_vm2, %v8792_v18 }
0x2093   :  { %7242 = vmatprep.mubr.msk.bf16.mxu1 %vm7702_vm0, %v7701_v1 }
0x2125   :  { %v4402_v63 = vpop.f32.mrb[0].mxu1 }
0x2126   :  { %v7146_v44 = vpop.f32.mrb[1].mxu1 }
0x2127   :  { %v4405_v27 = vpop.f32.mrb[2].mxu1 }
0x2128   :  { %v4424_v6 = vpack.c.bf16 %v4405_v27, %v4402_v63  ;;  %v7147_v34 = vpop.f32.mrb[3].mxu1 }
0x212a   :  { %7159 = vmatmul.mubr.msk.bf16.vlgmr.msra.gmra.mrb[4].mxu0 %vm553_vm5, %v4424_v6 }
0x212b   :  { %7162 = vmatprep.mubr.msk.bf16.mxu0 %vm7702_vm0, %v7701_v1  ;;  %7187 = vmatpush3.bf16.msra.mxu0 %v7420_v58 }
0x212c   :  { %7188 = vmatprep.subr.bf16.mxu0 %v7701_v1 }
0x212d   :  { %v4410_v14 = vpop.f32.mrb[4].mxu1 }
0x212e   :  { %v7150_v61 = vpop.f32.mrb[5].mxu1 }
0x212f   :  { %v4413_v52 = vpop.f32.mrb[6].mxu1  ;;  %7189 = vmatpush3.bf16.msra.mxu0 %v7421_v53 }
0x2130   :  { %v4425_v13 = vpack.c.bf16 %v4413_v52, %v4410_v14  ;;  %v7151_v7 = vpop.f32.mrb[7].mxu1  ;;  %7218 = vmatprep.subr.bf16.mxu0 %v7701_v1 }
0x2132   :  { %7163 = vmatmul.mubr.msk.bf16.gmra.mrb[8].mxu0 %vm553_vm5, %v4425_v13 }
0x2133   :  { %7166 = vmatprep.mubr.msk.bf16.mxu0 %vm7702_vm0, %v7701_v1 }
0x2135   :  { %v4418_v55 = vpop.f32.mrb[8].mxu1 }
0x2136   :  { %v7154_v62 = vpop.f32.mrb[9].mxu1  ;;  %v4426_v38 = vpack.c.bf16 %v4418_v55, %v4418_v55 }
0x2137   :  { %v4421_v20 = vpop.f32.mrb[10].mxu1 }
0x2138   :  { %v7155_v0 = vpop.f32.mrb[11].mxu1 }
0x213a   :  { %7167 = vmatmul.mubr.msk.bf16.gmra.mrb[12].mxu0 %vm553_vm5, %v4426_v38 }
0x213b   :  { %7190 = vmatprep.mubr.msk.bf16.mxu0 %vm7702_vm0, %v7701_v1 }
0x213d   :  { %v4561_v26 = vpop.f32.mrb[12].mxu1 }
0x213e   :  { %v7176_v51 = vpop.f32.mrb[13].mxu1  ;;  %v9307_v12 = vadd.f32 %v9304_v32, %v4561_v26 }
0x213f   :  { %v4564_v15 = vpop.f32.mrb[14].mxu1 }
0x2140   :  { %v9310_v17 = vadd.f32 %v9304_v32, %v4564_v15  ;;  %v7177_v19 = vpop.f32.mrb[15].mxu1 }
0x2142   :  { %v4745_v46 = vpack.c.bf16 %v9310_v17, %v9307_v12  ;;  %7191 = vmatmul.mubr.msk.bf16.vlgmr.msra.gmra.mrb[16].mxu0 %vm208_vm2, %v8763_v11  ;;  %v7672_v17 = vld [vmem:[%s9667_s30] sm:$0xff] }
0x2143   :  { %7194 = vmatprep.mubr.msk.bf16.mxu0 %vm7702_vm0, %v7701_v1 }
0x2145   :  { %v4569_v60 = vpop.f32.mrb[16].mxu1 }
0x2146   :  { %v7180_v10 = vpop.f32.mrb[17].mxu1  ;;  %v9319_v39 = vadd.f32 %v9304_v32, %v4569_v60 }
0x2147   :  { %v4572_v31 = vpop.f32.mrb[18].mxu1 }
0x2148   :  { %v9322_v40 = vadd.f32 %v9304_v32, %v4572_v31  ;;  %v7181_v24 = vpop.f32.mrb[19].mxu1 }
0x214a   :  { %v4746_v28 = vpack.c.bf16 %v9322_v40, %v9319_v39  ;;  %7195 = vmatmul.mubr.msk.bf16.gmra.mrb[20].mxu0 %vm208_vm2, %v8780_v2 }
0x214b   :  { %7198 = vmatprep.mubr.msk.bf16.mxu0 %vm7702_vm0, %v7701_v1 }
0x214d   :  { %v9330_v11 = vpop.f32.mrb[20].mxu1 }
0x214e   :  { %v7184_v4 = vpop.f32.mrb[21].mxu1 }
0x214f   :  { %v4580_v29 = vpop.f32.mrb[22].mxu1 }
0x2150   :  { %v7185_v5 = vpop.f32.mrb[23].mxu1 }
0x2152   :  { %7199 = vmatmul.mubr.msk.bf16.gmra.mrb[24].mxu0 %vm208_vm2, %v8792_v18 }
0x2153   :  { %7224 = vmatprep.mubr.msk.bf16.mxu0 %vm7702_vm0, %v7701_v1 }
0x2155   :  { %v4723_v36 = vpop.f32.mrb[24].mxu1 }
0x2156   :  { %v7208_v2 = vpop.f32.mrb[25].mxu1  ;;  %v4724_v35 = vadd.f32 %v6056_v42, %v4723_v36 }
0x2157   :  { %v4726_v33 = vpop.f32.mrb[26].mxu1 }
0x2158   :  { %v4727_v45 = vadd.f32 %v6056_v42, %v4726_v33  ;;  %v7209_v30 = vpop.f32.mrb[27].mxu1 }
0x215a   :  { %v4883_v23 = vpack.c.bf16 %v4727_v45, %v4724_v35 }
0x215c   :  { %7237 = vmatpush3.bf16.msra.mxu1 %v4883_v23 }
0x215d   :  { %v4731_v41 = vpop.f32.mrb[28].mxu1  ;;  %7238 = vmatprep.subr.bf16.mxu1 %v7701_v1 }
0x215e   :  { %v7212_v57 = vpop.f32.mrb[29].mxu1  ;;  %v4732_v43 = vadd.f32 %v6056_v42, %v4731_v41 }
0x215f   :  { %v4734_v18 = vpop.f32.mrb[30].mxu1 }
0x2160   :  { %v4735_v50 = vadd.f32 %v6056_v42, %v4734_v18  ;;  %v7213_v9 = vpop.f32.mrb[31].mxu1 }
0x2161   :  { %v4578_v9 = vadd.f32 %v9304_v32, %v9330_v11 }
0x2162   :  { %v4884_v59 = vpack.c.bf16 %v4735_v50, %v4732_v43 }
0x2164   :  { %7239 = vmatpush3.bf16.msra.mxu1 %v4884_v59  ;;  %v4747_v59 = vpack.c.bf16 %v4578_v9, %v4578_v9 }
0x2165   :  { %v4739_v16 = vpop.f32.mrb[32].mxu1  ;;  %7240 = vmatprep.subr.bf16.mxu1 %v7701_v1 }
0x2166   :  { %v4740_v3 = vadd.f32 %v6056_v42, %v4739_v16  ;;  %v7216_v63 = vpop.f32.mrb[33].mxu1 }
0x2167   :  { %v4742_v44 = vpop.f32.mrb[34].mxu1 }
0x2168   :  { %v4885_v27 = vpack.c.bf16 %v4740_v3, %v4740_v3  ;;  %v7217_v58 = vpop.f32.mrb[35].mxu1  ;;  %v7674_v44 = vld [vmem:[%s9667_s30 + $0x10] sm:$0xff] }
0x216a   :  { %v4896_v6 = vsel %vm700_vm4, %v4885_v27, 0 }
0x216b   :  { %7241 = vmatpush3.bf16.msra.mxu1 %v4896_v6 }
0x216c   :  { %7268 = vmatprep.subr.bf16.mxu1 %v7701_v1 }
0x21fd   :  { %v4475_v34 = vpop.f32.mrb[4].mxu0 }
0x21fe   :  { %v9344_v53 = vadd.f32 %v4475_v34, %v9186_v49  ;;  %v7160_v14 = vpop.f32.mrb[5].mxu0  ;;  %v7675_v34 = vld [vmem:[%s9667_s30 + $0x18] sm:$0xff] }
0x21ff   :  { %v4478_v61 = vpop.f32.mrb[6].mxu0 }
0x2200   :  { %v9347_v52 = vadd.f32 %v4478_v61, %v9188_v47  ;;  %v7161_v13 = vpop.f32.mrb[7].mxu0  ;;  %v6045_v47 = vld [vmem:[%s9666_s2 + $0x7] ss:$0 sm:$0xff] }
0x2205   :  { %v4483_v7 = vpop.f32.mrb[8].mxu0 }
0x2206   :  { %v9350_v55 = vadd.f32 %v4483_v7, %v9190_v22  ;;  %v7164_v62 = vpop.f32.mrb[9].mxu0 }
0x2207   :  { %v4486_v20 = vpop.f32.mrb[10].mxu0 }
0x2208   :  { %v9353_v38 = vadd.f32 %v4486_v20, %v9192_v48  ;;  %v7165_v0 = vpop.f32.mrb[11].mxu0  ;;  %v7676_v20 = vld [vmem:[%s9667_s30 + $0x20] sm:$0x3] }
0x220d   :  { %v4491_v26 = vpop.f32.mrb[12].mxu0 }
0x220e   :  { %v9356_v49 = vadd.f32 %v4491_v26, %v9194_v8  ;;  %v7168_v51 = vpop.f32.mrb[13].mxu0 }
0x220f   :  { %v4494_v15 = vpop.f32.mrb[14].mxu0 }
0x2210   :  { %v7169_v19 = vpop.f32.mrb[15].mxu0 }
0x2215   :  { %v4642_v60 = vpop.f32.mrb[16].mxu0 }
0x2216   :  { %v7192_v22 = vpop.f32.mrb[17].mxu0  ;;  %v4643_v31 = vadd.f32 %v6045_v47, %v4642_v60 }
0x2217   :  { %v4645_v10 = vpop.f32.mrb[18].mxu0 }
0x2218   :  { %v4646_v24 = vadd.f32 %v6045_v47, %v4645_v10  ;;  %v7193_v4 = vpop.f32.mrb[19].mxu0 }
0x221a   :  { %v4748_v48 = vpack.c.bf16 %v4646_v24, %v4643_v31 }
0x221c   :  { %v4761_v29 = vsel %vm553_vm5, %v4748_v48, 0 }
0x221d   :  { %v4650_v5 = vpop.f32.mrb[20].mxu0  ;;  %7219 = vmatpush3.bf16.xpose.msra.mxu0 %v4761_v29 }
0x221e   :  { %v7196_v8 = vpop.f32.mrb[21].mxu0  ;;  %7220 = vmatprep.subr.bf16.mxu0 %v7701_v1  ;;  %v4651_v36 = vadd.f32 %v6045_v47, %v4650_v5 }
0x221f   :  { %v4653_v42 = vpop.f32.mrb[22].mxu0 }
0x2220   :  { %v4654_v2 = vadd.f32 %v6045_v47, %v4653_v42  ;;  %v7197_v33 = vpop.f32.mrb[23].mxu0 }
0x2222   :  { %v4749_v35 = vpack.c.bf16 %v4654_v2, %v4651_v36 }
0x2224   :  { %v4764_v45 = vsel %vm553_vm5, %v4749_v35, 0 }
0x2225   :  { %v4658_v30 = vpop.f32.mrb[24].mxu0  ;;  %7221 = vmatpush3.bf16.xpose.msra.mxu0 %v4764_v45 }
0x2226   :  { %v4659_v23 = vadd.f32 %v6045_v47, %v4658_v30  ;;  %v7200_v41 = vpop.f32.mrb[25].mxu0  ;;  %7222 = vmatprep.subr.bf16.mxu0 %v7701_v1 }
0x2227   :  { %v4661_v57 = vpop.f32.mrb[26].mxu0 }
0x2228   :  { %v4750_v18 = vpack.c.bf16 %v4659_v23, %v4659_v23  ;;  %v7201_v43 = vpop.f32.mrb[27].mxu0 }
0x222a   :  { %v4767_v50 = vsel %vm553_vm5, %v4750_v18, 0 }
0x222d   :  { %7223 = vmatpush3.bf16.xpose.msra.mxu0 %v4767_v50 }
0x222e   :  { %7254 = vmatprep.subr.bf16.mxu0 %v7701_v1 }
0x2234   :  { %7225 = vmatmul.mubr.msk.bf16.vlgmr.msra.gmra.mrb[28].mxu0 %vm553_vm5, %v4745_v46 }
0x2235   :  { %7228 = vmatprep.mubr.msk.bf16.mxu0 %vm7702_vm0, %v7701_v1 }
0x223c   :  { %7229 = vmatmul.mubr.msk.bf16.gmra.mrb[32].mxu0 %vm553_vm5, %v4746_v28  ;;  %v7673_v28 = vld [vmem:[%s9667_s30 + $0x8] sm:$0xff] }
0x223d   :  { %7232 = vmatprep.mubr.msk.bf16.mxu0 %vm7702_vm0, %v7701_v1 }
0x2244   :  { %7233 = vmatmul.mubr.msk.bf16.gmra.mrb[36].mxu0 %vm553_vm5, %v4747_v59  ;;  %v6068_v59 = vld [vmem:[%s9617_s13 + $0x1c] sm:$0xf] }
0x2245   :  { %7256 = vmatprep.mubr.msk.bf16.mxu0 %vm7702_vm0, %v7701_v1 }
0x2307   :  { %v4803_v12 = vpop.f32.mrb[28].mxu0 }
0x2308   :  { %v4804_v46 = vadd.f32 %v7672_v17, %v4803_v12  ;;  %v7226_v39 = vpop.f32.mrb[29].mxu0  ;;  %v4969_v12 = vsel %vm1230_vm8, %v6068_v59, 0 }
0x2309   :  { %v4806_v40 = vpop.f32.mrb[30].mxu0  ;;  %7255 = vmatpush3.bf16.msra.mxu0 %v4969_v12 }
0x230a   :  { %v4807_v16 = vadd.f32 %v7673_v28, %v4806_v40  ;;  %v7227_v32 = vpop.f32.mrb[31].mxu0  ;;  %v4825_v11 = vsel %vm628_vm6, %v4804_v46, -inf  ;;  %7284 = vmatprep.subr.bf16.mxu0 %v7701_v1 }
0x230b   :  { %4826 = vmax.xlane.f32.xlu0 %v4825_v11 }
0x230c   :  { %v4828_v3 = vsel %vm628_vm6, %v4807_v16, -inf }
0x230d   :  { %4829 = vmax.xlane.f32.xlu1 %v4828_v3 }
0x230f   :  { %v4811_v63 = vpop.f32.mrb[32].mxu0 }
0x2310   :  { %v4812_v27 = vadd.f32 %v7674_v44, %v4811_v63  ;;  %v7230_v58 = vpop.f32.mrb[33].mxu0 }
0x2311   :  { %v4814_v6 = vpop.f32.mrb[34].mxu0 }
0x2312   :  { %v4815_v14 = vadd.f32 %v7675_v34, %v4814_v6  ;;  %v7231_v61 = vpop.f32.mrb[35].mxu0  ;;  %v4831_v13 = vsel %vm628_vm6, %v4812_v27, -inf }
0x2313   :  { %4832 = vmax.xlane.f32.xlu0 %v4831_v13 }
0x2314   :  { %v4834_v7 = vsel %vm628_vm6, %v4815_v14, -inf }
0x2315   :  { %4835 = vmax.xlane.f32.xlu1 %v4834_v7 }
0x2317   :  { %v4819_v62 = vpop.f32.mrb[36].mxu0 }
0x2318   :  { %v4820_v0 = vadd.f32 %v7676_v20, %v4819_v62  ;;  %v7234_v26 = vpop.f32.mrb[37].mxu0 }
0x2319   :  { %v4822_v51 = vpop.f32.mrb[38].mxu0 }
0x231a   :  { %v7235_v15 = vpop.f32.mrb[39].mxu0  ;;  %v4837_v19 = vsel %vm641_vm7, %v4820_v0, -inf }
0x231b   :  { %4838 = vmax.xlane.f32.xlu0 %v4837_v19 }
0x2398   :  { %v4827_v47 = vpop.xlane.xlu0 %4826 }
0x2399   :  { %v4840_v60 = vsub.f32 %v4804_v46, %v4827_v47 }
0x239a   :  { %v4830_v22 = vpop.xlane.xlu1 %4829 }
0x239b   :  { %v4845_v10 = vmul.f32 1.442695, %v4840_v60  ;;  %v4841_v31 = vsub.f32 %v4807_v16, %v4830_v22 }
0x239d   :  { %7612 = vpow2.f32 %v4845_v10  ;;  %v4847_v24 = vmul.f32 1.442695, %v4841_v31 }
0x239f   :  { %7614 = vpow2.f32 %v4847_v24 }
0x23a0   :  { %v4833_v4 = vpop.xlane.xlu0 %4832 }
0x23a1   :  { %v4842_v48 = vsub.f32 %v4812_v27, %v4833_v4 }
0x23a2   :  { %v4836_v29 = vpop.xlane.xlu1 %4835 }
0x23a3   :  { %v4849_v5 = vmul.f32 1.442695, %v4842_v48  ;;  %v4843_v8 = vsub.f32 %v4815_v14, %v4836_v29  ;;  %v6073_v29 = vld [vmem:[%s9618_s14 + $0x1] ss:$0 sm:$0xff] }
0x23a5   :  { %7616 = vpow2.f32 %v4849_v5  ;;  %v4851_v42 = vmul.f32 1.442695, %v4843_v8 }
0x23a7   :  { %v7613_v36 = vpop.eup %7612  ;;  %7618 = vpow2.f32 %v4851_v42  ;;  %v6075_v42 = vld [vmem:[%s9619_s15 + $0x1] ss:$0 sm:$0xff] }
0x23a8   :  { %v4839_v2 = vpop.xlane.xlu0 %4838  ;;  %v4855_v33 = vsel %vm628_vm6, %v7613_v36, 0.0 }
0x23a9   :  { %v7615_v35 = vpop.eup %7614  ;;  %v4844_v45 = vsub.f32 %v4820_v0, %v4839_v2  ;;  %4856 = vadd.xlane.f32.xlu1 %v4855_v33 }
0x23aa   :  { %v4858_v30 = vsel %vm628_vm6, %v7615_v35, 0.0 }
0x23ab   :  { %v4853_v23 = vmul.f32 1.442695, %v4844_v45  ;;  %4859 = vadd.xlane.f32.xlu0 %v4858_v30 }
0x23ad   :  { %7620 = vpow2.f32 %v4853_v23 }
0x23af   :  { %v7617_v41 = vpop.eup %7616 }
0x23b0   :  { %v4861_v57 = vsel %vm628_vm6, %v7617_v41, 0.0 }
0x23b1   :  { %v7619_v18 = vpop.eup %7618  ;;  %4862 = vadd.xlane.f32.xlu1 %v4861_v57 }
0x23b2   :  { %v4864_v43 = vsel %vm628_vm6, %v7619_v18, 0.0 }
0x23b3   :  { %4865 = vadd.xlane.f32.xlu0 %v4864_v43 }
0x23b7   :  { %v7621_v50 = vpop.eup %7620 }
0x23b8   :  { %v4867_v9 = vsel %vm641_vm7, %v7621_v50, 0.0 }
0x23b9   :  { %4868 = vadd.xlane.f32.xlu1 %v4867_v9 }
0x2436   :  { %v4857_v17 = vpop.xlane.xlu1 %4856 }
0x2437   :  { %7622 = vrcp.f32 %v4857_v17 }
0x2438   :  { %v4860_v46 = vpop.xlane.xlu0 %4859 }
0x2439   :  { %7624 = vrcp.f32 %v4860_v46 }
0x243e   :  { %v4863_v39 = vpop.xlane.xlu1 %4862 }
0x243f   :  { %7626 = vrcp.f32 %v4863_v39 }
0x2440   :  { %v4866_v40 = vpop.xlane.xlu0 %4865 }
0x2441   :  { %v7623_v28 = vpop.eup %7622  ;;  %7628 = vrcp.f32 %v4866_v40 }
0x2442   :  { %v4875_v32 = vmul.f32 %v7623_v28, %v7613_v36 }
0x2443   :  { %v7625_v16 = vpop.eup %7624 }
0x2444   :  { %v4876_v11 = vmul.f32 %v7625_v16, %v7615_v35 }
0x2446   :  { %v4880_v3 = vpack.c.bf16 %v4876_v11, %v4875_v32  ;;  %v4869_v63 = vpop.xlane.xlu1 %4868 }
0x2447   :  { %7630 = vrcp.f32 %v4869_v63 }
0x2448   :  { %7243 = vmatmul.mubr.msk.bf16.vlgmr.msra.gmra.mrb[36].mxu1 %vm628_vm6, %v4880_v3 }
0x2449   :  { %v7627_v44 = vpop.eup %7626  ;;  %7246 = vmatprep.mubr.msk.bf16.mxu1 %vm7702_vm0, %v7701_v1 }
0x244a   :  { %v4877_v58 = vmul.f32 %v7627_v44, %v7617_v41 }
0x244b   :  { %v7629_v27 = vpop.eup %7628 }
0x244c   :  { %v4878_v6 = vmul.f32 %v7629_v27, %v7619_v18 }
0x244e   :  { %v4881_v34 = vpack.c.bf16 %v4878_v6, %v4877_v58 }
0x2450   :  { %7247 = vmatmul.mubr.msk.bf16.gmra.mrb[40].mxu1 %vm628_vm6, %v4881_v34 }
0x2451   :  { %v7631_v14 = vpop.eup %7630  ;;  %7250 = vmatprep.mubr.msk.bf16.mxu1 %vm7702_vm0, %v7701_v1 }
0x2452   :  { %v4879_v61 = vmul.f32 %v7631_v14, %v7621_v50 }
0x2454   :  { %v4882_v13 = vpack.c.bf16 %v4879_v61, %v4879_v61 }
0x2458   :  { %7251 = vmatmul.mubr.msk.bf16.gmra.mrb[44].mxu1 %vm628_vm6, %v4882_v13 }
0x2459   :  { %7272 = vmatprep.mubr.msk.bf16.mxu1 %vm7702_vm0, %v7701_v1 }
0x251b   :  { %v4932_v7 = vpop.f32.mrb[36].mxu1 }
0x251c   :  { %v7244_v62 = vpop.f32.mrb[37].mxu1 }
0x251d   :  { %v4935_v20 = vpop.f32.mrb[38].mxu1 }
0x251e   :  { %v4954_v0 = vpack.c.bf16 %v4935_v20, %v4932_v7  ;;  %v7245_v26 = vpop.f32.mrb[39].mxu1 }
0x2520   :  { %7257 = vmatmul.mubr.msk.bf16.vlgmr.msra.gmra.mrb[40].mxu0 %vm553_vm5, %v4954_v0 }
0x2521   :  { %7260 = vmatprep.mubr.msk.bf16.mxu0 %vm7702_vm0, %v7701_v1 }
0x2523   :  { %v4940_v51 = vpop.f32.mrb[40].mxu1 }
0x2524   :  { %v7248_v15 = vpop.f32.mrb[41].mxu1 }
0x2525   :  { %v4943_v19 = vpop.f32.mrb[42].mxu1 }
0x2526   :  { %v4955_v47 = vpack.c.bf16 %v4943_v19, %v4940_v51  ;;  %v7249_v60 = vpop.f32.mrb[43].mxu1 }
0x2528   :  { %7261 = vmatmul.mubr.msk.bf16.gmra.mrb[44].mxu0 %vm553_vm5, %v4955_v47 }
0x2529   :  { %7264 = vmatprep.mubr.msk.bf16.mxu0 %vm7702_vm0, %v7701_v1 }
0x252b   :  { %v4948_v22 = vpop.f32.mrb[44].mxu1 }
0x252c   :  { %v7252_v10 = vpop.f32.mrb[45].mxu1  ;;  %v4956_v24 = vpack.c.bf16 %v4948_v22, %v4948_v22 }
0x252d   :  { %v4951_v31 = vpop.f32.mrb[46].mxu1 }
0x252e   :  { %v7253_v4 = vpop.f32.mrb[47].mxu1 }
0x2530   :  { %7265 = vmatmul.mubr.msk.bf16.gmra.mrb[48].mxu0 %vm553_vm5, %v4956_v24 }
0x2531   :  { %7300 = vmatprep.mubr.msk.bf16.mxu0 %vm7702_vm0, %v7701_v1 }
0x25f3   :  { %v5005_v48 = vpop.f32.mrb[40].mxu0 }
0x25f4   :  { %v5027_v5 = vadd.f32 %v5005_v48, %v9344_v53  ;;  %v7258_v8 = vpop.f32.mrb[41].mxu0 }
0x25f5   :  { %v5008_v36 = vpop.f32.mrb[42].mxu0 }
0x25f6   :  { %v5040_v2 = vadd.f32 %v6073_v29, %v5027_v5  ;;  %v5028_v33 = vadd.f32 %v5008_v36, %v9347_v52  ;;  %v7259_v35 = vpop.f32.mrb[43].mxu0  ;;  %v7423_v5 = vld [vmem:[%s9622_s18 + $0x18] sm:$0xff]  }
0x25f8   :  { %v5053_v45 = vmul.f32 %v6075_v42, %v5040_v2  ;;  %v5041_v30 = vadd.f32 %v6073_v29, %v5028_v33 }
0x25fa   :  { %v5054_v23 = vmul.f32 %v6075_v42, %v5041_v30  ;;  %v9441_v41 = vadd.f32 %v5053_v45, %v8703_v21 }
0x25fb   :  { %v5013_v57 = vpop.f32.mrb[44].mxu0 }
0x25fc   :  { %v5029_v18 = vadd.f32 %v5013_v57, %v9350_v55  ;;  %v7262_v53 = vpop.f32.mrb[45].mxu0  ;;  %v5067_v43 = vsel %vm208_vm2, %v9441_v41, 0.0  ;;  %v9447_v50 = vadd.f32 %v5054_v23, %v8706_v25 }
0x25fd   :  { %5068 = vadd.xlane.f32.xlu0 %v5067_v43  ;;  %v5016_v9 = vpop.f32.mrb[46].mxu0 }
0x25fe   :  { %v5042_v52 = vadd.f32 %v6073_v29, %v5029_v18  ;;  %v5030_v59 = vadd.f32 %v5016_v9, %v9353_v38  ;;  %v7263_v12 = vpop.f32.mrb[47].mxu0  ;;  %v5070_v21 = vsel %vm208_vm2, %v9447_v50, 0.0  ;;  %v6078_v9 = vld [vmem:[%s9620_s16 + $0x1] ss:$0 sm:$0xff] }
0x25ff   :  { %5071 = vadd.xlane.f32.xlu1 %v5070_v21 }
0x2600   :  { %v5055_v17 = vmul.f32 %v6075_v42, %v5042_v52  ;;  %v5043_v46 = vadd.f32 %v6073_v29, %v5030_v59 }
0x2602   :  { %v5056_v55 = vmul.f32 %v6075_v42, %v5043_v46  ;;  %v9453_v39 = vadd.f32 %v5055_v17, %v8713_v37 }
0x2603   :  { %v5021_v40 = vpop.f32.mrb[48].mxu0 }
0x2604   :  { %v5031_v25 = vadd.f32 %v5021_v40, %v9356_v49  ;;  %v7266_v28 = vpop.f32.mrb[49].mxu0  ;;  %v5073_v16 = vsel %vm208_vm2, %v9453_v39, 0.0  ;;  %v9459_v38 = vadd.f32 %v5056_v55, %v8716_v54  ;;  %v6079_v55 = vld [vmem:[%s9621_s17 + $0x1] ss:$0 sm:$0xff] }
0x2605   :  { %5074 = vadd.xlane.f32.xlu0 %v5073_v16  ;;  %v5024_v32 = vpop.f32.mrb[50].mxu0 }
0x2606   :  { %v5044_v11 = vadd.f32 %v6073_v29, %v5031_v25  ;;  %v7267_v3 = vpop.f32.mrb[51].mxu0  ;;  %v5076_v63 = vsel %vm208_vm2, %v9459_v38, 0.0  ;;  %v7422_v29 = vld [vmem:[%s9622_s18 + $0x10] sm:$0xff]  }
0x2607   :  { %5077 = vadd.xlane.f32.xlu1 %v5076_v63  ;;  %7269 = vmatpush3.bf16.msra.mxu1 %v7422_v29 }
0x2608   :  { %v5057_v37 = vmul.f32 %v6075_v42, %v5044_v11  ;;  %7270 = vmatprep.subr.bf16.mxu1 %v7701_v1 }
0x260a   :  { %v9464_v44 = vadd.f32 %v5057_v37, %v8723_v56 }
0x260b   :  { %7271 = vmatpush3.bf16.msra.mxu1 %v7423_v5 }
0x260c   :  { %v5079_v49 = vsel %vm221_vm3, %v9464_v44, 0.0 }
0x260d   :  { %5080 = vadd.xlane.f32.xlu0 %v5079_v49 }
0x268a   :  { %v5069_v27 = vpop.xlane.xlu0 %5068 }
0x268b   :  { %v5082_v58 = vmul.f32 0.03125, %v5069_v27 }
0x268c   :  { %v5072_v54 = vpop.xlane.xlu1 %5071 }
0x268d   :  { %v5087_v6 = vsub.f32 %v9441_v41, %v5082_v58  ;;  %v5083_v34 = vmul.f32 0.03125, %v5072_v54 }
0x268f   :  { %v5088_v14 = vsub.f32 %v9447_v50, %v5083_v34  ;;  %v5092_v61 = vmul.f32 %v5087_v6, %v5087_v6 }
0x2691   :  { %v5097_v13 = vsel %vm208_vm2, %v5092_v61, 0.0  ;;  %v5093_v7 = vmul.f32 %v5088_v14, %v5088_v14 }
0x2692   :  { %v5075_v62 = vpop.xlane.xlu0 %5074  ;;  %5098 = vadd.xlane.f32.xlu1 %v5097_v13 }
0x2693   :  { %v5084_v56 = vmul.f32 0.03125, %v5075_v62  ;;  %v5100_v20 = vsel %vm208_vm2, %v5093_v7, 0.0  ;;  %v7424_v62 = vld [vmem:[%s9624_s20 + $0x40] sm:$0xff]  }
0x2694   :  { %v5078_v0 = vpop.xlane.xlu1 %5077  ;;  %5101 = vadd.xlane.f32.xlu0 %v5100_v20  ;;  %7285 = vmatpush3.bf16.msra.mxu0 %v7424_v62  ;;  %v7426_v20 = vld [vmem:[%s9624_s20 + $0x50] sm:$0xff]  }
0x2695   :  { %v5089_v26 = vsub.f32 %v9453_v39, %v5084_v56  ;;  %v5085_v51 = vmul.f32 0.03125, %v5078_v0  ;;  %7286 = vmatprep.subr.bf16.mxu0 %v7701_v1  ;;  %v7425_v56 = vld [vmem:[%s9624_s20 + $0x48] sm:$0xff]   ;;  %v7427_v0 = vld [vmem:[%s9624_s20 + $0x58] sm:$0xff]  }
0x2697   :  { %v5090_v15 = vsub.f32 %v9459_v38, %v5085_v51  ;;  %v5094_v19 = vmul.f32 %v5089_v26, %v5089_v26  ;;  %v7429_v51 = vld [vmem:[%s9624_s20 + $0x68] sm:$0xff]  }
0x2698   :  { %7287 = vmatpush3.bf16.msra.mxu0 %v7425_v56 }
0x2699   :  { %v5103_v47 = vsel %vm208_vm2, %v5094_v19, 0.0  ;;  %v5095_v60 = vmul.f32 %v5090_v15, %v5090_v15  ;;  %7288 = vmatprep.subr.bf16.mxu0 %v7701_v1  ;;  %v7431_v19 = vld [vmem:[%s9624_s20 + $0x78] sm:$0xff]  }
0x269a   :  { %5104 = vadd.xlane.f32.xlu1 %v5103_v47  ;;  %v5081_v22 = vpop.xlane.xlu0 %5080  ;;  %v6085_v47 = vld [vmem:[%s9623_s19 + $0x1] ss:$0 sm:$0xff] }
0x269b   :  { %v5086_v10 = vmul.f32 0.03125, %v5081_v22  ;;  %v5106_v31 = vsel %vm208_vm2, %v5095_v60, 0.0 }
0x269c   :  { %5107 = vadd.xlane.f32.xlu0 %v5106_v31  ;;  %7289 = vmatpush3.bf16.msra.mxu0 %v7426_v20 }
0x269d   :  { %v5091_v24 = vsub.f32 %v9464_v44, %v5086_v10  ;;  %7290 = vmatprep.subr.bf16.mxu0 %v7701_v1 }
0x269f   :  { %v5096_v4 = vmul.f32 %v5091_v24, %v5091_v24 }
0x26a0   :  { %7291 = vmatpush3.bf16.msra.mxu0 %v7427_v0 }
0x26a1   :  { %v5109_v48 = vsel %vm221_vm3, %v5096_v4, 0.0  ;;  %7292 = vmatprep.subr.bf16.mxu0 %v7701_v1 }
0x26a2   :  { %5110 = vadd.xlane.f32.xlu1 %v5109_v48 }
0x271f   :  { %v5099_v8 = vpop.xlane.xlu1 %5098 }
0x2720   :  { %v5112_v42 = vmul.f32 0.03125, %v5099_v8 }
0x2721   :  { %v5102_v36 = vpop.xlane.xlu0 %5101 }
0x2722   :  { %v5117_v2 = vadd.f32 1e-06, %v5112_v42  ;;  %v5113_v33 = vmul.f32 0.03125, %v5102_v36 }
0x2724   :  { %7632 = vrsqrt.f32 %v5117_v2  ;;  %v5118_v35 = vadd.f32 1e-06, %v5113_v33 }
0x2726   :  { %7634 = vrsqrt.f32 %v5118_v35 }
0x2727   :  { %v5105_v45 = vpop.xlane.xlu1 %5104 }
0x2728   :  { %v5114_v30 = vmul.f32 0.03125, %v5105_v45 }
0x2729   :  { %v5108_v23 = vpop.xlane.xlu0 %5107 }
0x272a   :  { %v5119_v57 = vadd.f32 1e-06, %v5114_v30  ;;  %v5115_v18 = vmul.f32 0.03125, %v5108_v23 }
0x272c   :  { %7636 = vrsqrt.f32 %v5119_v57  ;;  %v5120_v53 = vadd.f32 1e-06, %v5115_v18 }
0x272e   :  { %v7633_v43 = vpop.eup %7632  ;;  %7638 = vrsqrt.f32 %v5120_v53 }
0x272f   :  { %v5127_v52 = vmul.f32 %v7633_v43, %v5087_v6  ;;  %v5111_v59 = vpop.xlane.xlu1 %5110 }
0x2730   :  { %v7635_v12 = vpop.eup %7634  ;;  %v5116_v21 = vmul.f32 0.03125, %v5111_v59 }
0x2731   :  { %v5138_v17 = vmul.f32 %v6078_v9, %v5127_v52  ;;  %v5128_v46 = vmul.f32 %v7635_v12, %v5088_v14 }
0x2732   :  { %v5121_v40 = vadd.f32 1e-06, %v5116_v21 }
0x2733   :  { %v5139_v25 = vmul.f32 %v6078_v9, %v5128_v46  ;;  %v5149_v28 = vadd.f32 %v6079_v55, %v5138_v17 }
0x2734   :  { %7640 = vrsqrt.f32 %v5121_v40 }
0x2735   :  { %v5150_v16 = vadd.f32 %v6079_v55, %v5139_v25 }
0x2736   :  { %v7637_v32 = vpop.eup %7636 }
0x2737   :  { %v5154_v11 = vpack.c.bf16 %v5150_v16, %v5149_v28  ;;  %v5129_v3 = vmul.f32 %v7637_v32, %v5089_v26  ;;  %v7428_v26 = vld [vmem:[%s9624_s20 + $0x60] sm:$0xff]  }
0x2738   :  { %v7639_v63 = vpop.eup %7638  ;;  %7293 = vmatpush3.bf16.msra.mxu0 %v7428_v26 }
0x2739   :  { %v5140_v37 = vmul.f32 %v6078_v9, %v5129_v3  ;;  %v5130_v49 = vmul.f32 %v7639_v63, %v5090_v15  ;;  %7273 = vmatmul.mubr.msk.bf16.vlgmr.msra.gmra.mrb[48].mxu1 %vm208_vm2, %v5154_v11  ;;  %7294 = vmatprep.subr.bf16.mxu0 %v7701_v1  ;;  %v7430_v15 = vld [vmem:[%s9624_s20 + $0x70] sm:$0xff]  }
0x273a   :  { %7276 = vmatprep.mubr.msk.bf16.mxu1 %vm7702_vm0, %v7701_v1 }
0x273b   :  { %v5141_v27 = vmul.f32 %v6078_v9, %v5130_v49  ;;  %v5151_v58 = vadd.f32 %v6079_v55, %v5140_v37 }
0x273c   :  { %7295 = vmatpush3.bf16.msra.mxu0 %v7429_v51 }
0x273d   :  { %v5152_v54 = vadd.f32 %v6079_v55, %v5141_v27  ;;  %7296 = vmatprep.subr.bf16.mxu0 %v7701_v1 }
0x273e   :  { %v7641_v6 = vpop.eup %7640 }
0x273f   :  { %v5155_v34 = vpack.c.bf16 %v5152_v54, %v5151_v58  ;;  %v5131_v14 = vmul.f32 %v7641_v6, %v5091_v24 }
0x2740   :  { %7297 = vmatpush3.bf16.msra.mxu0 %v7430_v15 }
0x2741   :  { %v5142_v61 = vmul.f32 %v6078_v9, %v5131_v14  ;;  %7277 = vmatmul.mubr.msk.bf16.gmra.mrb[52].mxu1 %vm208_vm2, %v5155_v34  ;;  %7298 = vmatprep.subr.bf16.mxu0 %v7701_v1 }
0x2742   :  { %7280 = vmatprep.mubr.msk.bf16.mxu1 %vm7702_vm0, %v7701_v1 }
0x2743   :  { %v5153_v13 = vadd.f32 %v6079_v55, %v5142_v61 }
0x2744   :  { %7299 = vmatpush3.bf16.msra.mxu0 %v7431_v19 }
0x2745   :  { %v5156_v7 = vpack.c.bf16 %v5153_v13, %v5153_v13 }
0x2749   :  { %7281 = vmatmul.mubr.msk.bf16.gmra.mrb[56].mxu1 %vm208_vm2, %v5156_v7 }
0x274a   :  { %7322 = vmatprep.mubr.msk.f32.mxu1 %vm7702_vm0, %v7701_v1 }
0x280c   :  { %v5225_v60 = vpop.f32.mrb[48].mxu1 }
0x280d   :  { %v5226_v22 = vadd.f32 %v6085_v47, %v5225_v60  ;;  %v7274_v10 = vpop.f32.mrb[49].mxu1 }
0x280e   :  { %v5228_v31 = vpop.f32.mrb[50].mxu1 }
0x280f   :  { %v5252_v24 = vmul.f32 0.044715, %v5226_v22  ;;  %v5229_v4 = vadd.f32 %v6085_v47, %v5228_v31  ;;  %v7275_v48 = vpop.f32.mrb[51].mxu1  ;;  %v5247_v34 = vmul.f32 0.5, %v5226_v22 }
0x2811   :  { %v5257_v29 = vmul.f32 %v5252_v24, %v5226_v22  ;;  %v5253_v5 = vmul.f32 0.044715, %v5229_v4  ;;  %v5248_v14 = vmul.f32 0.5, %v5229_v4 }
0x2813   :  { %v5262_v8 = vmul.f32 %v5257_v29, %v5226_v22  ;;  %v5258_v42 = vmul.f32 %v5253_v5, %v5229_v4  ;;  %v6108_v29 = vld [vmem:[%s9625_s21 + $0x1] ss:$0 sm:$0xff] }
0x2814   :  { %v5233_v36 = vpop.f32.mrb[52].mxu1 }
0x2815   :  { %v5267_v2 = vadd.f32 %v5262_v8, %v5226_v22  ;;  %v5263_v33 = vmul.f32 %v5258_v42, %v5229_v4  ;;  %v5234_v35 = vadd.f32 %v6085_v47, %v5233_v36  ;;  %v7278_v45 = vpop.f32.mrb[53].mxu1  ;;  %v6118_v8 = vld [vmem:[%s9626_s22 + $0x1] ss:$0 sm:$0xff] }
0x2816   :  { %v5236_v30 = vpop.f32.mrb[54].mxu1 }
0x2817   :  { %v5272_v23 = vmul.f32 0.7978846, %v5267_v2  ;;  %v5268_v57 = vadd.f32 %v5263_v33, %v5229_v4  ;;  %v5254_v18 = vmul.f32 0.044715, %v5234_v35  ;;  %v7279_v53 = vpop.f32.mrb[55].mxu1  ;;  %v5237_v43 = vadd.f32 %v6085_v47, %v5236_v30 }
0x2818   :  { %v5249_v51 = vmul.f32 0.5, %v5234_v35 }
0x2819   :  { %7642 = vtanh.f32 %v5272_v23  ;;  %v5273_v9 = vmul.f32 0.7978846, %v5268_v57  ;;  %v5259_v52 = vmul.f32 %v5254_v18, %v5234_v35  ;;  %v5255_v59 = vmul.f32 0.044715, %v5237_v43 }
0x281a   :  { %v5250_v15 = vmul.f32 0.5, %v5237_v43 }
0x281b   :  { %7644 = vtanh.f32 %v5273_v9  ;;  %v5264_v12 = vmul.f32 %v5259_v52, %v5234_v35  ;;  %v5260_v21 = vmul.f32 %v5255_v59, %v5237_v43 }
0x281c   :  { %v5241_v17 = vpop.f32.mrb[56].mxu1 }
0x281d   :  { %v5269_v46 = vadd.f32 %v5264_v12, %v5234_v35  ;;  %v5242_v55 = vadd.f32 %v6085_v47, %v5241_v17  ;;  %v7282_v40 = vpop.f32.mrb[57].mxu1  ;;  %v5265_v25 = vmul.f32 %v5260_v21, %v5237_v43 }
0x281e   :  { %v5244_v28 = vpop.f32.mrb[58].mxu1 }
0x281f   :  { %v5274_v16 = vmul.f32 0.7978846, %v5269_v46  ;;  %v5256_v32 = vmul.f32 0.044715, %v5242_v55  ;;  %v7283_v11 = vpop.f32.mrb[59].mxu1  ;;  %v5270_v3 = vadd.f32 %v5265_v25, %v5237_v43  ;;  %v5251_v24 = vmul.f32 0.5, %v5242_v55 }
0x2821   :  { %7646 = vtanh.f32 %v5274_v16  ;;  %v5261_v63 = vmul.f32 %v5256_v32, %v5242_v55  ;;  %v5275_v37 = vmul.f32 0.7978846, %v5270_v3 }
0x2823   :  { %v7643_v49 = vpop.eup %7642  ;;  %v5266_v27 = vmul.f32 %v5261_v63, %v5242_v55  ;;  %7648 = vtanh.f32 %v5275_v37 }
0x2824   :  { %v5282_v58 = vadd.f32 1.0, %v7643_v49 }
0x2825   :  { %v7645_v54 = vpop.eup %7644  ;;  %v5271_v6 = vadd.f32 %v5266_v27, %v5242_v55 }
0x2826   :  { %v5283_v61 = vadd.f32 1.0, %v7645_v54  ;;  %v5287_v7 = vmul.f32 %v5282_v58, %v5247_v34 }
0x2827   :  { %v5276_v13 = vmul.f32 0.7978846, %v5271_v6 }
0x2828   :  { %v5288_v62 = vmul.f32 %v5283_v61, %v5248_v14 }
0x2829   :  { %7650 = vtanh.f32 %v5276_v13 }
0x282a   :  { %v5292_v56 = vpack.c.bf16 %v5288_v62, %v5287_v7 }
0x282b   :  { %v7647_v20 = vpop.eup %7646 }
0x282c   :  { %7301 = vmatmul.mubr.bf16.vlgmr.msra.gmra.mrb[52].mxu0 %v5292_v56  ;;  %v5284_v0 = vadd.f32 1.0, %v7647_v20 }
0x282d   :  { %7304 = vmatprep.mubr.msk.bf16.mxu0 %vm7702_vm0, %v7701_v1  ;;  %v7649_v26 = vpop.eup %7648 }
0x282e   :  { %v5285_v19 = vadd.f32 1.0, %v7649_v26  ;;  %v5289_v47 = vmul.f32 %v5284_v0, %v5249_v51 }
0x2830   :  { %v5290_v60 = vmul.f32 %v5285_v19, %v5250_v15 }
0x2832   :  { %v5293_v10 = vpack.c.bf16 %v5290_v60, %v5289_v47 }
0x2833   :  { %v7651_v22 = vpop.eup %7650 }
0x2834   :  { %v5286_v31 = vadd.f32 1.0, %v7651_v22  ;;  %7305 = vmatmul.mubr.bf16.gmra.mrb[56].mxu0 %v5293_v10 }
0x2835   :  { %7308 = vmatprep.mubr.msk.bf16.mxu0 %vm7702_vm0, %v7701_v1 }
0x2836   :  { %v5291_v4 = vmul.f32 %v5286_v31, %v5251_v24  ;;  %v7703_v31 = vmov 0.0|0.0  }
0x2837   :  { %7336 = vmatprep.subr.bf16.mxu1 %v7703_v31 }
0x2838   :  { %v5294_v48 = vpack.c.bf16 %v5291_v4, %v5291_v4 }
0x283c   :  { %7309 = vmatmul.mubr.bf16.gmra.mrb[60].mxu0 %v5294_v48 }
0x28ff   :  { %v5402_v5 = vpop.f32.mrb[52].mxu0 }
0x2900   :  { %v5403_v42 = vadd.f32 %v6108_v29, %v5402_v5  ;;  %v7302_v36 = vpop.f32.mrb[53].mxu0 }
0x2901   :  { %v5405_v2 = vpop.f32.mrb[54].mxu0 }
0x2902   :  { %v5432_v33 = vmul.f32 %v6118_v8, %v5403_v42  ;;  %v5406_v35 = vadd.f32 %v6108_v29, %v5405_v2  ;;  %v7303_v45 = vpop.f32.mrb[55].mxu0 }
0x2904   :  { %v5433_v30 = vmul.f32 %v6118_v8, %v5406_v35  ;;  %v5437_v23 = vadd.f32 %v5432_v33, %v9441_v41 }
0x2906   :  { %v5444_v57 = vsel %vm208_vm2, %v5437_v23, 0.0  ;;  %v5438_v18 = vadd.f32 %v5433_v30, %v9447_v50 }
0x2907   :  { %5445 = vadd.xlane.f32.xlu0 %v5444_v57  ;;  %v5410_v53 = vpop.f32.mrb[56].mxu0 }
0x2908   :  { %v5447_v43 = vsel %vm208_vm2, %v5438_v18, 0.0  ;;  %v5411_v9 = vadd.f32 %v6108_v29, %v5410_v53  ;;  %v7306_v52 = vpop.f32.mrb[57].mxu0 }
0x2909   :  { %5448 = vadd.xlane.f32.xlu1 %v5447_v43  ;;  %v5413_v59 = vpop.f32.mrb[58].mxu0 }
0x290a   :  { %v5434_v12 = vmul.f32 %v6118_v8, %v5411_v9  ;;  %v5414_v21 = vadd.f32 %v6108_v29, %v5413_v59  ;;  %v7307_v17 = vpop.f32.mrb[59].mxu0  ;;  %v6120_v59 = vld [vmem:[%s9628_s24] ss:$0 sm:$0xff] }
0x290c   :  { %v5435_v46 = vmul.f32 %v6118_v8, %v5414_v21  ;;  %v5439_v55 = vadd.f32 %v5434_v12, %v9453_v39 }
0x290e   :  { %v5450_v41 = vsel %vm208_vm2, %v5439_v55, 0.0  ;;  %v5440_v40 = vadd.f32 %v5435_v46, %v9459_v38 }
0x290f   :  { %5451 = vadd.xlane.f32.xlu0 %v5450_v41  ;;  %v5418_v50 = vpop.f32.mrb[60].mxu0 }
0x2910   :  { %v5419_v25 = vadd.f32 %v6108_v29, %v5418_v50  ;;  %v7310_v28 = vpop.f32.mrb[61].mxu0  ;;  %v5453_v16 = vsel %vm208_vm2, %v5440_v40, 0.0 }
0x2911   :  { %5454 = vadd.xlane.f32.xlu1 %v5453_v16  ;;  %v5421_v32 = vpop.f32.mrb[62].mxu0 }
0x2912   :  { %v5436_v11 = vmul.f32 %v6118_v8, %v5419_v25  ;;  %v7311_v3 = vpop.f32.mrb[63].mxu0 }
0x2914   :  { %v5441_v63 = vadd.f32 %v5436_v11, %v9464_v44 }
0x2916   :  { %v5456_v37 = vsel %vm221_vm3, %v5441_v63, 0.0 }
0x2917   :  { %5457 = vadd.xlane.f32.xlu0 %v5456_v37 }
0x2994   :  { %v5446_v39 = vpop.xlane.xlu0 %5445 }
0x2995   :  { %v5459_v49 = vmul.f32 0.03125, %v5446_v39  ;;  %v5609_v39 = vld [vmem:[%s9629_s25] sm:$0xff] }
0x2996   :  { %v5449_v27 = vpop.xlane.xlu1 %5448 }
0x2997   :  { %v5464_v58 = vsub.f32 %v5437_v23, %v5459_v49  ;;  %v5460_v38 = vmul.f32 0.03125, %v5449_v27  ;;  %v6119_v23 = vld [vmem:[%s9627_s23] ss:$0 sm:$0xff]  ;;  %v5610_v49 = vld [vmem:[%s9629_s25 + $0x8] sm:$0xff] }
0x2999   :  { %v5465_v54 = vsub.f32 %v5438_v18, %v5460_v38  ;;  %v5469_v6 = vmul.f32 %v5464_v58, %v5464_v58  ;;  %v5531_v38 = vld [vmem:[%s9668_s28] sm:$0x3] }
0x299b   :  { %v5474_v34 = vsel %vm208_vm2, %v5469_v6, 0.0  ;;  %v5470_v14 = vmul.f32 %v5465_v54, %v5465_v54  ;;  %v5611_v6 = vld [vmem:[%s9629_s25 + $0x10] sm:$0xff] }
0x299c   :  { %5475 = vadd.xlane.f32.xlu1 %v5474_v34  ;;  %v5452_v61 = vpop.xlane.xlu0 %5451  ;;  %v5612_v34 = vld [vmem:[%s9629_s25 + $0x18] sm:$0xff]  ;;  %s7704_s25 = smov [#allocation2]  }
0x299d   :  { %v5477_v13 = vsel %vm208_vm2, %v5470_v14, 0.0  ;;  %v5461_v7 = vmul.f32 0.03125, %v5452_v61  ;;  %v7346_v14 = vpack.c.bf16 %v5612_v34, %v5611_v6  ;;  %s5701_s3 = sshll.u32 %s7704_s25, 4  ;;  %s5702_s3 = int_to_ptr.vmem [resolvable:$true] %s5701_s3 }
0x299e   :  { %5478 = vadd.xlane.f32.xlu0 %v5477_v13  ;;  %v5455_v44 = vpop.xlane.xlu1 %5454  ;;  %s7677_s13 = scalar_lea.vmem %s5702_s3, 32  ;;  %p7682_p1 = scmp.lt.s32.totalorder %s5702_s3, %s5702_s3 }
0x299f   :  { %v5466_v62 = vsub.f32 %v5439_v55, %v5461_v7  ;;  %v5462_v56 = vmul.f32 0.03125, %v5455_v44  ;;  %v6123_v7 = vld [vmem:[%s9630_s26] ss:$0 sm:$0xff]  ;;  %p7678_p0 = scmp.ne.s32.totalorder %s5702_s3, %s7677_s13  ;;  %p7683_p2 = scmp.lt.s32.totalorder %s7677_s13, %s7677_s13 }
0x29a1   :  { %v5467_v20 = vsub.f32 %v5440_v40, %v5462_v56  ;;  %v5471_v0 = vmul.f32 %v5466_v62, %v5466_v62  ;;  %p7684_p3 = por %p7683_p2, %p7682_p1 }
0x29a3   :  { %v5480_v26 = vsel %vm208_vm2, %v5471_v0, 0.0  ;;  %v5472_v51 = vmul.f32 %v5467_v20, %v5467_v20  ;;  %p7685_p4 = pnand %p7684_p3, %p7678_p0 }
0x29a4   :  { %5481 = vadd.xlane.f32.xlu1 %v5480_v26  ;;  %v5458_v15 = vpop.xlane.xlu0 %5457 }
0x29a5   :  { %v5463_v19 = vmul.f32 0.03125, %v5458_v15  ;;  %v5483_v47 = vsel %vm208_vm2, %v5472_v51, 0.0 }
0x29a6   :  { %5484 = vadd.xlane.f32.xlu0 %v5483_v47 }
0x29a7   :  { %v5468_v60 = vsub.f32 %v5441_v63, %v5463_v19 }
0x29a9   :  { %v5473_v22 = vmul.f32 %v5468_v60, %v5468_v60 }
0x29ab   :  { %v5486_v10 = vsel %vm221_vm3, %v5473_v22, 0.0 }
0x29ac   :  { %5487 = vadd.xlane.f32.xlu1 %v5486_v10 }
0x2a29   :  { %v5476_v24 = vpop.xlane.xlu1 %5475 }
0x2a2a   :  { %v5489_v4 = vmul.f32 0.03125, %v5476_v24 }
0x2a2b   :  { %v5479_v48 = vpop.xlane.xlu0 %5478 }
0x2a2c   :  { %v5494_v29 = vadd.f32 1e-06, %v5489_v4  ;;  %v5490_v5 = vmul.f32 0.03125, %v5479_v48 }
0x2a2e   :  { %7652 = vrsqrt.f32 %v5494_v29  ;;  %v5495_v8 = vadd.f32 1e-06, %v5490_v5 }
0x2a30   :  { %7654 = vrsqrt.f32 %v5495_v8 }
0x2a31   :  { %v5482_v42 = vpop.xlane.xlu1 %5481 }
0x2a32   :  { %v5491_v36 = vmul.f32 0.03125, %v5482_v42 }
0x2a33   :  { %v5485_v2 = vpop.xlane.xlu0 %5484 }
0x2a34   :  { %v5496_v33 = vadd.f32 1e-06, %v5491_v36  ;;  %v5492_v35 = vmul.f32 0.03125, %v5485_v2 }
0x2a36   :  { %7656 = vrsqrt.f32 %v5496_v33  ;;  %v5497_v45 = vadd.f32 1e-06, %v5492_v35 }
0x2a38   :  { %v7653_v30 = vpop.eup %7652  ;;  %7658 = vrsqrt.f32 %v5497_v45 }
0x2a39   :  { %v5504_v57 = vmul.f32 %v7653_v30, %v5464_v58  ;;  %v5488_v53 = vpop.xlane.xlu1 %5487 }
0x2a3a   :  { %v7655_v18 = vpop.eup %7654  ;;  %v5493_v9 = vmul.f32 0.03125, %v5488_v53 }
0x2a3b   :  { %v5505_v43 = vmul.f32 %v7655_v18, %v5465_v54  ;;  %v5515_v52 = vmul.f32 %v6119_v23, %v5504_v57  ;;  %v7343_v54 = vpack.c.bf16 %v5610_v49, %v5609_v39 }
0x2a3c   :  { %v5498_v12 = vadd.f32 1e-06, %v5493_v9 }
0x2a3d   :  { %v5516_v21 = vmul.f32 %v6119_v23, %v5505_v43  ;;  %v5526_v17 = vadd.f32 %v6120_v59, %v5515_v52 }
0x2a3e   :  { %7660 = vrsqrt.f32 %v5498_v12 }
0x2a3f   :  { %v5527_v46 = vadd.f32 %v6120_v59, %v5516_v21 }
0x2a40   :  { %v7657_v55 = vpop.eup %7656 }
0x2a41   :  { %v7337_v41 = vpack.c.bf16 %v5527_v46, %v5526_v17  ;;  %v5506_v40 = vmul.f32 %v7657_v55, %v5466_v62 }
0x2a42   :  { %v7659_v50 = vpop.eup %7658 }
0x2a43   :  { %7338 = vmatpush3.bf16.msra.mxu1 %v7337_v41  ;;  %v5507_v25 = vmul.f32 %v7659_v50, %v5467_v20  ;;  %v5517_v28 = vmul.f32 %v6119_v23, %v5506_v40 }
0x2a44   :  { %7339 = vmatprep.subr.bf16.mxu1 %v7703_v31 }
0x2a45   :  { %v5518_v16 = vmul.f32 %v6119_v23, %v5507_v25  ;;  %v5528_v32 = vadd.f32 %v6120_v59, %v5517_v28 }
0x2a47   :  { %v5529_v11 = vadd.f32 %v6120_v59, %v5518_v16 }
0x2a48   :  { %v7661_v3 = vpop.eup %7660 }
0x2a49   :  { %v5508_v63 = vmul.f32 %v7661_v3, %v5468_v60  ;;  %v7340_v37 = vpack.c.bf16 %v5529_v11, %v5528_v32 }
0x2a4b   :  { %v5519_v27 = vmul.f32 %v6119_v23, %v5508_v63  ;;  %7341 = vmatpush3.bf16.msra.mxu1 %v7340_v37 }
0x2a4c   :  { %7320 = vmatprep.subr.mxu1 %v7701_v1 }
0x2a4d   :  { %v5530_v58 = vadd.f32 %v6120_v59, %v5519_v27 }
0x2a4f   :  { %7321 = vmatpush3.msk.msra.mxu1 %vm5535_vm9, %v5530_v58 }
0x2a50   :  { %7323 = vmatmul.mubr.msk.f32.vlgmr.msra.gmra.mrb[60].mxu1 %vm628_vm6, %v5531_v38  ;;  %7342 = vmatprep.subr.bf16.mxu1 %v7703_v31 }
0x2a51   :  { %7344 = vmatpush3.bf16.msra.mxu1 %v7343_v54  ;;  %7333 = vmatprep.mubr.msk.f32.mxu1 %vm7702_vm0, %v7701_v1 }
0x2a52   :  { %7345 = vmatprep.subr.bf16.mxu1 %v7703_v31 }
0x2a55   :  { %7347 = vmatpush3.bf16.msra.mxu1 %v7346_v14 }
0x2b23   :  { %v5605_v61 = vpop.f32.mrb[60].mxu1 }
0x2b24   :  { %v7324_v13 = vpop.f32.mrb[61].mxu1  ;;  %7334 = vmatmul.mubr.msk.f32.vlgmr.msra.gmra.mrb[62].mxu1 %vm208_vm2, %v5605_v61 }
0x2bf7   :  { %v5689_v44 = vpop.f32.mrb[62].mxu1 }
0x2bf8   :  { %v5690_v62 = vadd.f32 %v6123_v7, %v5689_v44  ;;  %v7335_v56 = vpop.f32.mrb[63].mxu1 }
0x2bfa   :  { %5694 = vst.msk [vmem:[#allocation2] sm:$0x3] %vm5693_vm10, %v5690_v62 }
0x2bfb   :  { %7688 = shalt.err (!%p7685_p4)
}
0x2bfc   :  { %s9669_s6 = sld [smem:[#allocation17_spill]] }
0x2c02   :  { %s7689_s14 = scalar_lea.hbm %s9669_s6, 32 }
0x2c03   :  { %p7690_p5 = scmp.ne.s32.totalorder %s9669_s6, %s7689_s14  ;;  %p7693_p6 = scmp.lt.u32.totalorder %s7689_s14, %s9669_s6 }
0x2c05   :  { %p7695_p7 = pnand %p7693_p6, %p7690_p5 }
0x2c07   :  { %7698 = shalt.err (!%p7695_p7)
}
0x2c08   :  { %5704 = dma.vmem_to_hbm [thread:$0]  %s5702_s3, 32, %s9669_s6, [#allocation3]  }
0x2c09   :  { %7699 = dma.done.wait [#allocation3], 32  }
0x2c0a   :  { %7700 = vsyncadd [#allocation3], 4294967264 }
0x2c0b   :  { %5708 = vsyncpa [#allocation3], 1 }

</bundles_post_ra>
